<compile_context>
chip_gen: v6e
topology: v6e:2x2x1
jax: 0.10.0
libtpu: 0.0.40
codegen_flags: <defaults>
</compile_context>

<pallas_src>
import math

import jax
import jax.numpy as jnp
from jax import lax
from jax.experimental import pallas as pl
from jax.experimental.pallas import tpu as pltpu


def _round_up(a, b):
    return (a + b - 1) // b * b


def _pick_tiling(H2, W2):
    """Choose the padded quad-column count Wq and the output-row tile TR."""
    Wq = _round_up(W2 + 1, 32)                 # lane-friendly quad-row width
    tr_unit = 128 // math.gcd(Wq, 128)         # smallest TR with TR*Wq % 128 == 0
    # Keep >=2 row tiles when possible (v7x megacore at N==1) and bound the tile lane
    # width so a handful of (c2, (TR+1)*Wq) f32 planes fit comfortably in VMEM.
    cap = min(H2 // 2, max(tr_unit, 4096 // Wq))
    cap = (cap // tr_unit) * tr_unit
    if cap < tr_unit:                          # image too small to tile: single tile
        return Wq, H2, H2
    TR = None
    for tr in range(cap, 0, -tr_unit):         # prefer a TR that divides H2 exactly
        if H2 % tr == 0:
            TR = tr
            break
    if TR is None:
        TR = cap
    H2p = _round_up(H2, TR)
    return Wq, TR, H2p


def make_cbrm_kernel(c1, c2, Wq, TR, Kp):
    """Fused conv3x3(s2,p1) + BN + ReLU + maxpool3x3(s2,p1) for one output-row tile.

    x_ref : (1, 1, c1*16, (TR+3)*Wq)  4x4 space-to-depth phases of this tile's padded
                                      input slab (quad rows on lanes, flat).
    w_ref : (c2, Kp)                  conv weights (BN scale folded), zero K-padding.
    b_ref : (c2, 1)                   BN shift (per-output-channel bias), f32.
    o_ref : (1, c2, TR*Wq)            pooled output rows of this tile (flat (TR, Wq)).
    taps_ref : (4, Kp, (TR+1)*Wq)     VMEM scratch holding the staged tap slabs.
    """
    K = c1 * 9
    LTH = (TR + 1) * Wq                        # halo-extended plane (rows m0-1 .. m0+TR-1)
    LT = TR * Wq

    # Static tap tables per conv-output parity p = 2*ry + rx:
    # (phase-row index within the c1*16 block, lane offset within the tile slab).
    tap_tables = []
    for ry in range(2):
        for rx in range(2):
            taps = []
            for c in range(c1):
                for ky in range(3):
                    a = 2 * ry + ky
                    ro, pr = a // 4, a % 4
                    for kx in range(3):
                        b = 2 * rx + kx
                        co, pc = b // 4, b % 4
                        taps.append((c * 16 + pr * 4 + pc, ro * Wq + co))
            tap_tables.append(taps)

    def kernel(x_ref, w_ref, b_ref, o_ref, taps_ref):
        r = pl.program_id(1)

        w = w_ref[...]                         # (c2, Kp) bf16, resident across the grid
        bias = b_ref[...]                      # (c2, 1)  f32

        # ---- stage the 27 tap slabs per parity, contract on the MXU ----
        for p in range(4):
            for t, (ridx, off) in enumerate(tap_tables[p]):
                taps_ref[p, pl.ds(t, 1), :] = x_ref[0, 0, pl.ds(ridx, 1),
                                                    pl.ds(off, LTH)]
            if Kp > K:                         # zero K-padding rows (weights there are 0)
                taps_ref[p, pl.ds(K, Kp - K), :] = jnp.zeros(
                    (Kp - K, LTH), taps_ref.dtype)

        planes = []
        for p in range(4):
            y = jnp.dot(w, taps_ref[p], preferred_element_type=jnp.float32)
            planes.append(jnp.maximum(y + bias, 0.0))      # BN shift + ReLU
        y00, y01, y10, y11 = planes            # conv output at (row 2m+ry, col 2k+rx)

        # ---- 3x3 / stride-2 / pad-1 max pool on the parity planes ----
        # ReLU output >= 0, so 0 stands in for the pool's -inf padding (every window
        # contains at least one real element).
        lane = lax.broadcasted_iota(jnp.int32, (1, LTH), 1)
        col0 = (lane % Wq) == 0

        def shift_col(v):                      # v[:, (h,k)] -> v[:, (h,k-1)], 0 at k==0
            s = jnp.concatenate([jnp.zeros((c2, 1), v.dtype), v[:, :LTH - 1]], axis=1)
            return jnp.where(col0, 0.0, s)

        ce = jnp.maximum(jnp.maximum(y00, y01), shift_col(y01))   # conv row 2m
        cu = jnp.maximum(jnp.maximum(y10, y11), shift_col(y11))   # conv row 2m+1
        ec = jnp.maximum(ce, cu)

        # Output row m = m0+h pools conv rows {2m-1, 2m, 2m+1}:
        #   ec at plane row h+1 supplies rows 2m and 2m+1; cu at plane row h supplies
        #   row 2m-1.  For the first tile, plane row 0 is the pool's top padding row.
        prev = cu[:, :LT]
        lane_lt = lax.broadcasted_iota(jnp.int32, (1, LT), 1)
        prev = jnp.where(jnp.logical_and(r == 0, lane_lt < Wq), 0.0, prev)
        out = jnp.maximum(ec[:, Wq:], prev)                        # (c2, TR*Wq)

        o_ref[0] = out.astype(o_ref.dtype)

    return kernel


def cbrm_forward(x, params, eps=1e-5, compute_dtype=jnp.bfloat16):
    """CBRM forward. x: (N, c1, H, W) NCHW, H and W divisible by 4."""
    N, c1, H, W = x.shape
    assert H % 4 == 0 and W % 4 == 0, "this kernel assumes H, W divisible by 4"
    c2 = params['w'].shape[0]

    H2, W2 = H // 4, W // 4                    # pooled output size
    Wq, TR, H2p = _pick_tiling(H2, W2)
    R = H2p // TR
    LTH = (TR + 1) * Wq
    LT = TR * Wq
    Lt_in = (TR + 3) * Wq
    K = c1 * 9
    Kp = _round_up(K, 8)

    # ---- fold eval-mode BN into the conv weight / bias ----
    scale = params['gamma'] / jnp.sqrt(params['var'] + eps)
    shift = params['beta'] - params['mean'] * scale
    wf = (params['w'] * scale[:, None, None, None]).reshape(c2, K)
    w_pad = jnp.zeros((c2, Kp), jnp.float32).at[:, :K].set(wf).astype(compute_dtype)
    bf = shift.reshape(c2, 1).astype(jnp.float32)

    # ---- padded pixel grid + per-row-tile slabs + 4x4 space-to-depth ----
    # Rows: 4 zero rows (halo quad row) + 1 conv-pad row + H + bottom zeros.
    # Cols: 1 conv-pad col + W + right zeros.  Each row tile gets a (TR+3)-quad-row
    # slab so every in-kernel access is a static, contiguous lane-offset load.
    Hpad, Wpad = 4 * (H2p + 3), 4 * Wq
    xp = jnp.pad(x, ((0, 0), (0, 0), (5, Hpad - H - 5), (1, Wpad - W - 1)))
    slabs = [xp[:, :, 4 * TR * r: 4 * TR * r + 4 * (TR + 3), :] for r in range(R)]
    xt = jnp.stack(slabs, axis=2)                       # (N, c1, R, 4*(TR+3), Wpad)
    xt = xt.reshape(N, c1, R, TR + 3, 4, Wq, 4)
    xt = xt.transpose(0, 2, 1, 4, 6, 3, 5)              # (N, R, c1, pr, pc, qr, qc)
    xs = xt.reshape(N, R, c1 * 16, Lt_in).astype(compute_dtype)

    kernel = make_cbrm_kernel(c1, c2, Wq, TR, Kp)
    flops = 2 * N * R * 4 * c2 * Kp * LTH
    bytes_accessed = (xs.size * xs.dtype.itemsize
                      + w_pad.size * w_pad.dtype.itemsize
                      + bf.size * 4
                      + N * c2 * H2p * Wq * 4)

    out_flat = pl.pallas_call(
        kernel,
        out_shape=jax.ShapeDtypeStruct((N, c2, H2p * Wq), jnp.float32),
        grid=(N, R),
        in_specs=[
            pl.BlockSpec((1, 1, c1 * 16, Lt_in), lambda n, r: (n, r, 0, 0)),
            pl.BlockSpec((c2, Kp), lambda n, r: (0, 0)),   # resident folded weights
            pl.BlockSpec((c2, 1), lambda n, r: (0, 0)),    # resident folded bias
        ],
        out_specs=pl.BlockSpec((1, c2, LT), lambda n, r: (n, 0, r)),
        scratch_shapes=[pltpu.VMEM((4, Kp, LTH), compute_dtype)],
        compiler_params=pltpu.CompilerParams(
            dimension_semantics=("parallel", "parallel"),
            vmem_limit_bytes=48 * 1024 * 1024),
        cost_estimate=pl.CostEstimate(flops=int(flops), transcendentals=0,
                                      bytes_accessed=int(bytes_accessed)),
    )(xs, w_pad, bf)

    # flat (H2p, Wq) lane grid -> (H2, W2): drop junk pad rows / columns.
    return out_flat.reshape(N, c2, H2p, Wq)[:, :, :H2, :W2]


# ---------------- pure-JAX reference (PyTorch module semantics, eval BN) ----------------
# Inputs / folded weights are quantised to the same compute dtype as the kernel so the
# comparison isolates the kernel's indexing/fusion (f32 accumulation on both sides).
def cbrm_reference(x, params, eps=1e-5, compute_dtype=jnp.bfloat16):
    scale = params['gamma'] / jnp.sqrt(params['var'] + eps)
    shift = params['beta'] - params['mean'] * scale
    wq = (params['w'] * scale[:, None, None, None]).astype(compute_dtype).astype(jnp.float32)
    xq = x.astype(compute_dtype).astype(jnp.float32)
    y = lax.conv_general_dilated(xq, wq, (2, 2), ((1, 1), (1, 1)),
                                 dimension_numbers=('NCHW', 'OIHW', 'NCHW'),
                                 precision=lax.Precision.HIGHEST)
    y = y + shift[None, :, None, None]
    y = jnp.maximum(y, 0.0)
    y = lax.reduce_window(y, -jnp.inf, lax.max,
                          (1, 1, 3, 3), (1, 1, 2, 2),
                          ((0, 0), (0, 0), (1, 1), (1, 1)))
    return y


if __name__ == "__main__":
    key = jax.random.PRNGKey(0)
    N, c1, c2, H, W = 2, 3, 32, 16, 16         # CBRM(3, 32) stem, small spatial size
    ks = jax.random.split(key, 6)

    x = jax.random.normal(ks[0], (N, c1, H, W), jnp.float32)
    params = {
        'w': jax.random.normal(ks[1], (c2, c1, 3, 3), jnp.float32) * 0.3,
        'gamma': jax.random.uniform(ks[2], (c2,), jnp.float32, 0.5, 1.5),
        'beta': jax.random.normal(ks[3], (c2,), jnp.float32) * 0.1,
        'mean': jax.random.normal(ks[4], (c2,), jnp.float32) * 0.1,
        'var': jax.random.uniform(ks[5], (c2,), jnp.float32, 0.5, 1.5),
    }

    out = jax.block_until_ready(jax.jit(cbrm_forward)(x, params))
    ref = jax.block_until_ready(cbrm_reference(x, params))

    assert out.shape == (N, c2, H // 4, W // 4), out.shape
    max_err = float(jnp.max(jnp.abs(out - ref)))
    assert max_err < 1e-3, f"max abs error {max_err}"
    print("KERNEL_OK")
</pallas_src>

<mosaic_0001>
module attributes {stable_mosaic.version = 11 : i64} {
  func.func @kernel(%arg0: i32, %arg1: i32, %arg2: memref<1x1x48x224xbf16, #tpu.memory_space<vmem>>, %arg3: memref<32x32xbf16, #tpu.memory_space<vmem>>, %arg4: memref<32x1xf32, #tpu.memory_space<vmem>>, %arg5: memref<1x32x128xf32, #tpu.memory_space<vmem>>, %arg6: memref<4x32x160xbf16, #tpu.memory_space<vmem>>) attributes {dimension_semantics = [#tpu.dimension_semantics<parallel>, #tpu.dimension_semantics<parallel>], iteration_bounds = array<i64: 2, 1>, scalar_prefetch = 0 : i64, scratch_operands = 1 : i64, tpu.core_type = #tpu.core_type<tc>, window_params = [{transform_indices = @transform_0, window_bounds = array<i64: 1, 1, 48, 224>}, {pipeline_mode = #tpu.pipeline_mode<synchronous>, transform_indices = @transform_1, window_bounds = array<i64: 32, 32>}, {pipeline_mode = #tpu.pipeline_mode<synchronous>, transform_indices = @transform_2, window_bounds = array<i64: 32, 1>}, {transform_indices = @transform_3, window_bounds = array<i64: 1, 32, 128>}]} {
    %c0 = arith.constant 0 : index
    %c0_0 = arith.constant 0 : index
    %0 = vector.load %arg3[%c0, %c0_0] : memref<32x32xbf16, #tpu.memory_space<vmem>>, vector<32x32xbf16>
    %c0_1 = arith.constant 0 : index
    %c0_2 = arith.constant 0 : index
    %1 = vector.load %arg4[%c0_1, %c0_2] : memref<32x1xf32, #tpu.memory_space<vmem>>, vector<32x1xf32>
    %c0_3 = arith.constant 0 : index
    %c0_4 = arith.constant 0 : index
    %c0_5 = arith.constant 0 : index
    %c0_6 = arith.constant 0 : index
    %2 = vector.load %arg2[%c0_3, %c0_4, %c0_5, %c0_6] : memref<1x1x48x224xbf16, #tpu.memory_space<vmem>>, vector<1x1x1x160xbf16>
    %3 = vector.shape_cast %2 : vector<1x1x1x160xbf16> to vector<1x160xbf16>
    %c0_7 = arith.constant 0 : index
    %c0_8 = arith.constant 0 : index
    %c0_9 = arith.constant 0 : index
    %4 = vector.load %arg6[%c0_7, %c0_8, %c0_9] : memref<4x32x160xbf16, #tpu.memory_space<vmem>>, vector<1x1x160xbf16>
    %5 = vector.shape_cast %4 : vector<1x1x160xbf16> to vector<1x160xbf16>
    %6 = vector.shape_cast %3 : vector<1x160xbf16> to vector<1x1x160xbf16>
    tpu.vector_store %arg6[%c0_7, %c0_8, %c0_9], %6 {strides = array<i32>} : memref<4x32x160xbf16, #tpu.memory_space<vmem>>, vector<1x1x160xbf16>,
    %c0_10 = arith.constant 0 : index
    %c0_11 = arith.constant 0 : index
    %c1 = arith.constant 1 : index
    %c0_12 = arith.constant 0 : index
    %7 = vector.load %arg2[%c0_10, %c0_11, %c1, %c0_12] : memref<1x1x48x224xbf16, #tpu.memory_space<vmem>>, vector<1x1x1x160xbf16>
    %8 = vector.shape_cast %7 : vector<1x1x1x160xbf16> to vector<1x160xbf16>
    %c0_13 = arith.constant 0 : index
    %c1_14 = arith.constant 1 : index
    %c0_15 = arith.constant 0 : index
    %9 = vector.load %arg6[%c0_13, %c1_14, %c0_15] : memref<4x32x160xbf16, #tpu.memory_space<vmem>>, vector<1x1x160xbf16>
    %10 = vector.shape_cast %9 : vector<1x1x160xbf16> to vector<1x160xbf16>
    %11 = vector.shape_cast %8 : vector<1x160xbf16> to vector<1x1x160xbf16>
    tpu.vector_store %arg6[%c0_13, %c1_14, %c0_15], %11 {strides = array<i32>} : memref<4x32x160xbf16, #tpu.memory_space<vmem>>, vector<1x1x160xbf16>,
    %c0_16 = arith.constant 0 : index
    %c0_17 = arith.constant 0 : index
    %c2 = arith.constant 2 : index
    %c0_18 = arith.constant 0 : index
    %12 = vector.load %arg2[%c0_16, %c0_17, %c2, %c0_18] : memref<1x1x48x224xbf16, #tpu.memory_space<vmem>>, vector<1x1x1x160xbf16>
    %13 = vector.shape_cast %12 : vector<1x1x1x160xbf16> to vector<1x160xbf16>
    %c0_19 = arith.constant 0 : index
    %c2_20 = arith.constant 2 : index
    %c0_21 = arith.constant 0 : index
    %14 = vector.load %arg6[%c0_19, %c2_20, %c0_21] : memref<4x32x160xbf16, #tpu.memory_space<vmem>>, vector<1x1x160xbf16>
    %15 = vector.shape_cast %14 : vector<1x1x160xbf16> to vector<1x160xbf16>
    %16 = vector.shape_cast %13 : vector<1x160xbf16> to vector<1x1x160xbf16>
    tpu.vector_store %arg6[%c0_19, %c2_20, %c0_21], %16 {strides = array<i32>} : memref<4x32x160xbf16, #tpu.memory_space<vmem>>, vector<1x1x160xbf16>,
    %c0_22 = arith.constant 0 : index
    %c0_23 = arith.constant 0 : index
    %c4 = arith.constant 4 : index
    %c0_24 = arith.constant 0 : index
    %17 = vector.load %arg2[%c0_22, %c0_23, %c4, %c0_24] : memref<1x1x48x224xbf16, #tpu.memory_space<vmem>>, vector<1x1x1x160xbf16>
    %18 = vector.shape_cast %17 : vector<1x1x1x160xbf16> to vector<1x160xbf16>
    %c0_25 = arith.constant 0 : index
    %c3 = arith.constant 3 : index
    %c0_26 = arith.constant 0 : index
    %19 = vector.load %arg6[%c0_25, %c3, %c0_26] : memref<4x32x160xbf16, #tpu.memory_space<vmem>>, vector<1x1x160xbf16>
    %20 = vector.shape_cast %19 : vector<1x1x160xbf16> to vector<1x160xbf16>
    %21 = vector.shape_cast %18 : vector<1x160xbf16> to vector<1x1x160xbf16>
    tpu.vector_store %arg6[%c0_25, %c3, %c0_26], %21 {strides = array<i32>} : memref<4x32x160xbf16, #tpu.memory_space<vmem>>, vector<1x1x160xbf16>,
    %c0_27 = arith.constant 0 : index
    %c0_28 = arith.constant 0 : index
    %c5 = arith.constant 5 : index
    %c0_29 = arith.constant 0 : index
    %22 = vector.load %arg2[%c0_27, %c0_28, %c5, %c0_29] : memref<1x1x48x224xbf16, #tpu.memory_space<vmem>>, vector<1x1x1x160xbf16>
    %23 = vector.shape_cast %22 : vector<1x1x1x160xbf16> to vector<1x160xbf16>
    %c0_30 = arith.constant 0 : index
    %c4_31 = arith.constant 4 : index
    %c0_32 = arith.constant 0 : index
    %24 = vector.load %arg6[%c0_30, %c4_31, %c0_32] : memref<4x32x160xbf16, #tpu.memory_space<vmem>>, vector<1x1x160xbf16>
    %25 = vector.shape_cast %24 : vector<1x1x160xbf16> to vector<1x160xbf16>
    %26 = vector.shape_cast %23 : vector<1x160xbf16> to vector<1x1x160xbf16>
    tpu.vector_store %arg6[%c0_30, %c4_31, %c0_32], %26 {strides = array<i32>} : memref<4x32x160xbf16, #tpu.memory_space<vmem>>, vector<1x1x160xbf16>,
    %c0_33 = arith.constant 0 : index
    %c0_34 = arith.constant 0 : index
    %c6 = arith.constant 6 : index
    %c0_35 = arith.constant 0 : index
    %27 = vector.load %arg2[%c0_33, %c0_34, %c6, %c0_35] : memref<1x1x48x224xbf16, #tpu.memory_space<vmem>>, vector<1x1x1x160xbf16>
    %28 = vector.shape_cast %27 : vector<1x1x1x160xbf16> to vector<1x160xbf16>
    %c0_36 = arith.constant 0 : index
    %c5_37 = arith.constant 5 : index
    %c0_38 = arith.constant 0 : index
    %29 = vector.load %arg6[%c0_36, %c5_37, %c0_38] : memref<4x32x160xbf16, #tpu.memory_space<vmem>>, vector<1x1x160xbf16>
    %30 = vector.shape_cast %29 : vector<1x1x160xbf16> to vector<1x160xbf16>
    %31 = vector.shape_cast %28 : vector<1x160xbf16> to vector<1x1x160xbf16>
    tpu.vector_store %arg6[%c0_36, %c5_37, %c0_38], %31 {strides = array<i32>} : memref<4x32x160xbf16, #tpu.memory_space<vmem>>, vector<1x1x160xbf16>,
    %c0_39 = arith.constant 0 : index
    %c0_40 = arith.constant 0 : index
    %c8 = arith.constant 8 : index
    %c0_41 = arith.constant 0 : index
    %32 = vector.load %arg2[%c0_39, %c0_40, %c8, %c0_41] : memref<1x1x48x224xbf16, #tpu.memory_space<vmem>>, vector<1x1x1x160xbf16>
    %33 = vector.shape_cast %32 : vector<1x1x1x160xbf16> to vector<1x160xbf16>
    %c0_42 = arith.constant 0 : index
    %c6_43 = arith.constant 6 : index
    %c0_44 = arith.constant 0 : index
    %34 = vector.load %arg6[%c0_42, %c6_43, %c0_44] : memref<4x32x160xbf16, #tpu.memory_space<vmem>>, vector<1x1x160xbf16>
    %35 = vector.shape_cast %34 : vector<1x1x160xbf16> to vector<1x160xbf16>
    %36 = vector.shape_cast %33 : vector<1x160xbf16> to vector<1x1x160xbf16>
    tpu.vector_store %arg6[%c0_42, %c6_43, %c0_44], %36 {strides = array<i32>} : memref<4x32x160xbf16, #tpu.memory_space<vmem>>, vector<1x1x160xbf16>,
    %c0_45 = arith.constant 0 : index
    %c0_46 = arith.constant 0 : index
    %c9 = arith.constant 9 : index
    %c0_47 = arith.constant 0 : index
    %37 = vector.load %arg2[%c0_45, %c0_46, %c9, %c0_47] : memref<1x1x48x224xbf16, #tpu.memory_space<vmem>>, vector<1x1x1x160xbf16>
    %38 = vector.shape_cast %37 : vector<1x1x1x160xbf16> to vector<1x160xbf16>
    %c0_48 = arith.constant 0 : index
    %c7 = arith.constant 7 : index
    %c0_49 = arith.constant 0 : index
    %39 = vector.load %arg6[%c0_48, %c7, %c0_49] : memref<4x32x160xbf16, #tpu.memory_space<vmem>>, vector<1x1x160xbf16>
    %40 = vector.shape_cast %39 : vector<1x1x160xbf16> to vector<1x160xbf16>
    %41 = vector.shape_cast %38 : vector<1x160xbf16> to vector<1x1x160xbf16>
    tpu.vector_store %arg6[%c0_48, %c7, %c0_49], %41 {strides = array<i32>} : memref<4x32x160xbf16, #tpu.memory_space<vmem>>, vector<1x1x160xbf16>,
    %c0_50 = arith.constant 0 : index
    %c0_51 = arith.constant 0 : index
    %c10 = arith.constant 10 : index
    %c0_52 = arith.constant 0 : index
    %42 = vector.load %arg2[%c0_50, %c0_51, %c10, %c0_52] : memref<1x1x48x224xbf16, #tpu.memory_space<vmem>>, vector<1x1x1x160xbf16>
    %43 = vector.shape_cast %42 : vector<1x1x1x160xbf16> to vector<1x160xbf16>
    %c0_53 = arith.constant 0 : index
    %c8_54 = arith.constant 8 : index
    %c0_55 = arith.constant 0 : index
    %44 = vector.load %arg6[%c0_53, %c8_54, %c0_55] : memref<4x32x160xbf16, #tpu.memory_space<vmem>>, vector<1x1x160xbf16>
    %45 = vector.shape_cast %44 : vector<1x1x160xbf16> to vector<1x160xbf16>
    %46 = vector.shape_cast %43 : vector<1x160xbf16> to vector<1x1x160xbf16>
    tpu.vector_store %arg6[%c0_53, %c8_54, %c0_55], %46 {strides = array<i32>} : memref<4x32x160xbf16, #tpu.memory_space<vmem>>, vector<1x1x160xbf16>,
    %c0_56 = arith.constant 0 : index
    %c0_57 = arith.constant 0 : index
    %c16 = arith.constant 16 : index
    %c0_58 = arith.constant 0 : index
    %47 = vector.load %arg2[%c0_56, %c0_57, %c16, %c0_58] : memref<1x1x48x224xbf16, #tpu.memory_space<vmem>>, vector<1x1x1x160xbf16>
    %48 = vector.shape_cast %47 : vector<1x1x1x160xbf16> to vector<1x160xbf16>
    %c0_59 = arith.constant 0 : index
    %c9_60 = arith.constant 9 : index
    %c0_61 = arith.constant 0 : index
    %49 = vector.load %arg6[%c0_59, %c9_60, %c0_61] : memref<4x32x160xbf16, #tpu.memory_space<vmem>>, vector<1x1x160xbf16>
    %50 = vector.shape_cast %49 : vector<1x1x160xbf16> to vector<1x160xbf16>
    %51 = vector.shape_cast %48 : vector<1x160xbf16> to vector<1x1x160xbf16>
    tpu.vector_store %arg6[%c0_59, %c9_60, %c0_61], %51 {strides = array<i32>} : memref<4x32x160xbf16, #tpu.memory_space<vmem>>, vector<1x1x160xbf16>,
    %c0_62 = arith.constant 0 : index
    %c0_63 = arith.constant 0 : index
    %c17 = arith.constant 17 : index
    %c0_64 = arith.constant 0 : index
    %52 = vector.load %arg2[%c0_62, %c0_63, %c17, %c0_64] : memref<1x1x48x224xbf16, #tpu.memory_space<vmem>>, vector<1x1x1x160xbf16>
    %53 = vector.shape_cast %52 : vector<1x1x1x160xbf16> to vector<1x160xbf16>
    %c0_65 = arith.constant 0 : index
    %c10_66 = arith.constant 10 : index
    %c0_67 = arith.constant 0 : index
    %54 = vector.load %arg6[%c0_65, %c10_66, %c0_67] : memref<4x32x160xbf16, #tpu.memory_space<vmem>>, vector<1x1x160xbf16>
    %55 = vector.shape_cast %54 : vector<1x1x160xbf16> to vector<1x160xbf16>
    %56 = vector.shape_cast %53 : vector<1x160xbf16> to vector<1x1x160xbf16>
    tpu.vector_store %arg6[%c0_65, %c10_66, %c0_67], %56 {strides = array<i32>} : memref<4x32x160xbf16, #tpu.memory_space<vmem>>, vector<1x1x160xbf16>,
    %c0_68 = arith.constant 0 : index
    %c0_69 = arith.constant 0 : index
    %c18 = arith.constant 18 : index
    %c0_70 = arith.constant 0 : index
    %57 = vector.load %arg2[%c0_68, %c0_69, %c18, %c0_70] : memref<1x1x48x224xbf16, #tpu.memory_space<vmem>>, vector<1x1x1x160xbf16>
    %58 = vector.shape_cast %57 : vector<1x1x1x160xbf16> to vector<1x160xbf16>
    %c0_71 = arith.constant 0 : index
    %c11 = arith.constant 11 : index
    %c0_72 = arith.constant 0 : index
    %59 = vector.load %arg6[%c0_71, %c11, %c0_72] : memref<4x32x160xbf16, #tpu.memory_space<vmem>>, vector<1x1x160xbf16>
    %60 = vector.shape_cast %59 : vector<1x1x160xbf16> to vector<1x160xbf16>
    %61 = vector.shape_cast %58 : vector<1x160xbf16> to vector<1x1x160xbf16>
    tpu.vector_store %arg6[%c0_71, %c11, %c0_72], %61 {strides = array<i32>} : memref<4x32x160xbf16, #tpu.memory_space<vmem>>, vector<1x1x160xbf16>,
    %c0_73 = arith.constant 0 : index
    %c0_74 = arith.constant 0 : index
    %c20 = arith.constant 20 : index
    %c0_75 = arith.constant 0 : index
    %62 = vector.load %arg2[%c0_73, %c0_74, %c20, %c0_75] : memref<1x1x48x224xbf16, #tpu.memory_space<vmem>>, vector<1x1x1x160xbf16>
    %63 = vector.shape_cast %62 : vector<1x1x1x160xbf16> to vector<1x160xbf16>
    %c0_76 = arith.constant 0 : index
    %c12 = arith.constant 12 : index
    %c0_77 = arith.constant 0 : index
    %64 = vector.load %arg6[%c0_76, %c12, %c0_77] : memref<4x32x160xbf16, #tpu.memory_space<vmem>>, vector<1x1x160xbf16>
    %65 = vector.shape_cast %64 : vector<1x1x160xbf16> to vector<1x160xbf16>
    %66 = vector.shape_cast %63 : vector<1x160xbf16> to vector<1x1x160xbf16>
    tpu.vector_store %arg6[%c0_76, %c12, %c0_77], %66 {strides = array<i32>} : memref<4x32x160xbf16, #tpu.memory_space<vmem>>, vector<1x1x160xbf16>,
    %c0_78 = arith.constant 0 : index
    %c0_79 = arith.constant 0 : index
    %c21 = arith.constant 21 : index
    %c0_80 = arith.constant 0 : index
    %67 = vector.load %arg2[%c0_78, %c0_79, %c21, %c0_80] : memref<1x1x48x224xbf16, #tpu.memory_space<vmem>>, vector<1x1x1x160xbf16>
    %68 = vector.shape_cast %67 : vector<1x1x1x160xbf16> to vector<1x160xbf16>
    %c0_81 = arith.constant 0 : index
    %c13 = arith.constant 13 : index
    %c0_82 = arith.constant 0 : index
    %69 = vector.load %arg6[%c0_81, %c13, %c0_82] : memref<4x32x160xbf16, #tpu.memory_space<vmem>>, vector<1x1x160xbf16>
    %70 = vector.shape_cast %69 : vector<1x1x160xbf16> to vector<1x160xbf16>
    %71 = vector.shape_cast %68 : vector<1x160xbf16> to vector<1x1x160xbf16>
    tpu.vector_store %arg6[%c0_81, %c13, %c0_82], %71 {strides = array<i32>} : memref<4x32x160xbf16, #tpu.memory_space<vmem>>, vector<1x1x160xbf16>,
    %c0_83 = arith.constant 0 : index
    %c0_84 = arith.constant 0 : index
    %c22 = arith.constant 22 : index
    %c0_85 = arith.constant 0 : index
    %72 = vector.load %arg2[%c0_83, %c0_84, %c22, %c0_85] : memref<1x1x48x224xbf16, #tpu.memory_space<vmem>>, vector<1x1x1x160xbf16>
    %73 = vector.shape_cast %72 : vector<1x1x1x160xbf16> to vector<1x160xbf16>
    %c0_86 = arith.constant 0 : index
    %c14 = arith.constant 14 : index
    %c0_87 = arith.constant 0 : index
    %74 = vector.load %arg6[%c0_86, %c14, %c0_87] : memref<4x32x160xbf16, #tpu.memory_space<vmem>>, vector<1x1x160xbf16>
    %75 = vector.shape_cast %74 : vector<1x1x160xbf16> to vector<1x160xbf16>
    %76 = vector.shape_cast %73 : vector<1x160xbf16> to vector<1x1x160xbf16>
    tpu.vector_store %arg6[%c0_86, %c14, %c0_87], %76 {strides = array<i32>} : memref<4x32x160xbf16, #tpu.memory_space<vmem>>, vector<1x1x160xbf16>,
    %c0_88 = arith.constant 0 : index
    %c0_89 = arith.constant 0 : index
    %c24 = arith.constant 24 : index
    %c0_90 = arith.constant 0 : index
    %77 = vector.load %arg2[%c0_88, %c0_89, %c24, %c0_90] : memref<1x1x48x224xbf16, #tpu.memory_space<vmem>>, vector<1x1x1x160xbf16>
    %78 = vector.shape_cast %77 : vector<1x1x1x160xbf16> to vector<1x160xbf16>
    %c0_91 = arith.constant 0 : index
    %c15 = arith.constant 15 : index
    %c0_92 = arith.constant 0 : index
    %79 = vector.load %arg6[%c0_91, %c15, %c0_92] : memref<4x32x160xbf16, #tpu.memory_space<vmem>>, vector<1x1x160xbf16>
    %80 = vector.shape_cast %79 : vector<1x1x160xbf16> to vector<1x160xbf16>
    %81 = vector.shape_cast %78 : vector<1x160xbf16> to vector<1x1x160xbf16>
    tpu.vector_store %arg6[%c0_91, %c15, %c0_92], %81 {strides = array<i32>} : memref<4x32x160xbf16, #tpu.memory_space<vmem>>, vector<1x1x160xbf16>,
    %c0_93 = arith.constant 0 : index
    %c0_94 = arith.constant 0 : index
    %c25 = arith.constant 25 : index
    %c0_95 = arith.constant 0 : index
    %82 = vector.load %arg2[%c0_93, %c0_94, %c25, %c0_95] : memref<1x1x48x224xbf16, #tpu.memory_space<vmem>>, vector<1x1x1x160xbf16>
    %83 = vector.shape_cast %82 : vector<1x1x1x160xbf16> to vector<1x160xbf16>
    %c0_96 = arith.constant 0 : index
    %c16_97 = arith.constant 16 : index
    %c0_98 = arith.constant 0 : index
    %84 = vector.load %arg6[%c0_96, %c16_97, %c0_98] : memref<4x32x160xbf16, #tpu.memory_space<vmem>>, vector<1x1x160xbf16>
    %85 = vector.shape_cast %84 : vector<1x1x160xbf16> to vector<1x160xbf16>
    %86 = vector.shape_cast %83 : vector<1x160xbf16> to vector<1x1x160xbf16>
    tpu.vector_store %arg6[%c0_96, %c16_97, %c0_98], %86 {strides = array<i32>} : memref<4x32x160xbf16, #tpu.memory_space<vmem>>, vector<1x1x160xbf16>,
    %c0_99 = arith.constant 0 : index
    %c0_100 = arith.constant 0 : index
    %c26 = arith.constant 26 : index
    %c0_101 = arith.constant 0 : index
    %87 = vector.load %arg2[%c0_99, %c0_100, %c26, %c0_101] : memref<1x1x48x224xbf16, #tpu.memory_space<vmem>>, vector<1x1x1x160xbf16>
    %88 = vector.shape_cast %87 : vector<1x1x1x160xbf16> to vector<1x160xbf16>
    %c0_102 = arith.constant 0 : index
    %c17_103 = arith.constant 17 : index
    %c0_104 = arith.constant 0 : index
    %89 = vector.load %arg6[%c0_102, %c17_103, %c0_104] : memref<4x32x160xbf16, #tpu.memory_space<vmem>>, vector<1x1x160xbf16>
    %90 = vector.shape_cast %89 : vector<1x1x160xbf16> to vector<1x160xbf16>
    %91 = vector.shape_cast %88 : vector<1x160xbf16> to vector<1x1x160xbf16>
    tpu.vector_store %arg6[%c0_102, %c17_103, %c0_104], %91 {strides = array<i32>} : memref<4x32x160xbf16, #tpu.memory_space<vmem>>, vector<1x1x160xbf16>,
    %c0_105 = arith.constant 0 : index
    %c0_106 = arith.constant 0 : index
    %c32 = arith.constant 32 : index
    %c0_107 = arith.constant 0 : index
    %92 = vector.load %arg2[%c0_105, %c0_106, %c32, %c0_107] : memref<1x1x48x224xbf16, #tpu.memory_space<vmem>>, vector<1x1x1x160xbf16>
    %93 = vector.shape_cast %92 : vector<1x1x1x160xbf16> to vector<1x160xbf16>
    %c0_108 = arith.constant 0 : index
    %c18_109 = arith.constant 18 : index
    %c0_110 = arith.constant 0 : index
    %94 = vector.load %arg6[%c0_108, %c18_109, %c0_110] : memref<4x32x160xbf16, #tpu.memory_space<vmem>>, vector<1x1x160xbf16>
    %95 = vector.shape_cast %94 : vector<1x1x160xbf16> to vector<1x160xbf16>
    %96 = vector.shape_cast %93 : vector<1x160xbf16> to vector<1x1x160xbf16>
    tpu.vector_store %arg6[%c0_108, %c18_109, %c0_110], %96 {strides = array<i32>} : memref<4x32x160xbf16, #tpu.memory_space<vmem>>, vector<1x1x160xbf16>,
    %c0_111 = arith.constant 0 : index
    %c0_112 = arith.constant 0 : index
    %c33 = arith.constant 33 : index
    %c0_113 = arith.constant 0 : index
    %97 = vector.load %arg2[%c0_111, %c0_112, %c33, %c0_113] : memref<1x1x48x224xbf16, #tpu.memory_space<vmem>>, vector<1x1x1x160xbf16>
    %98 = vector.shape_cast %97 : vector<1x1x1x160xbf16> to vector<1x160xbf16>
    %c0_114 = arith.constant 0 : index
    %c19 = arith.constant 19 : index
    %c0_115 = arith.constant 0 : index
    %99 = vector.load %arg6[%c0_114, %c19, %c0_115] : memref<4x32x160xbf16, #tpu.memory_space<vmem>>, vector<1x1x160xbf16>
    %100 = vector.shape_cast %99 : vector<1x1x160xbf16> to vector<1x160xbf16>
    %101 = vector.shape_cast %98 : vector<1x160xbf16> to vector<1x1x160xbf16>
    tpu.vector_store %arg6[%c0_114, %c19, %c0_115], %101 {strides = array<i32>} : memref<4x32x160xbf16, #tpu.memory_space<vmem>>, vector<1x1x160xbf16>,
    %c0_116 = arith.constant 0 : index
    %c0_117 = arith.constant 0 : index
    %c34 = arith.constant 34 : index
    %c0_118 = arith.constant 0 : index
    %102 = vector.load %arg2[%c0_116, %c0_117, %c34, %c0_118] : memref<1x1x48x224xbf16, #tpu.memory_space<vmem>>, vector<1x1x1x160xbf16>
    %103 = vector.shape_cast %102 : vector<1x1x1x160xbf16> to vector<1x160xbf16>
    %c0_119 = arith.constant 0 : index
    %c20_120 = arith.constant 20 : index
    %c0_121 = arith.constant 0 : index
    %104 = vector.load %arg6[%c0_119, %c20_120, %c0_121] : memref<4x32x160xbf16, #tpu.memory_space<vmem>>, vector<1x1x160xbf16>
    %105 = vector.shape_cast %104 : vector<1x1x160xbf16> to vector<1x160xbf16>
    %106 = vector.shape_cast %103 : vector<1x160xbf16> to vector<1x1x160xbf16>
    tpu.vector_store %arg6[%c0_119, %c20_120, %c0_121], %106 {strides = array<i32>} : memref<4x32x160xbf16, #tpu.memory_space<vmem>>, vector<1x1x160xbf16>,
    %c0_122 = arith.constant 0 : index
    %c0_123 = arith.constant 0 : index
    %c36 = arith.constant 36 : index
    %c0_124 = arith.constant 0 : index
    %107 = vector.load %arg2[%c0_122, %c0_123, %c36, %c0_124] : memref<1x1x48x224xbf16, #tpu.memory_space<vmem>>, vector<1x1x1x160xbf16>
    %108 = vector.shape_cast %107 : vector<1x1x1x160xbf16> to vector<1x160xbf16>
    %c0_125 = arith.constant 0 : index
    %c21_126 = arith.constant 21 : index
    %c0_127 = arith.constant 0 : index
    %109 = vector.load %arg6[%c0_125, %c21_126, %c0_127] : memref<4x32x160xbf16, #tpu.memory_space<vmem>>, vector<1x1x160xbf16>
    %110 = vector.shape_cast %109 : vector<1x1x160xbf16> to vector<1x160xbf16>
    %111 = vector.shape_cast %108 : vector<1x160xbf16> to vector<1x1x160xbf16>
    tpu.vector_store %arg6[%c0_125, %c21_126, %c0_127], %111 {strides = array<i32>} : memref<4x32x160xbf16, #tpu.memory_space<vmem>>, vector<1x1x160xbf16>,
    %c0_128 = arith.constant 0 : index
    %c0_129 = arith.constant 0 : index
    %c37 = arith.constant 37 : index
    %c0_130 = arith.constant 0 : index
    %112 = vector.load %arg2[%c0_128, %c0_129, %c37, %c0_130] : memref<1x1x48x224xbf16, #tpu.memory_space<vmem>>, vector<1x1x1x160xbf16>
    %113 = vector.shape_cast %112 : vector<1x1x1x160xbf16> to vector<1x160xbf16>
    %c0_131 = arith.constant 0 : index
    %c22_132 = arith.constant 22 : index
    %c0_133 = arith.constant 0 : index
    %114 = vector.load %arg6[%c0_131, %c22_132, %c0_133] : memref<4x32x160xbf16, #tpu.memory_space<vmem>>, vector<1x1x160xbf16>
    %115 = vector.shape_cast %114 : vector<1x1x160xbf16> to vector<1x160xbf16>
    %116 = vector.shape_cast %113 : vector<1x160xbf16> to vector<1x1x160xbf16>
    tpu.vector_store %arg6[%c0_131, %c22_132, %c0_133], %116 {strides = array<i32>} : memref<4x32x160xbf16, #tpu.memory_space<vmem>>, vector<1x1x160xbf16>,
    %c0_134 = arith.constant 0 : index
    %c0_135 = arith.constant 0 : index
    %c38 = arith.constant 38 : index
    %c0_136 = arith.constant 0 : index
    %117 = vector.load %arg2[%c0_134, %c0_135, %c38, %c0_136] : memref<1x1x48x224xbf16, #tpu.memory_space<vmem>>, vector<1x1x1x160xbf16>
    %118 = vector.shape_cast %117 : vector<1x1x1x160xbf16> to vector<1x160xbf16>
    %c0_137 = arith.constant 0 : index
    %c23 = arith.constant 23 : index
    %c0_138 = arith.constant 0 : index
    %119 = vector.load %arg6[%c0_137, %c23, %c0_138] : memref<4x32x160xbf16, #tpu.memory_space<vmem>>, vector<1x1x160xbf16>
    %120 = vector.shape_cast %119 : vector<1x1x160xbf16> to vector<1x160xbf16>
    %121 = vector.shape_cast %118 : vector<1x160xbf16> to vector<1x1x160xbf16>
    tpu.vector_store %arg6[%c0_137, %c23, %c0_138], %121 {strides = array<i32>} : memref<4x32x160xbf16, #tpu.memory_space<vmem>>, vector<1x1x160xbf16>,
    %c0_139 = arith.constant 0 : index
    %c0_140 = arith.constant 0 : index
    %c40 = arith.constant 40 : index
    %c0_141 = arith.constant 0 : index
    %122 = vector.load %arg2[%c0_139, %c0_140, %c40, %c0_141] : memref<1x1x48x224xbf16, #tpu.memory_space<vmem>>, vector<1x1x1x160xbf16>
    %123 = vector.shape_cast %122 : vector<1x1x1x160xbf16> to vector<1x160xbf16>
    %c0_142 = arith.constant 0 : index
    %c24_143 = arith.constant 24 : index
    %c0_144 = arith.constant 0 : index
    %124 = vector.load %arg6[%c0_142, %c24_143, %c0_144] : memref<4x32x160xbf16, #tpu.memory_space<vmem>>, vector<1x1x160xbf16>
    %125 = vector.shape_cast %124 : vector<1x1x160xbf16> to vector<1x160xbf16>
    %126 = vector.shape_cast %123 : vector<1x160xbf16> to vector<1x1x160xbf16>
    tpu.vector_store %arg6[%c0_142, %c24_143, %c0_144], %126 {strides = array<i32>} : memref<4x32x160xbf16, #tpu.memory_space<vmem>>, vector<1x1x160xbf16>,
    %c0_145 = arith.constant 0 : index
    %c0_146 = arith.constant 0 : index
    %c41 = arith.constant 41 : index
    %c0_147 = arith.constant 0 : index
    %127 = vector.load %arg2[%c0_145, %c0_146, %c41, %c0_147] : memref<1x1x48x224xbf16, #tpu.memory_space<vmem>>, vector<1x1x1x160xbf16>
    %128 = vector.shape_cast %127 : vector<1x1x1x160xbf16> to vector<1x160xbf16>
    %c0_148 = arith.constant 0 : index
    %c25_149 = arith.constant 25 : index
    %c0_150 = arith.constant 0 : index
    %129 = vector.load %arg6[%c0_148, %c25_149, %c0_150] : memref<4x32x160xbf16, #tpu.memory_space<vmem>>, vector<1x1x160xbf16>
    %130 = vector.shape_cast %129 : vector<1x1x160xbf16> to vector<1x160xbf16>
    %131 = vector.shape_cast %128 : vector<1x160xbf16> to vector<1x1x160xbf16>
    tpu.vector_store %arg6[%c0_148, %c25_149, %c0_150], %131 {strides = array<i32>} : memref<4x32x160xbf16, #tpu.memory_space<vmem>>, vector<1x1x160xbf16>,
    %c0_151 = arith.constant 0 : index
    %c0_152 = arith.constant 0 : index
    %c42 = arith.constant 42 : index
    %c0_153 = arith.constant 0 : index
    %132 = vector.load %arg2[%c0_151, %c0_152, %c42, %c0_153] : memref<1x1x48x224xbf16, #tpu.memory_space<vmem>>, vector<1x1x1x160xbf16>
    %133 = vector.shape_cast %132 : vector<1x1x1x160xbf16> to vector<1x160xbf16>
    %c0_154 = arith.constant 0 : index
    %c26_155 = arith.constant 26 : index
    %c0_156 = arith.constant 0 : index
    %134 = vector.load %arg6[%c0_154, %c26_155, %c0_156] : memref<4x32x160xbf16, #tpu.memory_space<vmem>>, vector<1x1x160xbf16>
    %135 = vector.shape_cast %134 : vector<1x1x160xbf16> to vector<1x160xbf16>
    %136 = vector.shape_cast %133 : vector<1x160xbf16> to vector<1x1x160xbf16>
    tpu.vector_store %arg6[%c0_154, %c26_155, %c0_156], %136 {strides = array<i32>} : memref<4x32x160xbf16, #tpu.memory_space<vmem>>, vector<1x1x160xbf16>,
    %cst = arith.constant 0.000000e+00 : bf16
    %137 = vector.broadcast %cst : bf16 to vector<5x160xbf16>
    %c0_157 = arith.constant 0 : index
    %c27 = arith.constant 27 : index
    %c0_158 = arith.constant 0 : index
    %138 = vector.load %arg6[%c0_157, %c27, %c0_158] : memref<4x32x160xbf16, #tpu.memory_space<vmem>>, vector<1x5x160xbf16>
    %139 = vector.shape_cast %138 : vector<1x5x160xbf16> to vector<5x160xbf16>
    %140 = vector.shape_cast %137 : vector<5x160xbf16> to vector<1x5x160xbf16>
    tpu.vector_store %arg6[%c0_157, %c27, %c0_158], %140 {strides = array<i32>} : memref<4x32x160xbf16, #tpu.memory_space<vmem>>, vector<1x5x160xbf16>,
    %c0_159 = arith.constant 0 : index
    %c0_160 = arith.constant 0 : index
    %c2_161 = arith.constant 2 : index
    %c0_162 = arith.constant 0 : index
    %141 = vector.load %arg2[%c0_159, %c0_160, %c2_161, %c0_162] : memref<1x1x48x224xbf16, #tpu.memory_space<vmem>>, vector<1x1x1x160xbf16>
    %142 = vector.shape_cast %141 : vector<1x1x1x160xbf16> to vector<1x160xbf16>
    %c1_163 = arith.constant 1 : index
    %c0_164 = arith.constant 0 : index
    %c0_165 = arith.constant 0 : index
    %143 = vector.load %arg6[%c1_163, %c0_164, %c0_165] : memref<4x32x160xbf16, #tpu.memory_space<vmem>>, vector<1x1x160xbf16>
    %144 = vector.shape_cast %143 : vector<1x1x160xbf16> to vector<1x160xbf16>
    %145 = vector.shape_cast %142 : vector<1x160xbf16> to vector<1x1x160xbf16>
    tpu.vector_store %arg6[%c1_163, %c0_164, %c0_165], %145 {strides = array<i32>} : memref<4x32x160xbf16, #tpu.memory_space<vmem>>, vector<1x1x160xbf16>,
    %c0_166 = arith.constant 0 : index
    %c0_167 = arith.constant 0 : index
    %c3_168 = arith.constant 3 : index
    %c0_169 = arith.constant 0 : index
    %146 = vector.load %arg2[%c0_166, %c0_167, %c3_168, %c0_169] : memref<1x1x48x224xbf16, #tpu.memory_space<vmem>>, vector<1x1x1x160xbf16>
    %147 = vector.shape_cast %146 : vector<1x1x1x160xbf16> to vector<1x160xbf16>
    %c1_170 = arith.constant 1 : index
    %c1_171 = arith.constant 1 : index
    %c0_172 = arith.constant 0 : index
    %148 = vector.load %arg6[%c1_170, %c1_171, %c0_172] : memref<4x32x160xbf16, #tpu.memory_space<vmem>>, vector<1x1x160xbf16>
    %149 = vector.shape_cast %148 : vector<1x1x160xbf16> to vector<1x160xbf16>
    %150 = vector.shape_cast %147 : vector<1x160xbf16> to vector<1x1x160xbf16>
    tpu.vector_store %arg6[%c1_170, %c1_171, %c0_172], %150 {strides = array<i32>} : memref<4x32x160xbf16, #tpu.memory_space<vmem>>, vector<1x1x160xbf16>,
    %c0_173 = arith.constant 0 : index
    %c0_174 = arith.constant 0 : index
    %c0_175 = arith.constant 0 : index
    %c1_176 = arith.constant 1 : index
    %151 = vector.load %arg2[%c0_173, %c0_174, %c0_175, %c1_176] : memref<1x1x48x224xbf16, #tpu.memory_space<vmem>>, vector<1x1x1x160xbf16>
    %152 = vector.shape_cast %151 : vector<1x1x1x160xbf16> to vector<1x160xbf16>
    %c1_177 = arith.constant 1 : index
    %c2_178 = arith.constant 2 : index
    %c0_179 = arith.constant 0 : index
    %153 = vector.load %arg6[%c1_177, %c2_178, %c0_179] : memref<4x32x160xbf16, #tpu.memory_space<vmem>>, vector<1x1x160xbf16>
    %154 = vector.shape_cast %153 : vector<1x1x160xbf16> to vector<1x160xbf16>
    %155 = vector.shape_cast %152 : vector<1x160xbf16> to vector<1x1x160xbf16>
    tpu.vector_store %arg6[%c1_177, %c2_178, %c0_179], %155 {strides = array<i32>} : memref<4x32x160xbf16, #tpu.memory_space<vmem>>, vector<1x1x160xbf16>,
    %c0_180 = arith.constant 0 : index
    %c0_181 = arith.constant 0 : index
    %c6_182 = arith.constant 6 : index
    %c0_183 = arith.constant 0 : index
    %156 = vector.load %arg2[%c0_180, %c0_181, %c6_182, %c0_183] : memref<1x1x48x224xbf16, #tpu.memory_space<vmem>>, vector<1x1x1x160xbf16>
    %157 = vector.shape_cast %156 : vector<1x1x1x160xbf16> to vector<1x160xbf16>
    %c1_184 = arith.constant 1 : index
    %c3_185 = arith.constant 3 : index
    %c0_186 = arith.constant 0 : index
    %158 = vector.load %arg6[%c1_184, %c3_185, %c0_186] : memref<4x32x160xbf16, #tpu.memory_space<vmem>>, vector<1x1x160xbf16>
    %159 = vector.shape_cast %158 : vector<1x1x160xbf16> to vector<1x160xbf16>
    %160 = vector.shape_cast %157 : vector<1x160xbf16> to vector<1x1x160xbf16>
    tpu.vector_store %arg6[%c1_184, %c3_185, %c0_186], %160 {strides = array<i32>} : memref<4x32x160xbf16, #tpu.memory_space<vmem>>, vector<1x1x160xbf16>,
    %c0_187 = arith.constant 0 : index
    %c0_188 = arith.constant 0 : index
    %c7_189 = arith.constant 7 : index
    %c0_190 = arith.constant 0 : index
    %161 = vector.load %arg2[%c0_187, %c0_188, %c7_189, %c0_190] : memref<1x1x48x224xbf16, #tpu.memory_space<vmem>>, vector<1x1x1x160xbf16>
    %162 = vector.shape_cast %161 : vector<1x1x1x160xbf16> to vector<1x160xbf16>
    %c1_191 = arith.constant 1 : index
    %c4_192 = arith.constant 4 : index
    %c0_193 = arith.constant 0 : index
    %163 = vector.load %arg6[%c1_191, %c4_192, %c0_193] : memref<4x32x160xbf16, #tpu.memory_space<vmem>>, vector<1x1x160xbf16>
    %164 = vector.shape_cast %163 : vector<1x1x160xbf16> to vector<1x160xbf16>
    %165 = vector.shape_cast %162 : vector<1x160xbf16> to vector<1x1x160xbf16>
    tpu.vector_store %arg6[%c1_191, %c4_192, %c0_193], %165 {strides = array<i32>} : memref<4x32x160xbf16, #tpu.memory_space<vmem>>, vector<1x1x160xbf16>,
    %c0_194 = arith.constant 0 : index
    %c0_195 = arith.constant 0 : index
    %c4_196 = arith.constant 4 : index
    %c1_197 = arith.constant 1 : index
    %166 = vector.load %arg2[%c0_194, %c0_195, %c4_196, %c1_197] : memref<1x1x48x224xbf16, #tpu.memory_space<vmem>>, vector<1x1x1x160xbf16>
    %167 = vector.shape_cast %166 : vector<1x1x1x160xbf16> to vector<1x160xbf16>
    %c1_198 = arith.constant 1 : index
    %c5_199 = arith.constant 5 : index
    %c0_200 = arith.constant 0 : index
    %168 = vector.load %arg6[%c1_198, %c5_199, %c0_200] : memref<4x32x160xbf16, #tpu.memory_space<vmem>>, vector<1x1x160xbf16>
    %169 = vector.shape_cast %168 : vector<1x1x160xbf16> to vector<1x160xbf16>
    %170 = vector.shape_cast %167 : vector<1x160xbf16> to vector<1x1x160xbf16>
    tpu.vector_store %arg6[%c1_198, %c5_199, %c0_200], %170 {strides = array<i32>} : memref<4x32x160xbf16, #tpu.memory_space<vmem>>, vector<1x1x160xbf16>,
    %c0_201 = arith.constant 0 : index
    %c0_202 = arith.constant 0 : index
    %c10_203 = arith.constant 10 : index
    %c0_204 = arith.constant 0 : index
    %171 = vector.load %arg2[%c0_201, %c0_202, %c10_203, %c0_204] : memref<1x1x48x224xbf16, #tpu.memory_space<vmem>>, vector<1x1x1x160xbf16>
    %172 = vector.shape_cast %171 : vector<1x1x1x160xbf16> to vector<1x160xbf16>
    %c1_205 = arith.constant 1 : index
    %c6_206 = arith.constant 6 : index
    %c0_207 = arith.constant 0 : index
    %173 = vector.load %arg6[%c1_205, %c6_206, %c0_207] : memref<4x32x160xbf16, #tpu.memory_space<vmem>>, vector<1x1x160xbf16>
    %174 = vector.shape_cast %173 : vector<1x1x160xbf16> to vector<1x160xbf16>
    %175 = vector.shape_cast %172 : vector<1x160xbf16> to vector<1x1x160xbf16>
    tpu.vector_store %arg6[%c1_205, %c6_206, %c0_207], %175 {strides = array<i32>} : memref<4x32x160xbf16, #tpu.memory_space<vmem>>, vector<1x1x160xbf16>,
    %c0_208 = arith.constant 0 : index
    %c0_209 = arith.constant 0 : index
    %c11_210 = arith.constant 11 : index
    %c0_211 = arith.constant 0 : index
    %176 = vector.load %arg2[%c0_208, %c0_209, %c11_210, %c0_211] : memref<1x1x48x224xbf16, #tpu.memory_space<vmem>>, vector<1x1x1x160xbf16>
    %177 = vector.shape_cast %176 : vector<1x1x1x160xbf16> to vector<1x160xbf16>
    %c1_212 = arith.constant 1 : index
    %c7_213 = arith.constant 7 : index
    %c0_214 = arith.constant 0 : index
    %178 = vector.load %arg6[%c1_212, %c7_213, %c0_214] : memref<4x32x160xbf16, #tpu.memory_space<vmem>>, vector<1x1x160xbf16>
    %179 = vector.shape_cast %178 : vector<1x1x160xbf16> to vector<1x160xbf16>
    %180 = vector.shape_cast %177 : vector<1x160xbf16> to vector<1x1x160xbf16>
    tpu.vector_store %arg6[%c1_212, %c7_213, %c0_214], %180 {strides = array<i32>} : memref<4x32x160xbf16, #tpu.memory_space<vmem>>, vector<1x1x160xbf16>,
    %c0_215 = arith.constant 0 : index
    %c0_216 = arith.constant 0 : index
    %c8_217 = arith.constant 8 : index
    %c1_218 = arith.constant 1 : index
    %181 = vector.load %arg2[%c0_215, %c0_216, %c8_217, %c1_218] : memref<1x1x48x224xbf16, #tpu.memory_space<vmem>>, vector<1x1x1x160xbf16>
    %182 = vector.shape_cast %181 : vector<1x1x1x160xbf16> to vector<1x160xbf16>
    %c1_219 = arith.constant 1 : index
    %c8_220 = arith.constant 8 : index
    %c0_221 = arith.constant 0 : index
    %183 = vector.load %arg6[%c1_219, %c8_220, %c0_221] : memref<4x32x160xbf16, #tpu.memory_space<vmem>>, vector<1x1x160xbf16>
    %184 = vector.shape_cast %183 : vector<1x1x160xbf16> to vector<1x160xbf16>
    %185 = vector.shape_cast %182 : vector<1x160xbf16> to vector<1x1x160xbf16>
    tpu.vector_store %arg6[%c1_219, %c8_220, %c0_221], %185 {strides = array<i32>} : memref<4x32x160xbf16, #tpu.memory_space<vmem>>, vector<1x1x160xbf16>,
    %c0_222 = arith.constant 0 : index
    %c0_223 = arith.constant 0 : index
    %c18_224 = arith.constant 18 : index
    %c0_225 = arith.constant 0 : index
    %186 = vector.load %arg2[%c0_222, %c0_223, %c18_224, %c0_225] : memref<1x1x48x224xbf16, #tpu.memory_space<vmem>>, vector<1x1x1x160xbf16>
    %187 = vector.shape_cast %186 : vector<1x1x1x160xbf16> to vector<1x160xbf16>
    %c1_226 = arith.constant 1 : index
    %c9_227 = arith.constant 9 : index
    %c0_228 = arith.constant 0 : index
    %188 = vector.load %arg6[%c1_226, %c9_227, %c0_228] : memref<4x32x160xbf16, #tpu.memory_space<vmem>>, vector<1x1x160xbf16>
    %189 = vector.shape_cast %188 : vector<1x1x160xbf16> to vector<1x160xbf16>
    %190 = vector.shape_cast %187 : vector<1x160xbf16> to vector<1x1x160xbf16>
    tpu.vector_store %arg6[%c1_226, %c9_227, %c0_228], %190 {strides = array<i32>} : memref<4x32x160xbf16, #tpu.memory_space<vmem>>, vector<1x1x160xbf16>,
    %c0_229 = arith.constant 0 : index
    %c0_230 = arith.constant 0 : index
    %c19_231 = arith.constant 19 : index
    %c0_232 = arith.constant 0 : index
    %191 = vector.load %arg2[%c0_229, %c0_230, %c19_231, %c0_232] : memref<1x1x48x224xbf16, #tpu.memory_space<vmem>>, vector<1x1x1x160xbf16>
    %192 = vector.shape_cast %191 : vector<1x1x1x160xbf16> to vector<1x160xbf16>
    %c1_233 = arith.constant 1 : index
    %c10_234 = arith.constant 10 : index
    %c0_235 = arith.constant 0 : index
    %193 = vector.load %arg6[%c1_233, %c10_234, %c0_235] : memref<4x32x160xbf16, #tpu.memory_space<vmem>>, vector<1x1x160xbf16>
    %194 = vector.shape_cast %193 : vector<1x1x160xbf16> to vector<1x160xbf16>
    %195 = vector.shape_cast %192 : vector<1x160xbf16> to vector<1x1x160xbf16>
    tpu.vector_store %arg6[%c1_233, %c10_234, %c0_235], %195 {strides = array<i32>} : memref<4x32x160xbf16, #tpu.memory_space<vmem>>, vector<1x1x160xbf16>,
    %c0_236 = arith.constant 0 : index
    %c0_237 = arith.constant 0 : index
    %c16_238 = arith.constant 16 : index
    %c1_239 = arith.constant 1 : index
    %196 = vector.load %arg2[%c0_236, %c0_237, %c16_238, %c1_239] : memref<1x1x48x224xbf16, #tpu.memory_space<vmem>>, vector<1x1x1x160xbf16>
    %197 = vector.shape_cast %196 : vector<1x1x1x160xbf16> to vector<1x160xbf16>
    %c1_240 = arith.constant 1 : index
    %c11_241 = arith.constant 11 : index
    %c0_242 = arith.constant 0 : index
    %198 = vector.load %arg6[%c1_240, %c11_241, %c0_242] : memref<4x32x160xbf16, #tpu.memory_space<vmem>>, vector<1x1x160xbf16>
    %199 = vector.shape_cast %198 : vector<1x1x160xbf16> to vector<1x160xbf16>
    %200 = vector.shape_cast %197 : vector<1x160xbf16> to vector<1x1x160xbf16>
    tpu.vector_store %arg6[%c1_240, %c11_241, %c0_242], %200 {strides = array<i32>} : memref<4x32x160xbf16, #tpu.memory_space<vmem>>, vector<1x1x160xbf16>,
    %c0_243 = arith.constant 0 : index
    %c0_244 = arith.constant 0 : index
    %c22_245 = arith.constant 22 : index
    %c0_246 = arith.constant 0 : index
    %201 = vector.load %arg2[%c0_243, %c0_244, %c22_245, %c0_246] : memref<1x1x48x224xbf16, #tpu.memory_space<vmem>>, vector<1x1x1x160xbf16>
    %202 = vector.shape_cast %201 : vector<1x1x1x160xbf16> to vector<1x160xbf16>
    %c1_247 = arith.constant 1 : index
    %c12_248 = arith.constant 12 : index
    %c0_249 = arith.constant 0 : index
    %203 = vector.load %arg6[%c1_247, %c12_248, %c0_249] : memref<4x32x160xbf16, #tpu.memory_space<vmem>>, vector<1x1x160xbf16>
    %204 = vector.shape_cast %203 : vector<1x1x160xbf16> to vector<1x160xbf16>
    %205 = vector.shape_cast %202 : vector<1x160xbf16> to vector<1x1x160xbf16>
    tpu.vector_store %arg6[%c1_247, %c12_248, %c0_249], %205 {strides = array<i32>} : memref<4x32x160xbf16, #tpu.memory_space<vmem>>, vector<1x1x160xbf16>,
    %c0_250 = arith.constant 0 : index
    %c0_251 = arith.constant 0 : index
    %c23_252 = arith.constant 23 : index
    %c0_253 = arith.constant 0 : index
    %206 = vector.load %arg2[%c0_250, %c0_251, %c23_252, %c0_253] : memref<1x1x48x224xbf16, #tpu.memory_space<vmem>>, vector<1x1x1x160xbf16>
    %207 = vector.shape_cast %206 : vector<1x1x1x160xbf16> to vector<1x160xbf16>
    %c1_254 = arith.constant 1 : index
    %c13_255 = arith.constant 13 : index
    %c0_256 = arith.constant 0 : index
    %208 = vector.load %arg6[%c1_254, %c13_255, %c0_256] : memref<4x32x160xbf16, #tpu.memory_space<vmem>>, vector<1x1x160xbf16>
    %209 = vector.shape_cast %208 : vector<1x1x160xbf16> to vector<1x160xbf16>
    %210 = vector.shape_cast %207 : vector<1x160xbf16> to vector<1x1x160xbf16>
    tpu.vector_store %arg6[%c1_254, %c13_255, %c0_256], %210 {strides = array<i32>} : memref<4x32x160xbf16, #tpu.memory_space<vmem>>, vector<1x1x160xbf16>,
    %c0_257 = arith.constant 0 : index
    %c0_258 = arith.constant 0 : index
    %c20_259 = arith.constant 20 : index
    %c1_260 = arith.constant 1 : index
    %211 = vector.load %arg2[%c0_257, %c0_258, %c20_259, %c1_260] : memref<1x1x48x224xbf16, #tpu.memory_space<vmem>>, vector<1x1x1x160xbf16>
    %212 = vector.shape_cast %211 : vector<1x1x1x160xbf16> to vector<1x160xbf16>
    %c1_261 = arith.constant 1 : index
    %c14_262 = arith.constant 14 : index
    %c0_263 = arith.constant 0 : index
    %213 = vector.load %arg6[%c1_261, %c14_262, %c0_263] : memref<4x32x160xbf16, #tpu.memory_space<vmem>>, vector<1x1x160xbf16>
    %214 = vector.shape_cast %213 : vector<1x1x160xbf16> to vector<1x160xbf16>
    %215 = vector.shape_cast %212 : vector<1x160xbf16> to vector<1x1x160xbf16>
    tpu.vector_store %arg6[%c1_261, %c14_262, %c0_263], %215 {strides = array<i32>} : memref<4x32x160xbf16, #tpu.memory_space<vmem>>, vector<1x1x160xbf16>,
    %c0_264 = arith.constant 0 : index
    %c0_265 = arith.constant 0 : index
    %c26_266 = arith.constant 26 : index
    %c0_267 = arith.constant 0 : index
    %216 = vector.load %arg2[%c0_264, %c0_265, %c26_266, %c0_267] : memref<1x1x48x224xbf16, #tpu.memory_space<vmem>>, vector<1x1x1x160xbf16>
    %217 = vector.shape_cast %216 : vector<1x1x1x160xbf16> to vector<1x160xbf16>
    %c1_268 = arith.constant 1 : index
    %c15_269 = arith.constant 15 : index
    %c0_270 = arith.constant 0 : index
    %218 = vector.load %arg6[%c1_268, %c15_269, %c0_270] : memref<4x32x160xbf16, #tpu.memory_space<vmem>>, vector<1x1x160xbf16>
    %219 = vector.shape_cast %218 : vector<1x1x160xbf16> to vector<1x160xbf16>
    %220 = vector.shape_cast %217 : vector<1x160xbf16> to vector<1x1x160xbf16>
    tpu.vector_store %arg6[%c1_268, %c15_269, %c0_270], %220 {strides = array<i32>} : memref<4x32x160xbf16, #tpu.memory_space<vmem>>, vector<1x1x160xbf16>,
    %c0_271 = arith.constant 0 : index
    %c0_272 = arith.constant 0 : index
    %c27_273 = arith.constant 27 : index
    %c0_274 = arith.constant 0 : index
    %221 = vector.load %arg2[%c0_271, %c0_272, %c27_273, %c0_274] : memref<1x1x48x224xbf16, #tpu.memory_space<vmem>>, vector<1x1x1x160xbf16>
    %222 = vector.shape_cast %221 : vector<1x1x1x160xbf16> to vector<1x160xbf16>
    %c1_275 = arith.constant 1 : index
    %c16_276 = arith.constant 16 : index
    %c0_277 = arith.constant 0 : index
    %223 = vector.load %arg6[%c1_275, %c16_276, %c0_277] : memref<4x32x160xbf16, #tpu.memory_space<vmem>>, vector<1x1x160xbf16>
    %224 = vector.shape_cast %223 : vector<1x1x160xbf16> to vector<1x160xbf16>
    %225 = vector.shape_cast %222 : vector<1x160xbf16> to vector<1x1x160xbf16>
    tpu.vector_store %arg6[%c1_275, %c16_276, %c0_277], %225 {strides = array<i32>} : memref<4x32x160xbf16, #tpu.memory_space<vmem>>, vector<1x1x160xbf16>,
    %c0_278 = arith.constant 0 : index
    %c0_279 = arith.constant 0 : index
    %c24_280 = arith.constant 24 : index
    %c1_281 = arith.constant 1 : index
    %226 = vector.load %arg2[%c0_278, %c0_279, %c24_280, %c1_281] : memref<1x1x48x224xbf16, #tpu.memory_space<vmem>>, vector<1x1x1x160xbf16>
    %227 = vector.shape_cast %226 : vector<1x1x1x160xbf16> to vector<1x160xbf16>
    %c1_282 = arith.constant 1 : index
    %c17_283 = arith.constant 17 : index
    %c0_284 = arith.constant 0 : index
    %228 = vector.load %arg6[%c1_282, %c17_283, %c0_284] : memref<4x32x160xbf16, #tpu.memory_space<vmem>>, vector<1x1x160xbf16>
    %229 = vector.shape_cast %228 : vector<1x1x160xbf16> to vector<1x160xbf16>
    %230 = vector.shape_cast %227 : vector<1x160xbf16> to vector<1x1x160xbf16>
    tpu.vector_store %arg6[%c1_282, %c17_283, %c0_284], %230 {strides = array<i32>} : memref<4x32x160xbf16, #tpu.memory_space<vmem>>, vector<1x1x160xbf16>,
    %c0_285 = arith.constant 0 : index
    %c0_286 = arith.constant 0 : index
    %c34_287 = arith.constant 34 : index
    %c0_288 = arith.constant 0 : index
    %231 = vector.load %arg2[%c0_285, %c0_286, %c34_287, %c0_288] : memref<1x1x48x224xbf16, #tpu.memory_space<vmem>>, vector<1x1x1x160xbf16>
    %232 = vector.shape_cast %231 : vector<1x1x1x160xbf16> to vector<1x160xbf16>
    %c1_289 = arith.constant 1 : index
    %c18_290 = arith.constant 18 : index
    %c0_291 = arith.constant 0 : index
    %233 = vector.load %arg6[%c1_289, %c18_290, %c0_291] : memref<4x32x160xbf16, #tpu.memory_space<vmem>>, vector<1x1x160xbf16>
    %234 = vector.shape_cast %233 : vector<1x1x160xbf16> to vector<1x160xbf16>
    %235 = vector.shape_cast %232 : vector<1x160xbf16> to vector<1x1x160xbf16>
    tpu.vector_store %arg6[%c1_289, %c18_290, %c0_291], %235 {strides = array<i32>} : memref<4x32x160xbf16, #tpu.memory_space<vmem>>, vector<1x1x160xbf16>,
    %c0_292 = arith.constant 0 : index
    %c0_293 = arith.constant 0 : index
    %c35 = arith.constant 35 : index
    %c0_294 = arith.constant 0 : index
    %236 = vector.load %arg2[%c0_292, %c0_293, %c35, %c0_294] : memref<1x1x48x224xbf16, #tpu.memory_space<vmem>>, vector<1x1x1x160xbf16>
    %237 = vector.shape_cast %236 : vector<1x1x1x160xbf16> to vector<1x160xbf16>
    %c1_295 = arith.constant 1 : index
    %c19_296 = arith.constant 19 : index
    %c0_297 = arith.constant 0 : index
    %238 = vector.load %arg6[%c1_295, %c19_296, %c0_297] : memref<4x32x160xbf16, #tpu.memory_space<vmem>>, vector<1x1x160xbf16>
    %239 = vector.shape_cast %238 : vector<1x1x160xbf16> to vector<1x160xbf16>
    %240 = vector.shape_cast %237 : vector<1x160xbf16> to vector<1x1x160xbf16>
    tpu.vector_store %arg6[%c1_295, %c19_296, %c0_297], %240 {strides = array<i32>} : memref<4x32x160xbf16, #tpu.memory_space<vmem>>, vector<1x1x160xbf16>,
    %c0_298 = arith.constant 0 : index
    %c0_299 = arith.constant 0 : index
    %c32_300 = arith.constant 32 : index
    %c1_301 = arith.constant 1 : index
    %241 = vector.load %arg2[%c0_298, %c0_299, %c32_300, %c1_301] : memref<1x1x48x224xbf16, #tpu.memory_space<vmem>>, vector<1x1x1x160xbf16>
    %242 = vector.shape_cast %241 : vector<1x1x1x160xbf16> to vector<1x160xbf16>
    %c1_302 = arith.constant 1 : index
    %c20_303 = arith.constant 20 : index
    %c0_304 = arith.constant 0 : index
    %243 = vector.load %arg6[%c1_302, %c20_303, %c0_304] : memref<4x32x160xbf16, #tpu.memory_space<vmem>>, vector<1x1x160xbf16>
    %244 = vector.shape_cast %243 : vector<1x1x160xbf16> to vector<1x160xbf16>
    %245 = vector.shape_cast %242 : vector<1x160xbf16> to vector<1x1x160xbf16>
    tpu.vector_store %arg6[%c1_302, %c20_303, %c0_304], %245 {strides = array<i32>} : memref<4x32x160xbf16, #tpu.memory_space<vmem>>, vector<1x1x160xbf16>,
    %c0_305 = arith.constant 0 : index
    %c0_306 = arith.constant 0 : index
    %c38_307 = arith.constant 38 : index
    %c0_308 = arith.constant 0 : index
    %246 = vector.load %arg2[%c0_305, %c0_306, %c38_307, %c0_308] : memref<1x1x48x224xbf16, #tpu.memory_space<vmem>>, vector<1x1x1x160xbf16>
    %247 = vector.shape_cast %246 : vector<1x1x1x160xbf16> to vector<1x160xbf16>
    %c1_309 = arith.constant 1 : index
    %c21_310 = arith.constant 21 : index
    %c0_311 = arith.constant 0 : index
    %248 = vector.load %arg6[%c1_309, %c21_310, %c0_311] : memref<4x32x160xbf16, #tpu.memory_space<vmem>>, vector<1x1x160xbf16>
    %249 = vector.shape_cast %248 : vector<1x1x160xbf16> to vector<1x160xbf16>
    %250 = vector.shape_cast %247 : vector<1x160xbf16> to vector<1x1x160xbf16>
    tpu.vector_store %arg6[%c1_309, %c21_310, %c0_311], %250 {strides = array<i32>} : memref<4x32x160xbf16, #tpu.memory_space<vmem>>, vector<1x1x160xbf16>,
    %c0_312 = arith.constant 0 : index
    %c0_313 = arith.constant 0 : index
    %c39 = arith.constant 39 : index
    %c0_314 = arith.constant 0 : index
    %251 = vector.load %arg2[%c0_312, %c0_313, %c39, %c0_314] : memref<1x1x48x224xbf16, #tpu.memory_space<vmem>>, vector<1x1x1x160xbf16>
    %252 = vector.shape_cast %251 : vector<1x1x1x160xbf16> to vector<1x160xbf16>
    %c1_315 = arith.constant 1 : index
    %c22_316 = arith.constant 22 : index
    %c0_317 = arith.constant 0 : index
    %253 = vector.load %arg6[%c1_315, %c22_316, %c0_317] : memref<4x32x160xbf16, #tpu.memory_space<vmem>>, vector<1x1x160xbf16>
    %254 = vector.shape_cast %253 : vector<1x1x160xbf16> to vector<1x160xbf16>
    %255 = vector.shape_cast %252 : vector<1x160xbf16> to vector<1x1x160xbf16>
    tpu.vector_store %arg6[%c1_315, %c22_316, %c0_317], %255 {strides = array<i32>} : memref<4x32x160xbf16, #tpu.memory_space<vmem>>, vector<1x1x160xbf16>,
    %c0_318 = arith.constant 0 : index
    %c0_319 = arith.constant 0 : index
    %c36_320 = arith.constant 36 : index
    %c1_321 = arith.constant 1 : index
    %256 = vector.load %arg2[%c0_318, %c0_319, %c36_320, %c1_321] : memref<1x1x48x224xbf16, #tpu.memory_space<vmem>>, vector<1x1x1x160xbf16>
    %257 = vector.shape_cast %256 : vector<1x1x1x160xbf16> to vector<1x160xbf16>
    %c1_322 = arith.constant 1 : index
    %c23_323 = arith.constant 23 : index
    %c0_324 = arith.constant 0 : index
    %258 = vector.load %arg6[%c1_322, %c23_323, %c0_324] : memref<4x32x160xbf16, #tpu.memory_space<vmem>>, vector<1x1x160xbf16>
    %259 = vector.shape_cast %258 : vector<1x1x160xbf16> to vector<1x160xbf16>
    %260 = vector.shape_cast %257 : vector<1x160xbf16> to vector<1x1x160xbf16>
    tpu.vector_store %arg6[%c1_322, %c23_323, %c0_324], %260 {strides = array<i32>} : memref<4x32x160xbf16, #tpu.memory_space<vmem>>, vector<1x1x160xbf16>,
    %c0_325 = arith.constant 0 : index
    %c0_326 = arith.constant 0 : index
    %c42_327 = arith.constant 42 : index
    %c0_328 = arith.constant 0 : index
    %261 = vector.load %arg2[%c0_325, %c0_326, %c42_327, %c0_328] : memref<1x1x48x224xbf16, #tpu.memory_space<vmem>>, vector<1x1x1x160xbf16>
    %262 = vector.shape_cast %261 : vector<1x1x1x160xbf16> to vector<1x160xbf16>
    %c1_329 = arith.constant 1 : index
    %c24_330 = arith.constant 24 : index
    %c0_331 = arith.constant 0 : index
    %263 = vector.load %arg6[%c1_329, %c24_330, %c0_331] : memref<4x32x160xbf16, #tpu.memory_space<vmem>>, vector<1x1x160xbf16>
    %264 = vector.shape_cast %263 : vector<1x1x160xbf16> to vector<1x160xbf16>
    %265 = vector.shape_cast %262 : vector<1x160xbf16> to vector<1x1x160xbf16>
    tpu.vector_store %arg6[%c1_329, %c24_330, %c0_331], %265 {strides = array<i32>} : memref<4x32x160xbf16, #tpu.memory_space<vmem>>, vector<1x1x160xbf16>,
    %c0_332 = arith.constant 0 : index
    %c0_333 = arith.constant 0 : index
    %c43 = arith.constant 43 : index
    %c0_334 = arith.constant 0 : index
    %266 = vector.load %arg2[%c0_332, %c0_333, %c43, %c0_334] : memref<1x1x48x224xbf16, #tpu.memory_space<vmem>>, vector<1x1x1x160xbf16>
    %267 = vector.shape_cast %266 : vector<1x1x1x160xbf16> to vector<1x160xbf16>
    %c1_335 = arith.constant 1 : index
    %c25_336 = arith.constant 25 : index
    %c0_337 = arith.constant 0 : index
    %268 = vector.load %arg6[%c1_335, %c25_336, %c0_337] : memref<4x32x160xbf16, #tpu.memory_space<vmem>>, vector<1x1x160xbf16>
    %269 = vector.shape_cast %268 : vector<1x1x160xbf16> to vector<1x160xbf16>
    %270 = vector.shape_cast %267 : vector<1x160xbf16> to vector<1x1x160xbf16>
    tpu.vector_store %arg6[%c1_335, %c25_336, %c0_337], %270 {strides = array<i32>} : memref<4x32x160xbf16, #tpu.memory_space<vmem>>, vector<1x1x160xbf16>,
    %c0_338 = arith.constant 0 : index
    %c0_339 = arith.constant 0 : index
    %c40_340 = arith.constant 40 : index
    %c1_341 = arith.constant 1 : index
    %271 = vector.load %arg2[%c0_338, %c0_339, %c40_340, %c1_341] : memref<1x1x48x224xbf16, #tpu.memory_space<vmem>>, vector<1x1x1x160xbf16>
    %272 = vector.shape_cast %271 : vector<1x1x1x160xbf16> to vector<1x160xbf16>
    %c1_342 = arith.constant 1 : index
    %c26_343 = arith.constant 26 : index
    %c0_344 = arith.constant 0 : index
    %273 = vector.load %arg6[%c1_342, %c26_343, %c0_344] : memref<4x32x160xbf16, #tpu.memory_space<vmem>>, vector<1x1x160xbf16>
    %274 = vector.shape_cast %273 : vector<1x1x160xbf16> to vector<1x160xbf16>
    %275 = vector.shape_cast %272 : vector<1x160xbf16> to vector<1x1x160xbf16>
    tpu.vector_store %arg6[%c1_342, %c26_343, %c0_344], %275 {strides = array<i32>} : memref<4x32x160xbf16, #tpu.memory_space<vmem>>, vector<1x1x160xbf16>,
    %cst_345 = arith.constant 0.000000e+00 : bf16
    %276 = vector.broadcast %cst_345 : bf16 to vector<5x160xbf16>
    %c1_346 = arith.constant 1 : index
    %c27_347 = arith.constant 27 : index
    %c0_348 = arith.constant 0 : index
    %277 = vector.load %arg6[%c1_346, %c27_347, %c0_348] : memref<4x32x160xbf16, #tpu.memory_space<vmem>>, vector<1x5x160xbf16>
    %278 = vector.shape_cast %277 : vector<1x5x160xbf16> to vector<5x160xbf16>
    %279 = vector.shape_cast %276 : vector<5x160xbf16> to vector<1x5x160xbf16>
    tpu.vector_store %arg6[%c1_346, %c27_347, %c0_348], %279 {strides = array<i32>} : memref<4x32x160xbf16, #tpu.memory_space<vmem>>, vector<1x5x160xbf16>,
    %c0_349 = arith.constant 0 : index
    %c0_350 = arith.constant 0 : index
    %c8_351 = arith.constant 8 : index
    %c0_352 = arith.constant 0 : index
    %280 = vector.load %arg2[%c0_349, %c0_350, %c8_351, %c0_352] : memref<1x1x48x224xbf16, #tpu.memory_space<vmem>>, vector<1x1x1x160xbf16>
    %281 = vector.shape_cast %280 : vector<1x1x1x160xbf16> to vector<1x160xbf16>
    %c2_353 = arith.constant 2 : index
    %c0_354 = arith.constant 0 : index
    %c0_355 = arith.constant 0 : index
    %282 = vector.load %arg6[%c2_353, %c0_354, %c0_355] : memref<4x32x160xbf16, #tpu.memory_space<vmem>>, vector<1x1x160xbf16>
    %283 = vector.shape_cast %282 : vector<1x1x160xbf16> to vector<1x160xbf16>
    %284 = vector.shape_cast %281 : vector<1x160xbf16> to vector<1x1x160xbf16>
    tpu.vector_store %arg6[%c2_353, %c0_354, %c0_355], %284 {strides = array<i32>} : memref<4x32x160xbf16, #tpu.memory_space<vmem>>, vector<1x1x160xbf16>,
    %c0_356 = arith.constant 0 : index
    %c0_357 = arith.constant 0 : index
    %c9_358 = arith.constant 9 : index
    %c0_359 = arith.constant 0 : index
    %285 = vector.load %arg2[%c0_356, %c0_357, %c9_358, %c0_359] : memref<1x1x48x224xbf16, #tpu.memory_space<vmem>>, vector<1x1x1x160xbf16>
    %286 = vector.shape_cast %285 : vector<1x1x1x160xbf16> to vector<1x160xbf16>
    %c2_360 = arith.constant 2 : index
    %c1_361 = arith.constant 1 : index
    %c0_362 = arith.constant 0 : index
    %287 = vector.load %arg6[%c2_360, %c1_361, %c0_362] : memref<4x32x160xbf16, #tpu.memory_space<vmem>>, vector<1x1x160xbf16>
    %288 = vector.shape_cast %287 : vector<1x1x160xbf16> to vector<1x160xbf16>
    %289 = vector.shape_cast %286 : vector<1x160xbf16> to vector<1x1x160xbf16>
    tpu.vector_store %arg6[%c2_360, %c1_361, %c0_362], %289 {strides = array<i32>} : memref<4x32x160xbf16, #tpu.memory_space<vmem>>, vector<1x1x160xbf16>,
    %c0_363 = arith.constant 0 : index
    %c0_364 = arith.constant 0 : index
    %c10_365 = arith.constant 10 : index
    %c0_366 = arith.constant 0 : index
    %290 = vector.load %arg2[%c0_363, %c0_364, %c10_365, %c0_366] : memref<1x1x48x224xbf16, #tpu.memory_space<vmem>>, vector<1x1x1x160xbf16>
    %291 = vector.shape_cast %290 : vector<1x1x1x160xbf16> to vector<1x160xbf16>
    %c2_367 = arith.constant 2 : index
    %c2_368 = arith.constant 2 : index
    %c0_369 = arith.constant 0 : index
    %292 = vector.load %arg6[%c2_367, %c2_368, %c0_369] : memref<4x32x160xbf16, #tpu.memory_space<vmem>>, vector<1x1x160xbf16>
    %293 = vector.shape_cast %292 : vector<1x1x160xbf16> to vector<1x160xbf16>
    %294 = vector.shape_cast %291 : vector<1x160xbf16> to vector<1x1x160xbf16>
    tpu.vector_store %arg6[%c2_367, %c2_368, %c0_369], %294 {strides = array<i32>} : memref<4x32x160xbf16, #tpu.memory_space<vmem>>, vector<1x1x160xbf16>,
    %c0_370 = arith.constant 0 : index
    %c0_371 = arith.constant 0 : index
    %c12_372 = arith.constant 12 : index
    %c0_373 = arith.constant 0 : index
    %295 = vector.load %arg2[%c0_370, %c0_371, %c12_372, %c0_373] : memref<1x1x48x224xbf16, #tpu.memory_space<vmem>>, vector<1x1x1x160xbf16>
    %296 = vector.shape_cast %295 : vector<1x1x1x160xbf16> to vector<1x160xbf16>
    %c2_374 = arith.constant 2 : index
    %c3_375 = arith.constant 3 : index
    %c0_376 = arith.constant 0 : index
    %297 = vector.load %arg6[%c2_374, %c3_375, %c0_376] : memref<4x32x160xbf16, #tpu.memory_space<vmem>>, vector<1x1x160xbf16>
    %298 = vector.shape_cast %297 : vector<1x1x160xbf16> to vector<1x160xbf16>
    %299 = vector.shape_cast %296 : vector<1x160xbf16> to vector<1x1x160xbf16>
    tpu.vector_store %arg6[%c2_374, %c3_375, %c0_376], %299 {strides = array<i32>} : memref<4x32x160xbf16, #tpu.memory_space<vmem>>, vector<1x1x160xbf16>,
    %c0_377 = arith.constant 0 : index
    %c0_378 = arith.constant 0 : index
    %c13_379 = arith.constant 13 : index
    %c0_380 = arith.constant 0 : index
    %300 = vector.load %arg2[%c0_377, %c0_378, %c13_379, %c0_380] : memref<1x1x48x224xbf16, #tpu.memory_space<vmem>>, vector<1x1x1x160xbf16>
    %301 = vector.shape_cast %300 : vector<1x1x1x160xbf16> to vector<1x160xbf16>
    %c2_381 = arith.constant 2 : index
    %c4_382 = arith.constant 4 : index
    %c0_383 = arith.constant 0 : index
    %302 = vector.load %arg6[%c2_381, %c4_382, %c0_383] : memref<4x32x160xbf16, #tpu.memory_space<vmem>>, vector<1x1x160xbf16>
    %303 = vector.shape_cast %302 : vector<1x1x160xbf16> to vector<1x160xbf16>
    %304 = vector.shape_cast %301 : vector<1x160xbf16> to vector<1x1x160xbf16>
    tpu.vector_store %arg6[%c2_381, %c4_382, %c0_383], %304 {strides = array<i32>} : memref<4x32x160xbf16, #tpu.memory_space<vmem>>, vector<1x1x160xbf16>,
    %c0_384 = arith.constant 0 : index
    %c0_385 = arith.constant 0 : index
    %c14_386 = arith.constant 14 : index
    %c0_387 = arith.constant 0 : index
    %305 = vector.load %arg2[%c0_384, %c0_385, %c14_386, %c0_387] : memref<1x1x48x224xbf16, #tpu.memory_space<vmem>>, vector<1x1x1x160xbf16>
    %306 = vector.shape_cast %305 : vector<1x1x1x160xbf16> to vector<1x160xbf16>
    %c2_388 = arith.constant 2 : index
    %c5_389 = arith.constant 5 : index
    %c0_390 = arith.constant 0 : index
    %307 = vector.load %arg6[%c2_388, %c5_389, %c0_390] : memref<4x32x160xbf16, #tpu.memory_space<vmem>>, vector<1x1x160xbf16>
    %308 = vector.shape_cast %307 : vector<1x1x160xbf16> to vector<1x160xbf16>
    %309 = vector.shape_cast %306 : vector<1x160xbf16> to vector<1x1x160xbf16>
    tpu.vector_store %arg6[%c2_388, %c5_389, %c0_390], %309 {strides = array<i32>} : memref<4x32x160xbf16, #tpu.memory_space<vmem>>, vector<1x1x160xbf16>,
    %c0_391 = arith.constant 0 : index
    %c0_392 = arith.constant 0 : index
    %c0_393 = arith.constant 0 : index
    %c32_394 = arith.constant 32 : index
    %310 = vector.load %arg2[%c0_391, %c0_392, %c0_393, %c32_394] : memref<1x1x48x224xbf16, #tpu.memory_space<vmem>>, vector<1x1x1x160xbf16>
    %311 = vector.shape_cast %310 : vector<1x1x1x160xbf16> to vector<1x160xbf16>
    %c2_395 = arith.constant 2 : index
    %c6_396 = arith.constant 6 : index
    %c0_397 = arith.constant 0 : index
    %312 = vector.load %arg6[%c2_395, %c6_396, %c0_397] : memref<4x32x160xbf16, #tpu.memory_space<vmem>>, vector<1x1x160xbf16>
    %313 = vector.shape_cast %312 : vector<1x1x160xbf16> to vector<1x160xbf16>
    %314 = vector.shape_cast %311 : vector<1x160xbf16> to vector<1x1x160xbf16>
    tpu.vector_store %arg6[%c2_395, %c6_396, %c0_397], %314 {strides = array<i32>} : memref<4x32x160xbf16, #tpu.memory_space<vmem>>, vector<1x1x160xbf16>,
    %c0_398 = arith.constant 0 : index
    %c0_399 = arith.constant 0 : index
    %c1_400 = arith.constant 1 : index
    %c32_401 = arith.constant 32 : index
    %315 = vector.load %arg2[%c0_398, %c0_399, %c1_400, %c32_401] : memref<1x1x48x224xbf16, #tpu.memory_space<vmem>>, vector<1x1x1x160xbf16>
    %316 = vector.shape_cast %315 : vector<1x1x1x160xbf16> to vector<1x160xbf16>
    %c2_402 = arith.constant 2 : index
    %c7_403 = arith.constant 7 : index
    %c0_404 = arith.constant 0 : index
    %317 = vector.load %arg6[%c2_402, %c7_403, %c0_404] : memref<4x32x160xbf16, #tpu.memory_space<vmem>>, vector<1x1x160xbf16>
    %318 = vector.shape_cast %317 : vector<1x1x160xbf16> to vector<1x160xbf16>
    %319 = vector.shape_cast %316 : vector<1x160xbf16> to vector<1x1x160xbf16>
    tpu.vector_store %arg6[%c2_402, %c7_403, %c0_404], %319 {strides = array<i32>} : memref<4x32x160xbf16, #tpu.memory_space<vmem>>, vector<1x1x160xbf16>,
    %c0_405 = arith.constant 0 : index
    %c0_406 = arith.constant 0 : index
    %c2_407 = arith.constant 2 : index
    %c32_408 = arith.constant 32 : index
    %320 = vector.load %arg2[%c0_405, %c0_406, %c2_407, %c32_408] : memref<1x1x48x224xbf16, #tpu.memory_space<vmem>>, vector<1x1x1x160xbf16>
    %321 = vector.shape_cast %320 : vector<1x1x1x160xbf16> to vector<1x160xbf16>
    %c2_409 = arith.constant 2 : index
    %c8_410 = arith.constant 8 : index
    %c0_411 = arith.constant 0 : index
    %322 = vector.load %arg6[%c2_409, %c8_410, %c0_411] : memref<4x32x160xbf16, #tpu.memory_space<vmem>>, vector<1x1x160xbf16>
    %323 = vector.shape_cast %322 : vector<1x1x160xbf16> to vector<1x160xbf16>
    %324 = vector.shape_cast %321 : vector<1x160xbf16> to vector<1x1x160xbf16>
    tpu.vector_store %arg6[%c2_409, %c8_410, %c0_411], %324 {strides = array<i32>} : memref<4x32x160xbf16, #tpu.memory_space<vmem>>, vector<1x1x160xbf16>,
    %c0_412 = arith.constant 0 : index
    %c0_413 = arith.constant 0 : index
    %c24_414 = arith.constant 24 : index
    %c0_415 = arith.constant 0 : index
    %325 = vector.load %arg2[%c0_412, %c0_413, %c24_414, %c0_415] : memref<1x1x48x224xbf16, #tpu.memory_space<vmem>>, vector<1x1x1x160xbf16>
    %326 = vector.shape_cast %325 : vector<1x1x1x160xbf16> to vector<1x160xbf16>
    %c2_416 = arith.constant 2 : index
    %c9_417 = arith.constant 9 : index
    %c0_418 = arith.constant 0 : index
    %327 = vector.load %arg6[%c2_416, %c9_417, %c0_418] : memref<4x32x160xbf16, #tpu.memory_space<vmem>>, vector<1x1x160xbf16>
    %328 = vector.shape_cast %327 : vector<1x1x160xbf16> to vector<1x160xbf16>
    %329 = vector.shape_cast %326 : vector<1x160xbf16> to vector<1x1x160xbf16>
    tpu.vector_store %arg6[%c2_416, %c9_417, %c0_418], %329 {strides = array<i32>} : memref<4x32x160xbf16, #tpu.memory_space<vmem>>, vector<1x1x160xbf16>,
    %c0_419 = arith.constant 0 : index
    %c0_420 = arith.constant 0 : index
    %c25_421 = arith.constant 25 : index
    %c0_422 = arith.constant 0 : index
    %330 = vector.load %arg2[%c0_419, %c0_420, %c25_421, %c0_422] : memref<1x1x48x224xbf16, #tpu.memory_space<vmem>>, vector<1x1x1x160xbf16>
    %331 = vector.shape_cast %330 : vector<1x1x1x160xbf16> to vector<1x160xbf16>
    %c2_423 = arith.constant 2 : index
    %c10_424 = arith.constant 10 : index
    %c0_425 = arith.constant 0 : index
    %332 = vector.load %arg6[%c2_423, %c10_424, %c0_425] : memref<4x32x160xbf16, #tpu.memory_space<vmem>>, vector<1x1x160xbf16>
    %333 = vector.shape_cast %332 : vector<1x1x160xbf16> to vector<1x160xbf16>
    %334 = vector.shape_cast %331 : vector<1x160xbf16> to vector<1x1x160xbf16>
    tpu.vector_store %arg6[%c2_423, %c10_424, %c0_425], %334 {strides = array<i32>} : memref<4x32x160xbf16, #tpu.memory_space<vmem>>, vector<1x1x160xbf16>,
    %c0_426 = arith.constant 0 : index
    %c0_427 = arith.constant 0 : index
    %c26_428 = arith.constant 26 : index
    %c0_429 = arith.constant 0 : index
    %335 = vector.load %arg2[%c0_426, %c0_427, %c26_428, %c0_429] : memref<1x1x48x224xbf16, #tpu.memory_space<vmem>>, vector<1x1x1x160xbf16>
    %336 = vector.shape_cast %335 : vector<1x1x1x160xbf16> to vector<1x160xbf16>
    %c2_430 = arith.constant 2 : index
    %c11_431 = arith.constant 11 : index
    %c0_432 = arith.constant 0 : index
    %337 = vector.load %arg6[%c2_430, %c11_431, %c0_432] : memref<4x32x160xbf16, #tpu.memory_space<vmem>>, vector<1x1x160xbf16>
    %338 = vector.shape_cast %337 : vector<1x1x160xbf16> to vector<1x160xbf16>
    %339 = vector.shape_cast %336 : vector<1x160xbf16> to vector<1x1x160xbf16>
    tpu.vector_store %arg6[%c2_430, %c11_431, %c0_432], %339 {strides = array<i32>} : memref<4x32x160xbf16, #tpu.memory_space<vmem>>, vector<1x1x160xbf16>,
    %c0_433 = arith.constant 0 : index
    %c0_434 = arith.constant 0 : index
    %c28 = arith.constant 28 : index
    %c0_435 = arith.constant 0 : index
    %340 = vector.load %arg2[%c0_433, %c0_434, %c28, %c0_435] : memref<1x1x48x224xbf16, #tpu.memory_space<vmem>>, vector<1x1x1x160xbf16>
    %341 = vector.shape_cast %340 : vector<1x1x1x160xbf16> to vector<1x160xbf16>
    %c2_436 = arith.constant 2 : index
    %c12_437 = arith.constant 12 : index
    %c0_438 = arith.constant 0 : index
    %342 = vector.load %arg6[%c2_436, %c12_437, %c0_438] : memref<4x32x160xbf16, #tpu.memory_space<vmem>>, vector<1x1x160xbf16>
    %343 = vector.shape_cast %342 : vector<1x1x160xbf16> to vector<1x160xbf16>
    %344 = vector.shape_cast %341 : vector<1x160xbf16> to vector<1x1x160xbf16>
    tpu.vector_store %arg6[%c2_436, %c12_437, %c0_438], %344 {strides = array<i32>} : memref<4x32x160xbf16, #tpu.memory_space<vmem>>, vector<1x1x160xbf16>,
    %c0_439 = arith.constant 0 : index
    %c0_440 = arith.constant 0 : index
    %c29 = arith.constant 29 : index
    %c0_441 = arith.constant 0 : index
    %345 = vector.load %arg2[%c0_439, %c0_440, %c29, %c0_441] : memref<1x1x48x224xbf16, #tpu.memory_space<vmem>>, vector<1x1x1x160xbf16>
    %346 = vector.shape_cast %345 : vector<1x1x1x160xbf16> to vector<1x160xbf16>
    %c2_442 = arith.constant 2 : index
    %c13_443 = arith.constant 13 : index
    %c0_444 = arith.constant 0 : index
    %347 = vector.load %arg6[%c2_442, %c13_443, %c0_444] : memref<4x32x160xbf16, #tpu.memory_space<vmem>>, vector<1x1x160xbf16>
    %348 = vector.shape_cast %347 : vector<1x1x160xbf16> to vector<1x160xbf16>
    %349 = vector.shape_cast %346 : vector<1x160xbf16> to vector<1x1x160xbf16>
    tpu.vector_store %arg6[%c2_442, %c13_443, %c0_444], %349 {strides = array<i32>} : memref<4x32x160xbf16, #tpu.memory_space<vmem>>, vector<1x1x160xbf16>,
    %c0_445 = arith.constant 0 : index
    %c0_446 = arith.constant 0 : index
    %c30 = arith.constant 30 : index
    %c0_447 = arith.constant 0 : index
    %350 = vector.load %arg2[%c0_445, %c0_446, %c30, %c0_447] : memref<1x1x48x224xbf16, #tpu.memory_space<vmem>>, vector<1x1x1x160xbf16>
    %351 = vector.shape_cast %350 : vector<1x1x1x160xbf16> to vector<1x160xbf16>
    %c2_448 = arith.constant 2 : index
    %c14_449 = arith.constant 14 : index
    %c0_450 = arith.constant 0 : index
    %352 = vector.load %arg6[%c2_448, %c14_449, %c0_450] : memref<4x32x160xbf16, #tpu.memory_space<vmem>>, vector<1x1x160xbf16>
    %353 = vector.shape_cast %352 : vector<1x1x160xbf16> to vector<1x160xbf16>
    %354 = vector.shape_cast %351 : vector<1x160xbf16> to vector<1x1x160xbf16>
    tpu.vector_store %arg6[%c2_448, %c14_449, %c0_450], %354 {strides = array<i32>} : memref<4x32x160xbf16, #tpu.memory_space<vmem>>, vector<1x1x160xbf16>,
    %c0_451 = arith.constant 0 : index
    %c0_452 = arith.constant 0 : index
    %c16_453 = arith.constant 16 : index
    %c32_454 = arith.constant 32 : index
    %355 = vector.load %arg2[%c0_451, %c0_452, %c16_453, %c32_454] : memref<1x1x48x224xbf16, #tpu.memory_space<vmem>>, vector<1x1x1x160xbf16>
    %356 = vector.shape_cast %355 : vector<1x1x1x160xbf16> to vector<1x160xbf16>
    %c2_455 = arith.constant 2 : index
    %c15_456 = arith.constant 15 : index
    %c0_457 = arith.constant 0 : index
    %357 = vector.load %arg6[%c2_455, %c15_456, %c0_457] : memref<4x32x160xbf16, #tpu.memory_space<vmem>>, vector<1x1x160xbf16>
    %358 = vector.shape_cast %357 : vector<1x1x160xbf16> to vector<1x160xbf16>
    %359 = vector.shape_cast %356 : vector<1x160xbf16> to vector<1x1x160xbf16>
    tpu.vector_store %arg6[%c2_455, %c15_456, %c0_457], %359 {strides = array<i32>} : memref<4x32x160xbf16, #tpu.memory_space<vmem>>, vector<1x1x160xbf16>,
    %c0_458 = arith.constant 0 : index
    %c0_459 = arith.constant 0 : index
    %c17_460 = arith.constant 17 : index
    %c32_461 = arith.constant 32 : index
    %360 = vector.load %arg2[%c0_458, %c0_459, %c17_460, %c32_461] : memref<1x1x48x224xbf16, #tpu.memory_space<vmem>>, vector<1x1x1x160xbf16>
    %361 = vector.shape_cast %360 : vector<1x1x1x160xbf16> to vector<1x160xbf16>
    %c2_462 = arith.constant 2 : index
    %c16_463 = arith.constant 16 : index
    %c0_464 = arith.constant 0 : index
    %362 = vector.load %arg6[%c2_462, %c16_463, %c0_464] : memref<4x32x160xbf16, #tpu.memory_space<vmem>>, vector<1x1x160xbf16>
    %363 = vector.shape_cast %362 : vector<1x1x160xbf16> to vector<1x160xbf16>
    %364 = vector.shape_cast %361 : vector<1x160xbf16> to vector<1x1x160xbf16>
    tpu.vector_store %arg6[%c2_462, %c16_463, %c0_464], %364 {strides = array<i32>} : memref<4x32x160xbf16, #tpu.memory_space<vmem>>, vector<1x1x160xbf16>,
    %c0_465 = arith.constant 0 : index
    %c0_466 = arith.constant 0 : index
    %c18_467 = arith.constant 18 : index
    %c32_468 = arith.constant 32 : index
    %365 = vector.load %arg2[%c0_465, %c0_466, %c18_467, %c32_468] : memref<1x1x48x224xbf16, #tpu.memory_space<vmem>>, vector<1x1x1x160xbf16>
    %366 = vector.shape_cast %365 : vector<1x1x1x160xbf16> to vector<1x160xbf16>
    %c2_469 = arith.constant 2 : index
    %c17_470 = arith.constant 17 : index
    %c0_471 = arith.constant 0 : index
    %367 = vector.load %arg6[%c2_469, %c17_470, %c0_471] : memref<4x32x160xbf16, #tpu.memory_space<vmem>>, vector<1x1x160xbf16>
    %368 = vector.shape_cast %367 : vector<1x1x160xbf16> to vector<1x160xbf16>
    %369 = vector.shape_cast %366 : vector<1x160xbf16> to vector<1x1x160xbf16>
    tpu.vector_store %arg6[%c2_469, %c17_470, %c0_471], %369 {strides = array<i32>} : memref<4x32x160xbf16, #tpu.memory_space<vmem>>, vector<1x1x160xbf16>,
    %c0_472 = arith.constant 0 : index
    %c0_473 = arith.constant 0 : index
    %c40_474 = arith.constant 40 : index
    %c0_475 = arith.constant 0 : index
    %370 = vector.load %arg2[%c0_472, %c0_473, %c40_474, %c0_475] : memref<1x1x48x224xbf16, #tpu.memory_space<vmem>>, vector<1x1x1x160xbf16>
    %371 = vector.shape_cast %370 : vector<1x1x1x160xbf16> to vector<1x160xbf16>
    %c2_476 = arith.constant 2 : index
    %c18_477 = arith.constant 18 : index
    %c0_478 = arith.constant 0 : index
    %372 = vector.load %arg6[%c2_476, %c18_477, %c0_478] : memref<4x32x160xbf16, #tpu.memory_space<vmem>>, vector<1x1x160xbf16>
    %373 = vector.shape_cast %372 : vector<1x1x160xbf16> to vector<1x160xbf16>
    %374 = vector.shape_cast %371 : vector<1x160xbf16> to vector<1x1x160xbf16>
    tpu.vector_store %arg6[%c2_476, %c18_477, %c0_478], %374 {strides = array<i32>} : memref<4x32x160xbf16, #tpu.memory_space<vmem>>, vector<1x1x160xbf16>,
    %c0_479 = arith.constant 0 : index
    %c0_480 = arith.constant 0 : index
    %c41_481 = arith.constant 41 : index
    %c0_482 = arith.constant 0 : index
    %375 = vector.load %arg2[%c0_479, %c0_480, %c41_481, %c0_482] : memref<1x1x48x224xbf16, #tpu.memory_space<vmem>>, vector<1x1x1x160xbf16>
    %376 = vector.shape_cast %375 : vector<1x1x1x160xbf16> to vector<1x160xbf16>
    %c2_483 = arith.constant 2 : index
    %c19_484 = arith.constant 19 : index
    %c0_485 = arith.constant 0 : index
    %377 = vector.load %arg6[%c2_483, %c19_484, %c0_485] : memref<4x32x160xbf16, #tpu.memory_space<vmem>>, vector<1x1x160xbf16>
    %378 = vector.shape_cast %377 : vector<1x1x160xbf16> to vector<1x160xbf16>
    %379 = vector.shape_cast %376 : vector<1x160xbf16> to vector<1x1x160xbf16>
    tpu.vector_store %arg6[%c2_483, %c19_484, %c0_485], %379 {strides = array<i32>} : memref<4x32x160xbf16, #tpu.memory_space<vmem>>, vector<1x1x160xbf16>,
    %c0_486 = arith.constant 0 : index
    %c0_487 = arith.constant 0 : index
    %c42_488 = arith.constant 42 : index
    %c0_489 = arith.constant 0 : index
    %380 = vector.load %arg2[%c0_486, %c0_487, %c42_488, %c0_489] : memref<1x1x48x224xbf16, #tpu.memory_space<vmem>>, vector<1x1x1x160xbf16>
    %381 = vector.shape_cast %380 : vector<1x1x1x160xbf16> to vector<1x160xbf16>
    %c2_490 = arith.constant 2 : index
    %c20_491 = arith.constant 20 : index
    %c0_492 = arith.constant 0 : index
    %382 = vector.load %arg6[%c2_490, %c20_491, %c0_492] : memref<4x32x160xbf16, #tpu.memory_space<vmem>>, vector<1x1x160xbf16>
    %383 = vector.shape_cast %382 : vector<1x1x160xbf16> to vector<1x160xbf16>
    %384 = vector.shape_cast %381 : vector<1x160xbf16> to vector<1x1x160xbf16>
    tpu.vector_store %arg6[%c2_490, %c20_491, %c0_492], %384 {strides = array<i32>} : memref<4x32x160xbf16, #tpu.memory_space<vmem>>, vector<1x1x160xbf16>,
    %c0_493 = arith.constant 0 : index
    %c0_494 = arith.constant 0 : index
    %c44 = arith.constant 44 : index
    %c0_495 = arith.constant 0 : index
    %385 = vector.load %arg2[%c0_493, %c0_494, %c44, %c0_495] : memref<1x1x48x224xbf16, #tpu.memory_space<vmem>>, vector<1x1x1x160xbf16>
    %386 = vector.shape_cast %385 : vector<1x1x1x160xbf16> to vector<1x160xbf16>
    %c2_496 = arith.constant 2 : index
    %c21_497 = arith.constant 21 : index
    %c0_498 = arith.constant 0 : index
    %387 = vector.load %arg6[%c2_496, %c21_497, %c0_498] : memref<4x32x160xbf16, #tpu.memory_space<vmem>>, vector<1x1x160xbf16>
    %388 = vector.shape_cast %387 : vector<1x1x160xbf16> to vector<1x160xbf16>
    %389 = vector.shape_cast %386 : vector<1x160xbf16> to vector<1x1x160xbf16>
    tpu.vector_store %arg6[%c2_496, %c21_497, %c0_498], %389 {strides = array<i32>} : memref<4x32x160xbf16, #tpu.memory_space<vmem>>, vector<1x1x160xbf16>,
    %c0_499 = arith.constant 0 : index
    %c0_500 = arith.constant 0 : index
    %c45 = arith.constant 45 : index
    %c0_501 = arith.constant 0 : index
    %390 = vector.load %arg2[%c0_499, %c0_500, %c45, %c0_501] : memref<1x1x48x224xbf16, #tpu.memory_space<vmem>>, vector<1x1x1x160xbf16>
    %391 = vector.shape_cast %390 : vector<1x1x1x160xbf16> to vector<1x160xbf16>
    %c2_502 = arith.constant 2 : index
    %c22_503 = arith.constant 22 : index
    %c0_504 = arith.constant 0 : index
    %392 = vector.load %arg6[%c2_502, %c22_503, %c0_504] : memref<4x32x160xbf16, #tpu.memory_space<vmem>>, vector<1x1x160xbf16>
    %393 = vector.shape_cast %392 : vector<1x1x160xbf16> to vector<1x160xbf16>
    %394 = vector.shape_cast %391 : vector<1x160xbf16> to vector<1x1x160xbf16>
    tpu.vector_store %arg6[%c2_502, %c22_503, %c0_504], %394 {strides = array<i32>} : memref<4x32x160xbf16, #tpu.memory_space<vmem>>, vector<1x1x160xbf16>,
    %c0_505 = arith.constant 0 : index
    %c0_506 = arith.constant 0 : index
    %c46 = arith.constant 46 : index
    %c0_507 = arith.constant 0 : index
    %395 = vector.load %arg2[%c0_505, %c0_506, %c46, %c0_507] : memref<1x1x48x224xbf16, #tpu.memory_space<vmem>>, vector<1x1x1x160xbf16>
    %396 = vector.shape_cast %395 : vector<1x1x1x160xbf16> to vector<1x160xbf16>
    %c2_508 = arith.constant 2 : index
    %c23_509 = arith.constant 23 : index
    %c0_510 = arith.constant 0 : index
    %397 = vector.load %arg6[%c2_508, %c23_509, %c0_510] : memref<4x32x160xbf16, #tpu.memory_space<vmem>>, vector<1x1x160xbf16>
    %398 = vector.shape_cast %397 : vector<1x1x160xbf16> to vector<1x160xbf16>
    %399 = vector.shape_cast %396 : vector<1x160xbf16> to vector<1x1x160xbf16>
    tpu.vector_store %arg6[%c2_508, %c23_509, %c0_510], %399 {strides = array<i32>} : memref<4x32x160xbf16, #tpu.memory_space<vmem>>, vector<1x1x160xbf16>,
    %c0_511 = arith.constant 0 : index
    %c0_512 = arith.constant 0 : index
    %c32_513 = arith.constant 32 : index
    %c32_514 = arith.constant 32 : index
    %400 = vector.load %arg2[%c0_511, %c0_512, %c32_513, %c32_514] : memref<1x1x48x224xbf16, #tpu.memory_space<vmem>>, vector<1x1x1x160xbf16>
    %401 = vector.shape_cast %400 : vector<1x1x1x160xbf16> to vector<1x160xbf16>
    %c2_515 = arith.constant 2 : index
    %c24_516 = arith.constant 24 : index
    %c0_517 = arith.constant 0 : index
    %402 = vector.load %arg6[%c2_515, %c24_516, %c0_517] : memref<4x32x160xbf16, #tpu.memory_space<vmem>>, vector<1x1x160xbf16>
    %403 = vector.shape_cast %402 : vector<1x1x160xbf16> to vector<1x160xbf16>
    %404 = vector.shape_cast %401 : vector<1x160xbf16> to vector<1x1x160xbf16>
    tpu.vector_store %arg6[%c2_515, %c24_516, %c0_517], %404 {strides = array<i32>} : memref<4x32x160xbf16, #tpu.memory_space<vmem>>, vector<1x1x160xbf16>,
    %c0_518 = arith.constant 0 : index
    %c0_519 = arith.constant 0 : index
    %c33_520 = arith.constant 33 : index
    %c32_521 = arith.constant 32 : index
    %405 = vector.load %arg2[%c0_518, %c0_519, %c33_520, %c32_521] : memref<1x1x48x224xbf16, #tpu.memory_space<vmem>>, vector<1x1x1x160xbf16>
    %406 = vector.shape_cast %405 : vector<1x1x1x160xbf16> to vector<1x160xbf16>
    %c2_522 = arith.constant 2 : index
    %c25_523 = arith.constant 25 : index
    %c0_524 = arith.constant 0 : index
    %407 = vector.load %arg6[%c2_522, %c25_523, %c0_524] : memref<4x32x160xbf16, #tpu.memory_space<vmem>>, vector<1x1x160xbf16>
    %408 = vector.shape_cast %407 : vector<1x1x160xbf16> to vector<1x160xbf16>
    %409 = vector.shape_cast %406 : vector<1x160xbf16> to vector<1x1x160xbf16>
    tpu.vector_store %arg6[%c2_522, %c25_523, %c0_524], %409 {strides = array<i32>} : memref<4x32x160xbf16, #tpu.memory_space<vmem>>, vector<1x1x160xbf16>,
    %c0_525 = arith.constant 0 : index
    %c0_526 = arith.constant 0 : index
    %c34_527 = arith.constant 34 : index
    %c32_528 = arith.constant 32 : index
    %410 = vector.load %arg2[%c0_525, %c0_526, %c34_527, %c32_528] : memref<1x1x48x224xbf16, #tpu.memory_space<vmem>>, vector<1x1x1x160xbf16>
    %411 = vector.shape_cast %410 : vector<1x1x1x160xbf16> to vector<1x160xbf16>
    %c2_529 = arith.constant 2 : index
    %c26_530 = arith.constant 26 : index
    %c0_531 = arith.constant 0 : index
    %412 = vector.load %arg6[%c2_529, %c26_530, %c0_531] : memref<4x32x160xbf16, #tpu.memory_space<vmem>>, vector<1x1x160xbf16>
    %413 = vector.shape_cast %412 : vector<1x1x160xbf16> to vector<1x160xbf16>
    %414 = vector.shape_cast %411 : vector<1x160xbf16> to vector<1x1x160xbf16>
    tpu.vector_store %arg6[%c2_529, %c26_530, %c0_531], %414 {strides = array<i32>} : memref<4x32x160xbf16, #tpu.memory_space<vmem>>, vector<1x1x160xbf16>,
    %cst_532 = arith.constant 0.000000e+00 : bf16
    %415 = vector.broadcast %cst_532 : bf16 to vector<5x160xbf16>
    %c2_533 = arith.constant 2 : index
    %c27_534 = arith.constant 27 : index
    %c0_535 = arith.constant 0 : index
    %416 = vector.load %arg6[%c2_533, %c27_534, %c0_535] : memref<4x32x160xbf16, #tpu.memory_space<vmem>>, vector<1x5x160xbf16>
    %417 = vector.shape_cast %416 : vector<1x5x160xbf16> to vector<5x160xbf16>
    %418 = vector.shape_cast %415 : vector<5x160xbf16> to vector<1x5x160xbf16>
    tpu.vector_store %arg6[%c2_533, %c27_534, %c0_535], %418 {strides = array<i32>} : memref<4x32x160xbf16, #tpu.memory_space<vmem>>, vector<1x5x160xbf16>,
    %c0_536 = arith.constant 0 : index
    %c0_537 = arith.constant 0 : index
    %c10_538 = arith.constant 10 : index
    %c0_539 = arith.constant 0 : index
    %419 = vector.load %arg2[%c0_536, %c0_537, %c10_538, %c0_539] : memref<1x1x48x224xbf16, #tpu.memory_space<vmem>>, vector<1x1x1x160xbf16>
    %420 = vector.shape_cast %419 : vector<1x1x1x160xbf16> to vector<1x160xbf16>
    %c3_540 = arith.constant 3 : index
    %c0_541 = arith.constant 0 : index
    %c0_542 = arith.constant 0 : index
    %421 = vector.load %arg6[%c3_540, %c0_541, %c0_542] : memref<4x32x160xbf16, #tpu.memory_space<vmem>>, vector<1x1x160xbf16>
    %422 = vector.shape_cast %421 : vector<1x1x160xbf16> to vector<1x160xbf16>
    %423 = vector.shape_cast %420 : vector<1x160xbf16> to vector<1x1x160xbf16>
    tpu.vector_store %arg6[%c3_540, %c0_541, %c0_542], %423 {strides = array<i32>} : memref<4x32x160xbf16, #tpu.memory_space<vmem>>, vector<1x1x160xbf16>,
    %c0_543 = arith.constant 0 : index
    %c0_544 = arith.constant 0 : index
    %c11_545 = arith.constant 11 : index
    %c0_546 = arith.constant 0 : index
    %424 = vector.load %arg2[%c0_543, %c0_544, %c11_545, %c0_546] : memref<1x1x48x224xbf16, #tpu.memory_space<vmem>>, vector<1x1x1x160xbf16>
    %425 = vector.shape_cast %424 : vector<1x1x1x160xbf16> to vector<1x160xbf16>
    %c3_547 = arith.constant 3 : index
    %c1_548 = arith.constant 1 : index
    %c0_549 = arith.constant 0 : index
    %426 = vector.load %arg6[%c3_547, %c1_548, %c0_549] : memref<4x32x160xbf16, #tpu.memory_space<vmem>>, vector<1x1x160xbf16>
    %427 = vector.shape_cast %426 : vector<1x1x160xbf16> to vector<1x160xbf16>
    %428 = vector.shape_cast %425 : vector<1x160xbf16> to vector<1x1x160xbf16>
    tpu.vector_store %arg6[%c3_547, %c1_548, %c0_549], %428 {strides = array<i32>} : memref<4x32x160xbf16, #tpu.memory_space<vmem>>, vector<1x1x160xbf16>,
    %c0_550 = arith.constant 0 : index
    %c0_551 = arith.constant 0 : index
    %c8_552 = arith.constant 8 : index
    %c1_553 = arith.constant 1 : index
    %429 = vector.load %arg2[%c0_550, %c0_551, %c8_552, %c1_553] : memref<1x1x48x224xbf16, #tpu.memory_space<vmem>>, vector<1x1x1x160xbf16>
    %430 = vector.shape_cast %429 : vector<1x1x1x160xbf16> to vector<1x160xbf16>
    %c3_554 = arith.constant 3 : index
    %c2_555 = arith.constant 2 : index
    %c0_556 = arith.constant 0 : index
    %431 = vector.load %arg6[%c3_554, %c2_555, %c0_556] : memref<4x32x160xbf16, #tpu.memory_space<vmem>>, vector<1x1x160xbf16>
    %432 = vector.shape_cast %431 : vector<1x1x160xbf16> to vector<1x160xbf16>
    %433 = vector.shape_cast %430 : vector<1x160xbf16> to vector<1x1x160xbf16>
    tpu.vector_store %arg6[%c3_554, %c2_555, %c0_556], %433 {strides = array<i32>} : memref<4x32x160xbf16, #tpu.memory_space<vmem>>, vector<1x1x160xbf16>,
    %c0_557 = arith.constant 0 : index
    %c0_558 = arith.constant 0 : index
    %c14_559 = arith.constant 14 : index
    %c0_560 = arith.constant 0 : index
    %434 = vector.load %arg2[%c0_557, %c0_558, %c14_559, %c0_560] : memref<1x1x48x224xbf16, #tpu.memory_space<vmem>>, vector<1x1x1x160xbf16>
    %435 = vector.shape_cast %434 : vector<1x1x1x160xbf16> to vector<1x160xbf16>
    %c3_561 = arith.constant 3 : index
    %c3_562 = arith.constant 3 : index
    %c0_563 = arith.constant 0 : index
    %436 = vector.load %arg6[%c3_561, %c3_562, %c0_563] : memref<4x32x160xbf16, #tpu.memory_space<vmem>>, vector<1x1x160xbf16>
    %437 = vector.shape_cast %436 : vector<1x1x160xbf16> to vector<1x160xbf16>
    %438 = vector.shape_cast %435 : vector<1x160xbf16> to vector<1x1x160xbf16>
    tpu.vector_store %arg6[%c3_561, %c3_562, %c0_563], %438 {strides = array<i32>} : memref<4x32x160xbf16, #tpu.memory_space<vmem>>, vector<1x1x160xbf16>,
    %c0_564 = arith.constant 0 : index
    %c0_565 = arith.constant 0 : index
    %c15_566 = arith.constant 15 : index
    %c0_567 = arith.constant 0 : index
    %439 = vector.load %arg2[%c0_564, %c0_565, %c15_566, %c0_567] : memref<1x1x48x224xbf16, #tpu.memory_space<vmem>>, vector<1x1x1x160xbf16>
    %440 = vector.shape_cast %439 : vector<1x1x1x160xbf16> to vector<1x160xbf16>
    %c3_568 = arith.constant 3 : index
    %c4_569 = arith.constant 4 : index
    %c0_570 = arith.constant 0 : index
    %441 = vector.load %arg6[%c3_568, %c4_569, %c0_570] : memref<4x32x160xbf16, #tpu.memory_space<vmem>>, vector<1x1x160xbf16>
    %442 = vector.shape_cast %441 : vector<1x1x160xbf16> to vector<1x160xbf16>
    %443 = vector.shape_cast %440 : vector<1x160xbf16> to vector<1x1x160xbf16>
    tpu.vector_store %arg6[%c3_568, %c4_569, %c0_570], %443 {strides = array<i32>} : memref<4x32x160xbf16, #tpu.memory_space<vmem>>, vector<1x1x160xbf16>,
    %c0_571 = arith.constant 0 : index
    %c0_572 = arith.constant 0 : index
    %c12_573 = arith.constant 12 : index
    %c1_574 = arith.constant 1 : index
    %444 = vector.load %arg2[%c0_571, %c0_572, %c12_573, %c1_574] : memref<1x1x48x224xbf16, #tpu.memory_space<vmem>>, vector<1x1x1x160xbf16>
    %445 = vector.shape_cast %444 : vector<1x1x1x160xbf16> to vector<1x160xbf16>
    %c3_575 = arith.constant 3 : index
    %c5_576 = arith.constant 5 : index
    %c0_577 = arith.constant 0 : index
    %446 = vector.load %arg6[%c3_575, %c5_576, %c0_577] : memref<4x32x160xbf16, #tpu.memory_space<vmem>>, vector<1x1x160xbf16>
    %447 = vector.shape_cast %446 : vector<1x1x160xbf16> to vector<1x160xbf16>
    %448 = vector.shape_cast %445 : vector<1x160xbf16> to vector<1x1x160xbf16>
    tpu.vector_store %arg6[%c3_575, %c5_576, %c0_577], %448 {strides = array<i32>} : memref<4x32x160xbf16, #tpu.memory_space<vmem>>, vector<1x1x160xbf16>,
    %c0_578 = arith.constant 0 : index
    %c0_579 = arith.constant 0 : index
    %c2_580 = arith.constant 2 : index
    %c32_581 = arith.constant 32 : index
    %449 = vector.load %arg2[%c0_578, %c0_579, %c2_580, %c32_581] : memref<1x1x48x224xbf16, #tpu.memory_space<vmem>>, vector<1x1x1x160xbf16>
    %450 = vector.shape_cast %449 : vector<1x1x1x160xbf16> to vector<1x160xbf16>
    %c3_582 = arith.constant 3 : index
    %c6_583 = arith.constant 6 : index
    %c0_584 = arith.constant 0 : index
    %451 = vector.load %arg6[%c3_582, %c6_583, %c0_584] : memref<4x32x160xbf16, #tpu.memory_space<vmem>>, vector<1x1x160xbf16>
    %452 = vector.shape_cast %451 : vector<1x1x160xbf16> to vector<1x160xbf16>
    %453 = vector.shape_cast %450 : vector<1x160xbf16> to vector<1x1x160xbf16>
    tpu.vector_store %arg6[%c3_582, %c6_583, %c0_584], %453 {strides = array<i32>} : memref<4x32x160xbf16, #tpu.memory_space<vmem>>, vector<1x1x160xbf16>,
    %c0_585 = arith.constant 0 : index
    %c0_586 = arith.constant 0 : index
    %c3_587 = arith.constant 3 : index
    %c32_588 = arith.constant 32 : index
    %454 = vector.load %arg2[%c0_585, %c0_586, %c3_587, %c32_588] : memref<1x1x48x224xbf16, #tpu.memory_space<vmem>>, vector<1x1x1x160xbf16>
    %455 = vector.shape_cast %454 : vector<1x1x1x160xbf16> to vector<1x160xbf16>
    %c3_589 = arith.constant 3 : index
    %c7_590 = arith.constant 7 : index
    %c0_591 = arith.constant 0 : index
    %456 = vector.load %arg6[%c3_589, %c7_590, %c0_591] : memref<4x32x160xbf16, #tpu.memory_space<vmem>>, vector<1x1x160xbf16>
    %457 = vector.shape_cast %456 : vector<1x1x160xbf16> to vector<1x160xbf16>
    %458 = vector.shape_cast %455 : vector<1x160xbf16> to vector<1x1x160xbf16>
    tpu.vector_store %arg6[%c3_589, %c7_590, %c0_591], %458 {strides = array<i32>} : memref<4x32x160xbf16, #tpu.memory_space<vmem>>, vector<1x1x160xbf16>,
    %c0_592 = arith.constant 0 : index
    %c0_593 = arith.constant 0 : index
    %c0_594 = arith.constant 0 : index
    %c33_595 = arith.constant 33 : index
    %459 = vector.load %arg2[%c0_592, %c0_593, %c0_594, %c33_595] : memref<1x1x48x224xbf16, #tpu.memory_space<vmem>>, vector<1x1x1x160xbf16>
    %460 = vector.shape_cast %459 : vector<1x1x1x160xbf16> to vector<1x160xbf16>
    %c3_596 = arith.constant 3 : index
    %c8_597 = arith.constant 8 : index
    %c0_598 = arith.constant 0 : index
    %461 = vector.load %arg6[%c3_596, %c8_597, %c0_598] : memref<4x32x160xbf16, #tpu.memory_space<vmem>>, vector<1x1x160xbf16>
    %462 = vector.shape_cast %461 : vector<1x1x160xbf16> to vector<1x160xbf16>
    %463 = vector.shape_cast %460 : vector<1x160xbf16> to vector<1x1x160xbf16>
    tpu.vector_store %arg6[%c3_596, %c8_597, %c0_598], %463 {strides = array<i32>} : memref<4x32x160xbf16, #tpu.memory_space<vmem>>, vector<1x1x160xbf16>,
    %c0_599 = arith.constant 0 : index
    %c0_600 = arith.constant 0 : index
    %c26_601 = arith.constant 26 : index
    %c0_602 = arith.constant 0 : index
    %464 = vector.load %arg2[%c0_599, %c0_600, %c26_601, %c0_602] : memref<1x1x48x224xbf16, #tpu.memory_space<vmem>>, vector<1x1x1x160xbf16>
    %465 = vector.shape_cast %464 : vector<1x1x1x160xbf16> to vector<1x160xbf16>
    %c3_603 = arith.constant 3 : index
    %c9_604 = arith.constant 9 : index
    %c0_605 = arith.constant 0 : index
    %466 = vector.load %arg6[%c3_603, %c9_604, %c0_605] : memref<4x32x160xbf16, #tpu.memory_space<vmem>>, vector<1x1x160xbf16>
    %467 = vector.shape_cast %466 : vector<1x1x160xbf16> to vector<1x160xbf16>
    %468 = vector.shape_cast %465 : vector<1x160xbf16> to vector<1x1x160xbf16>
    tpu.vector_store %arg6[%c3_603, %c9_604, %c0_605], %468 {strides = array<i32>} : memref<4x32x160xbf16, #tpu.memory_space<vmem>>, vector<1x1x160xbf16>,
    %c0_606 = arith.constant 0 : index
    %c0_607 = arith.constant 0 : index
    %c27_608 = arith.constant 27 : index
    %c0_609 = arith.constant 0 : index
    %469 = vector.load %arg2[%c0_606, %c0_607, %c27_608, %c0_609] : memref<1x1x48x224xbf16, #tpu.memory_space<vmem>>, vector<1x1x1x160xbf16>
    %470 = vector.shape_cast %469 : vector<1x1x1x160xbf16> to vector<1x160xbf16>
    %c3_610 = arith.constant 3 : index
    %c10_611 = arith.constant 10 : index
    %c0_612 = arith.constant 0 : index
    %471 = vector.load %arg6[%c3_610, %c10_611, %c0_612] : memref<4x32x160xbf16, #tpu.memory_space<vmem>>, vector<1x1x160xbf16>
    %472 = vector.shape_cast %471 : vector<1x1x160xbf16> to vector<1x160xbf16>
    %473 = vector.shape_cast %470 : vector<1x160xbf16> to vector<1x1x160xbf16>
    tpu.vector_store %arg6[%c3_610, %c10_611, %c0_612], %473 {strides = array<i32>} : memref<4x32x160xbf16, #tpu.memory_space<vmem>>, vector<1x1x160xbf16>,
    %c0_613 = arith.constant 0 : index
    %c0_614 = arith.constant 0 : index
    %c24_615 = arith.constant 24 : index
    %c1_616 = arith.constant 1 : index
    %474 = vector.load %arg2[%c0_613, %c0_614, %c24_615, %c1_616] : memref<1x1x48x224xbf16, #tpu.memory_space<vmem>>, vector<1x1x1x160xbf16>
    %475 = vector.shape_cast %474 : vector<1x1x1x160xbf16> to vector<1x160xbf16>
    %c3_617 = arith.constant 3 : index
    %c11_618 = arith.constant 11 : index
    %c0_619 = arith.constant 0 : index
    %476 = vector.load %arg6[%c3_617, %c11_618, %c0_619] : memref<4x32x160xbf16, #tpu.memory_space<vmem>>, vector<1x1x160xbf16>
    %477 = vector.shape_cast %476 : vector<1x1x160xbf16> to vector<1x160xbf16>
    %478 = vector.shape_cast %475 : vector<1x160xbf16> to vector<1x1x160xbf16>
    tpu.vector_store %arg6[%c3_617, %c11_618, %c0_619], %478 {strides = array<i32>} : memref<4x32x160xbf16, #tpu.memory_space<vmem>>, vector<1x1x160xbf16>,
    %c0_620 = arith.constant 0 : index
    %c0_621 = arith.constant 0 : index
    %c30_622 = arith.constant 30 : index
    %c0_623 = arith.constant 0 : index
    %479 = vector.load %arg2[%c0_620, %c0_621, %c30_622, %c0_623] : memref<1x1x48x224xbf16, #tpu.memory_space<vmem>>, vector<1x1x1x160xbf16>
    %480 = vector.shape_cast %479 : vector<1x1x1x160xbf16> to vector<1x160xbf16>
    %c3_624 = arith.constant 3 : index
    %c12_625 = arith.constant 12 : index
    %c0_626 = arith.constant 0 : index
    %481 = vector.load %arg6[%c3_624, %c12_625, %c0_626] : memref<4x32x160xbf16, #tpu.memory_space<vmem>>, vector<1x1x160xbf16>
    %482 = vector.shape_cast %481 : vector<1x1x160xbf16> to vector<1x160xbf16>
    %483 = vector.shape_cast %480 : vector<1x160xbf16> to vector<1x1x160xbf16>
    tpu.vector_store %arg6[%c3_624, %c12_625, %c0_626], %483 {strides = array<i32>} : memref<4x32x160xbf16, #tpu.memory_space<vmem>>, vector<1x1x160xbf16>,
    %c0_627 = arith.constant 0 : index
    %c0_628 = arith.constant 0 : index
    %c31 = arith.constant 31 : index
    %c0_629 = arith.constant 0 : index
    %484 = vector.load %arg2[%c0_627, %c0_628, %c31, %c0_629] : memref<1x1x48x224xbf16, #tpu.memory_space<vmem>>, vector<1x1x1x160xbf16>
    %485 = vector.shape_cast %484 : vector<1x1x1x160xbf16> to vector<1x160xbf16>
    %c3_630 = arith.constant 3 : index
    %c13_631 = arith.constant 13 : index
    %c0_632 = arith.constant 0 : index
    %486 = vector.load %arg6[%c3_630, %c13_631, %c0_632] : memref<4x32x160xbf16, #tpu.memory_space<vmem>>, vector<1x1x160xbf16>
    %487 = vector.shape_cast %486 : vector<1x1x160xbf16> to vector<1x160xbf16>
    %488 = vector.shape_cast %485 : vector<1x160xbf16> to vector<1x1x160xbf16>
    tpu.vector_store %arg6[%c3_630, %c13_631, %c0_632], %488 {strides = array<i32>} : memref<4x32x160xbf16, #tpu.memory_space<vmem>>, vector<1x1x160xbf16>,
    %c0_633 = arith.constant 0 : index
    %c0_634 = arith.constant 0 : index
    %c28_635 = arith.constant 28 : index
    %c1_636 = arith.constant 1 : index
    %489 = vector.load %arg2[%c0_633, %c0_634, %c28_635, %c1_636] : memref<1x1x48x224xbf16, #tpu.memory_space<vmem>>, vector<1x1x1x160xbf16>
    %490 = vector.shape_cast %489 : vector<1x1x1x160xbf16> to vector<1x160xbf16>
    %c3_637 = arith.constant 3 : index
    %c14_638 = arith.constant 14 : index
    %c0_639 = arith.constant 0 : index
    %491 = vector.load %arg6[%c3_637, %c14_638, %c0_639] : memref<4x32x160xbf16, #tpu.memory_space<vmem>>, vector<1x1x160xbf16>
    %492 = vector.shape_cast %491 : vector<1x1x160xbf16> to vector<1x160xbf16>
    %493 = vector.shape_cast %490 : vector<1x160xbf16> to vector<1x1x160xbf16>
    tpu.vector_store %arg6[%c3_637, %c14_638, %c0_639], %493 {strides = array<i32>} : memref<4x32x160xbf16, #tpu.memory_space<vmem>>, vector<1x1x160xbf16>,
    %c0_640 = arith.constant 0 : index
    %c0_641 = arith.constant 0 : index
    %c18_642 = arith.constant 18 : index
    %c32_643 = arith.constant 32 : index
    %494 = vector.load %arg2[%c0_640, %c0_641, %c18_642, %c32_643] : memref<1x1x48x224xbf16, #tpu.memory_space<vmem>>, vector<1x1x1x160xbf16>
    %495 = vector.shape_cast %494 : vector<1x1x1x160xbf16> to vector<1x160xbf16>
    %c3_644 = arith.constant 3 : index
    %c15_645 = arith.constant 15 : index
    %c0_646 = arith.constant 0 : index
    %496 = vector.load %arg6[%c3_644, %c15_645, %c0_646] : memref<4x32x160xbf16, #tpu.memory_space<vmem>>, vector<1x1x160xbf16>
    %497 = vector.shape_cast %496 : vector<1x1x160xbf16> to vector<1x160xbf16>
    %498 = vector.shape_cast %495 : vector<1x160xbf16> to vector<1x1x160xbf16>
    tpu.vector_store %arg6[%c3_644, %c15_645, %c0_646], %498 {strides = array<i32>} : memref<4x32x160xbf16, #tpu.memory_space<vmem>>, vector<1x1x160xbf16>,
    %c0_647 = arith.constant 0 : index
    %c0_648 = arith.constant 0 : index
    %c19_649 = arith.constant 19 : index
    %c32_650 = arith.constant 32 : index
    %499 = vector.load %arg2[%c0_647, %c0_648, %c19_649, %c32_650] : memref<1x1x48x224xbf16, #tpu.memory_space<vmem>>, vector<1x1x1x160xbf16>
    %500 = vector.shape_cast %499 : vector<1x1x1x160xbf16> to vector<1x160xbf16>
    %c3_651 = arith.constant 3 : index
    %c16_652 = arith.constant 16 : index
    %c0_653 = arith.constant 0 : index
    %501 = vector.load %arg6[%c3_651, %c16_652, %c0_653] : memref<4x32x160xbf16, #tpu.memory_space<vmem>>, vector<1x1x160xbf16>
    %502 = vector.shape_cast %501 : vector<1x1x160xbf16> to vector<1x160xbf16>
    %503 = vector.shape_cast %500 : vector<1x160xbf16> to vector<1x1x160xbf16>
    tpu.vector_store %arg6[%c3_651, %c16_652, %c0_653], %503 {strides = array<i32>} : memref<4x32x160xbf16, #tpu.memory_space<vmem>>, vector<1x1x160xbf16>,
    %c0_654 = arith.constant 0 : index
    %c0_655 = arith.constant 0 : index
    %c16_656 = arith.constant 16 : index
    %c33_657 = arith.constant 33 : index
    %504 = vector.load %arg2[%c0_654, %c0_655, %c16_656, %c33_657] : memref<1x1x48x224xbf16, #tpu.memory_space<vmem>>, vector<1x1x1x160xbf16>
    %505 = vector.shape_cast %504 : vector<1x1x1x160xbf16> to vector<1x160xbf16>
    %c3_658 = arith.constant 3 : index
    %c17_659 = arith.constant 17 : index
    %c0_660 = arith.constant 0 : index
    %506 = vector.load %arg6[%c3_658, %c17_659, %c0_660] : memref<4x32x160xbf16, #tpu.memory_space<vmem>>, vector<1x1x160xbf16>
    %507 = vector.shape_cast %506 : vector<1x1x160xbf16> to vector<1x160xbf16>
    %508 = vector.shape_cast %505 : vector<1x160xbf16> to vector<1x1x160xbf16>
    tpu.vector_store %arg6[%c3_658, %c17_659, %c0_660], %508 {strides = array<i32>} : memref<4x32x160xbf16, #tpu.memory_space<vmem>>, vector<1x1x160xbf16>,
    %c0_661 = arith.constant 0 : index
    %c0_662 = arith.constant 0 : index
    %c42_663 = arith.constant 42 : index
    %c0_664 = arith.constant 0 : index
    %509 = vector.load %arg2[%c0_661, %c0_662, %c42_663, %c0_664] : memref<1x1x48x224xbf16, #tpu.memory_space<vmem>>, vector<1x1x1x160xbf16>
    %510 = vector.shape_cast %509 : vector<1x1x1x160xbf16> to vector<1x160xbf16>
    %c3_665 = arith.constant 3 : index
    %c18_666 = arith.constant 18 : index
    %c0_667 = arith.constant 0 : index
    %511 = vector.load %arg6[%c3_665, %c18_666, %c0_667] : memref<4x32x160xbf16, #tpu.memory_space<vmem>>, vector<1x1x160xbf16>
    %512 = vector.shape_cast %511 : vector<1x1x160xbf16> to vector<1x160xbf16>
    %513 = vector.shape_cast %510 : vector<1x160xbf16> to vector<1x1x160xbf16>
    tpu.vector_store %arg6[%c3_665, %c18_666, %c0_667], %513 {strides = array<i32>} : memref<4x32x160xbf16, #tpu.memory_space<vmem>>, vector<1x1x160xbf16>,
    %c0_668 = arith.constant 0 : index
    %c0_669 = arith.constant 0 : index
    %c43_670 = arith.constant 43 : index
    %c0_671 = arith.constant 0 : index
    %514 = vector.load %arg2[%c0_668, %c0_669, %c43_670, %c0_671] : memref<1x1x48x224xbf16, #tpu.memory_space<vmem>>, vector<1x1x1x160xbf16>
    %515 = vector.shape_cast %514 : vector<1x1x1x160xbf16> to vector<1x160xbf16>
    %c3_672 = arith.constant 3 : index
    %c19_673 = arith.constant 19 : index
    %c0_674 = arith.constant 0 : index
    %516 = vector.load %arg6[%c3_672, %c19_673, %c0_674] : memref<4x32x160xbf16, #tpu.memory_space<vmem>>, vector<1x1x160xbf16>
    %517 = vector.shape_cast %516 : vector<1x1x160xbf16> to vector<1x160xbf16>
    %518 = vector.shape_cast %515 : vector<1x160xbf16> to vector<1x1x160xbf16>
    tpu.vector_store %arg6[%c3_672, %c19_673, %c0_674], %518 {strides = array<i32>} : memref<4x32x160xbf16, #tpu.memory_space<vmem>>, vector<1x1x160xbf16>,
    %c0_675 = arith.constant 0 : index
    %c0_676 = arith.constant 0 : index
    %c40_677 = arith.constant 40 : index
    %c1_678 = arith.constant 1 : index
    %519 = vector.load %arg2[%c0_675, %c0_676, %c40_677, %c1_678] : memref<1x1x48x224xbf16, #tpu.memory_space<vmem>>, vector<1x1x1x160xbf16>
    %520 = vector.shape_cast %519 : vector<1x1x1x160xbf16> to vector<1x160xbf16>
    %c3_679 = arith.constant 3 : index
    %c20_680 = arith.constant 20 : index
    %c0_681 = arith.constant 0 : index
    %521 = vector.load %arg6[%c3_679, %c20_680, %c0_681] : memref<4x32x160xbf16, #tpu.memory_space<vmem>>, vector<1x1x160xbf16>
    %522 = vector.shape_cast %521 : vector<1x1x160xbf16> to vector<1x160xbf16>
    %523 = vector.shape_cast %520 : vector<1x160xbf16> to vector<1x1x160xbf16>
    tpu.vector_store %arg6[%c3_679, %c20_680, %c0_681], %523 {strides = array<i32>} : memref<4x32x160xbf16, #tpu.memory_space<vmem>>, vector<1x1x160xbf16>,
    %c0_682 = arith.constant 0 : index
    %c0_683 = arith.constant 0 : index
    %c46_684 = arith.constant 46 : index
    %c0_685 = arith.constant 0 : index
    %524 = vector.load %arg2[%c0_682, %c0_683, %c46_684, %c0_685] : memref<1x1x48x224xbf16, #tpu.memory_space<vmem>>, vector<1x1x1x160xbf16>
    %525 = vector.shape_cast %524 : vector<1x1x1x160xbf16> to vector<1x160xbf16>
    %c3_686 = arith.constant 3 : index
    %c21_687 = arith.constant 21 : index
    %c0_688 = arith.constant 0 : index
    %526 = vector.load %arg6[%c3_686, %c21_687, %c0_688] : memref<4x32x160xbf16, #tpu.memory_space<vmem>>, vector<1x1x160xbf16>
    %527 = vector.shape_cast %526 : vector<1x1x160xbf16> to vector<1x160xbf16>
    %528 = vector.shape_cast %525 : vector<1x160xbf16> to vector<1x1x160xbf16>
    tpu.vector_store %arg6[%c3_686, %c21_687, %c0_688], %528 {strides = array<i32>} : memref<4x32x160xbf16, #tpu.memory_space<vmem>>, vector<1x1x160xbf16>,
    %c0_689 = arith.constant 0 : index
    %c0_690 = arith.constant 0 : index
    %c47 = arith.constant 47 : index
    %c0_691 = arith.constant 0 : index
    %529 = vector.load %arg2[%c0_689, %c0_690, %c47, %c0_691] : memref<1x1x48x224xbf16, #tpu.memory_space<vmem>>, vector<1x1x1x160xbf16>
    %530 = vector.shape_cast %529 : vector<1x1x1x160xbf16> to vector<1x160xbf16>
    %c3_692 = arith.constant 3 : index
    %c22_693 = arith.constant 22 : index
    %c0_694 = arith.constant 0 : index
    %531 = vector.load %arg6[%c3_692, %c22_693, %c0_694] : memref<4x32x160xbf16, #tpu.memory_space<vmem>>, vector<1x1x160xbf16>
    %532 = vector.shape_cast %531 : vector<1x1x160xbf16> to vector<1x160xbf16>
    %533 = vector.shape_cast %530 : vector<1x160xbf16> to vector<1x1x160xbf16>
    tpu.vector_store %arg6[%c3_692, %c22_693, %c0_694], %533 {strides = array<i32>} : memref<4x32x160xbf16, #tpu.memory_space<vmem>>, vector<1x1x160xbf16>,
    %c0_695 = arith.constant 0 : index
    %c0_696 = arith.constant 0 : index
    %c44_697 = arith.constant 44 : index
    %c1_698 = arith.constant 1 : index
    %534 = vector.load %arg2[%c0_695, %c0_696, %c44_697, %c1_698] : memref<1x1x48x224xbf16, #tpu.memory_space<vmem>>, vector<1x1x1x160xbf16>
    %535 = vector.shape_cast %534 : vector<1x1x1x160xbf16> to vector<1x160xbf16>
    %c3_699 = arith.constant 3 : index
    %c23_700 = arith.constant 23 : index
    %c0_701 = arith.constant 0 : index
    %536 = vector.load %arg6[%c3_699, %c23_700, %c0_701] : memref<4x32x160xbf16, #tpu.memory_space<vmem>>, vector<1x1x160xbf16>
    %537 = vector.shape_cast %536 : vector<1x1x160xbf16> to vector<1x160xbf16>
    %538 = vector.shape_cast %535 : vector<1x160xbf16> to vector<1x1x160xbf16>
    tpu.vector_store %arg6[%c3_699, %c23_700, %c0_701], %538 {strides = array<i32>} : memref<4x32x160xbf16, #tpu.memory_space<vmem>>, vector<1x1x160xbf16>,
    %c0_702 = arith.constant 0 : index
    %c0_703 = arith.constant 0 : index
    %c34_704 = arith.constant 34 : index
    %c32_705 = arith.constant 32 : index
    %539 = vector.load %arg2[%c0_702, %c0_703, %c34_704, %c32_705] : memref<1x1x48x224xbf16, #tpu.memory_space<vmem>>, vector<1x1x1x160xbf16>
    %540 = vector.shape_cast %539 : vector<1x1x1x160xbf16> to vector<1x160xbf16>
    %c3_706 = arith.constant 3 : index
    %c24_707 = arith.constant 24 : index
    %c0_708 = arith.constant 0 : index
    %541 = vector.load %arg6[%c3_706, %c24_707, %c0_708] : memref<4x32x160xbf16, #tpu.memory_space<vmem>>, vector<1x1x160xbf16>
    %542 = vector.shape_cast %541 : vector<1x1x160xbf16> to vector<1x160xbf16>
    %543 = vector.shape_cast %540 : vector<1x160xbf16> to vector<1x1x160xbf16>
    tpu.vector_store %arg6[%c3_706, %c24_707, %c0_708], %543 {strides = array<i32>} : memref<4x32x160xbf16, #tpu.memory_space<vmem>>, vector<1x1x160xbf16>,
    %c0_709 = arith.constant 0 : index
    %c0_710 = arith.constant 0 : index
    %c35_711 = arith.constant 35 : index
    %c32_712 = arith.constant 32 : index
    %544 = vector.load %arg2[%c0_709, %c0_710, %c35_711, %c32_712] : memref<1x1x48x224xbf16, #tpu.memory_space<vmem>>, vector<1x1x1x160xbf16>
    %545 = vector.shape_cast %544 : vector<1x1x1x160xbf16> to vector<1x160xbf16>
    %c3_713 = arith.constant 3 : index
    %c25_714 = arith.constant 25 : index
    %c0_715 = arith.constant 0 : index
    %546 = vector.load %arg6[%c3_713, %c25_714, %c0_715] : memref<4x32x160xbf16, #tpu.memory_space<vmem>>, vector<1x1x160xbf16>
    %547 = vector.shape_cast %546 : vector<1x1x160xbf16> to vector<1x160xbf16>
    %548 = vector.shape_cast %545 : vector<1x160xbf16> to vector<1x1x160xbf16>
    tpu.vector_store %arg6[%c3_713, %c25_714, %c0_715], %548 {strides = array<i32>} : memref<4x32x160xbf16, #tpu.memory_space<vmem>>, vector<1x1x160xbf16>,
    %c0_716 = arith.constant 0 : index
    %c0_717 = arith.constant 0 : index
    %c32_718 = arith.constant 32 : index
    %c33_719 = arith.constant 33 : index
    %549 = vector.load %arg2[%c0_716, %c0_717, %c32_718, %c33_719] : memref<1x1x48x224xbf16, #tpu.memory_space<vmem>>, vector<1x1x1x160xbf16>
    %550 = vector.shape_cast %549 : vector<1x1x1x160xbf16> to vector<1x160xbf16>
    %c3_720 = arith.constant 3 : index
    %c26_721 = arith.constant 26 : index
    %c0_722 = arith.constant 0 : index
    %551 = vector.load %arg6[%c3_720, %c26_721, %c0_722] : memref<4x32x160xbf16, #tpu.memory_space<vmem>>, vector<1x1x160xbf16>
    %552 = vector.shape_cast %551 : vector<1x1x160xbf16> to vector<1x160xbf16>
    %553 = vector.shape_cast %550 : vector<1x160xbf16> to vector<1x1x160xbf16>
    tpu.vector_store %arg6[%c3_720, %c26_721, %c0_722], %553 {strides = array<i32>} : memref<4x32x160xbf16, #tpu.memory_space<vmem>>, vector<1x1x160xbf16>,
    %cst_723 = arith.constant 0.000000e+00 : bf16
    %554 = vector.broadcast %cst_723 : bf16 to vector<5x160xbf16>
    %c3_724 = arith.constant 3 : index
    %c27_725 = arith.constant 27 : index
    %c0_726 = arith.constant 0 : index
    %555 = vector.load %arg6[%c3_724, %c27_725, %c0_726] : memref<4x32x160xbf16, #tpu.memory_space<vmem>>, vector<1x5x160xbf16>
    %556 = vector.shape_cast %555 : vector<1x5x160xbf16> to vector<5x160xbf16>
    %557 = vector.shape_cast %554 : vector<5x160xbf16> to vector<1x5x160xbf16>
    tpu.vector_store %arg6[%c3_724, %c27_725, %c0_726], %557 {strides = array<i32>} : memref<4x32x160xbf16, #tpu.memory_space<vmem>>, vector<1x5x160xbf16>,
    %c0_727 = arith.constant 0 : index
    %c0_728 = arith.constant 0 : index
    %c0_729 = arith.constant 0 : index
    %558 = vector.load %arg6[%c0_727, %c0_728, %c0_729] : memref<4x32x160xbf16, #tpu.memory_space<vmem>>, vector<1x32x160xbf16>
    %559 = vector.shape_cast %558 : vector<1x32x160xbf16> to vector<32x160xbf16>
    %cst_730 = arith.constant dense<0.000000e+00> : vector<32x160xf32>
    %560 = tpu.matmul %0, %559, %cst_730 {dimension_numbers = #tpu.dot_dimension_numbers<[1], [0], [0], [1], [0, 0, 1, 1], [], []>} : vector<32x32xbf16>, vector<32x160xbf16>, vector<32x160xf32> -> vector<32x160xf32>
    %561 = vector.broadcast %1 : vector<32x1xf32> to vector<32x160xf32>
    %562 = arith.addf %560, %561 : vector<32x160xf32>
    %cst_731 = arith.constant 0.000000e+00 : f32
    %563 = vector.broadcast %cst_731 : f32 to vector<32x160xf32>
    %564 = arith.maximumf %562, %563 : vector<32x160xf32>
    %c1_732 = arith.constant 1 : index
    %c0_733 = arith.constant 0 : index
    %c0_734 = arith.constant 0 : index
    %565 = vector.load %arg6[%c1_732, %c0_733, %c0_734] : memref<4x32x160xbf16, #tpu.memory_space<vmem>>, vector<1x32x160xbf16>
    %566 = vector.shape_cast %565 : vector<1x32x160xbf16> to vector<32x160xbf16>
    %cst_735 = arith.constant dense<0.000000e+00> : vector<32x160xf32>
    %567 = tpu.matmul %0, %566, %cst_735 {dimension_numbers = #tpu.dot_dimension_numbers<[1], [0], [0], [1], [0, 0, 1, 1], [], []>} : vector<32x32xbf16>, vector<32x160xbf16>, vector<32x160xf32> -> vector<32x160xf32>
    %568 = vector.broadcast %1 : vector<32x1xf32> to vector<32x160xf32>
    %569 = arith.addf %567, %568 : vector<32x160xf32>
    %cst_736 = arith.constant 0.000000e+00 : f32
    %570 = vector.broadcast %cst_736 : f32 to vector<32x160xf32>
    %571 = arith.maximumf %569, %570 : vector<32x160xf32>
    %c2_737 = arith.constant 2 : index
    %c0_738 = arith.constant 0 : index
    %c0_739 = arith.constant 0 : index
    %572 = vector.load %arg6[%c2_737, %c0_738, %c0_739] : memref<4x32x160xbf16, #tpu.memory_space<vmem>>, vector<1x32x160xbf16>
    %573 = vector.shape_cast %572 : vector<1x32x160xbf16> to vector<32x160xbf16>
    %cst_740 = arith.constant dense<0.000000e+00> : vector<32x160xf32>
    %574 = tpu.matmul %0, %573, %cst_740 {dimension_numbers = #tpu.dot_dimension_numbers<[1], [0], [0], [1], [0, 0, 1, 1], [], []>} : vector<32x32xbf16>, vector<32x160xbf16>, vector<32x160xf32> -> vector<32x160xf32>
    %575 = vector.broadcast %1 : vector<32x1xf32> to vector<32x160xf32>
    %576 = arith.addf %574, %575 : vector<32x160xf32>
    %cst_741 = arith.constant 0.000000e+00 : f32
    %577 = vector.broadcast %cst_741 : f32 to vector<32x160xf32>
    %578 = arith.maximumf %576, %577 : vector<32x160xf32>
    %c3_742 = arith.constant 3 : index
    %c0_743 = arith.constant 0 : index
    %c0_744 = arith.constant 0 : index
    %579 = vector.load %arg6[%c3_742, %c0_743, %c0_744] : memref<4x32x160xbf16, #tpu.memory_space<vmem>>, vector<1x32x160xbf16>
    %580 = vector.shape_cast %579 : vector<1x32x160xbf16> to vector<32x160xbf16>
    %cst_745 = arith.constant dense<0.000000e+00> : vector<32x160xf32>
    %581 = tpu.matmul %0, %580, %cst_745 {dimension_numbers = #tpu.dot_dimension_numbers<[1], [0], [0], [1], [0, 0, 1, 1], [], []>} : vector<32x32xbf16>, vector<32x160xbf16>, vector<32x160xf32> -> vector<32x160xf32>
    %582 = vector.broadcast %1 : vector<32x1xf32> to vector<32x160xf32>
    %583 = arith.addf %581, %582 : vector<32x160xf32>
    %cst_746 = arith.constant 0.000000e+00 : f32
    %584 = vector.broadcast %cst_746 : f32 to vector<32x160xf32>
    %585 = arith.maximumf %583, %584 : vector<32x160xf32>
    %586 = tpu.iota {dimensions = array<i32: 1>} : vector<1x160xi32>
    %c32_i32 = arith.constant 32 : i32
    %c0_i32 = arith.constant 0 : i32
    %587 = arith.cmpi eq, %c32_i32, %c0_i32 : i32
    %c1_i32 = arith.constant 1 : i32
    %588 = arith.select %587, %c1_i32, %c32_i32 : i32
    %589 = vector.broadcast %588 : i32 to vector<1x160xi32>
    %590 = arith.remsi %586, %589 : vector<1x160xi32>
    %c0_i32_747 = arith.constant 0 : i32
    %591 = vector.broadcast %c0_i32_747 : i32 to vector<1x160xi32>
    %592 = arith.cmpi ne, %590, %591 : vector<1x160xi32>
    %c0_i32_748 = arith.constant 0 : i32
    %593 = vector.broadcast %c0_i32_748 : i32 to vector<1x160xi32>
    %594 = arith.cmpi slt, %590, %593 : vector<1x160xi32>
    %c0_i32_749 = arith.constant 0 : i32
    %595 = arith.cmpi slt, %588, %c0_i32_749 : i32
    %596 = vector.broadcast %595 : i1 to vector<1x160xi1>
    %597 = vector.broadcast %596 : vector<1x160xi1> to vector<1x160xi1>
    %598 = arith.xori %594, %597 : vector<1x160xi1>
    %599 = arith.andi %598, %592 : vector<1x160xi1>
    %600 = vector.broadcast %588 : i32 to vector<1x160xi32>
    %601 = arith.addi %590, %600 : vector<1x160xi32>
    %602 = arith.select %599, %601, %590 : vector<1x160xi1>, vector<1x160xi32>
    %c0_i32_750 = arith.constant 0 : i32
    %603 = vector.broadcast %c0_i32_750 : i32 to vector<1x160xi32>
    %604 = arith.cmpi eq, %602, %603 : vector<1x160xi32>
    %605 = arith.maximumf %564, %571 : vector<32x160xf32>
    %cst_751 = arith.constant 0.000000e+00 : f32
    %606 = vector.broadcast %cst_751 : f32 to vector<32x1xf32>
    %607 = vector.extract_strided_slice %571 {offsets = [0, 0], sizes = [32, 159], strides = [1, 1]} : vector<32x160xf32> to vector<32x159xf32>
    %608 = tpu.concatenate %606, %607 in 1 : vector<32x1xf32>, vector<32x159xf32> -> vector<32x160xf32>
    %cst_752 = arith.constant 0.000000e+00 : f32
    %609 = vector.shape_cast %604 : vector<1x160xi1> to vector<1x160xi1>
    %610 = vector.broadcast %609 : vector<1x160xi1> to vector<32x160xi1>
    %611 = vector.broadcast %cst_752 : f32 to vector<32x160xf32>
    %612 = arith.select %610, %611, %608 : vector<32x160xi1>, vector<32x160xf32>
    %613 = arith.maximumf %605, %612 : vector<32x160xf32>
    %614 = arith.maximumf %578, %585 : vector<32x160xf32>
    %cst_753 = arith.constant 0.000000e+00 : f32
    %615 = vector.broadcast %cst_753 : f32 to vector<32x1xf32>
    %616 = vector.extract_strided_slice %585 {offsets = [0, 0], sizes = [32, 159], strides = [1, 1]} : vector<32x160xf32> to vector<32x159xf32>
    %617 = tpu.concatenate %615, %616 in 1 : vector<32x1xf32>, vector<32x159xf32> -> vector<32x160xf32>
    %cst_754 = arith.constant 0.000000e+00 : f32
    %618 = vector.shape_cast %604 : vector<1x160xi1> to vector<1x160xi1>
    %619 = vector.broadcast %618 : vector<1x160xi1> to vector<32x160xi1>
    %620 = vector.broadcast %cst_754 : f32 to vector<32x160xf32>
    %621 = arith.select %619, %620, %617 : vector<32x160xi1>, vector<32x160xf32>
    %622 = arith.maximumf %614, %621 : vector<32x160xf32>
    %623 = arith.maximumf %613, %622 : vector<32x160xf32>
    %624 = vector.extract_strided_slice %622 {offsets = [0, 0], sizes = [32, 128], strides = [1, 1]} : vector<32x160xf32> to vector<32x128xf32>
    %625 = tpu.iota {dimensions = array<i32: 1>} : vector<1x128xi32>
    %c0_i32_755 = arith.constant 0 : i32
    %626 = arith.cmpi eq, %arg1, %c0_i32_755 : i32
    %c32_i32_756 = arith.constant 32 : i32
    %627 = vector.broadcast %c32_i32_756 : i32 to vector<1x128xi32>
    %628 = arith.cmpi slt, %625, %627 : vector<1x128xi32>
    %629 = vector.broadcast %626 : i1 to vector<1x128xi1>
    %630 = arith.andi %629, %628 : vector<1x128xi1>
    %cst_757 = arith.constant 0.000000e+00 : f32
    %631 = vector.shape_cast %630 : vector<1x128xi1> to vector<1x128xi1>
    %632 = vector.broadcast %631 : vector<1x128xi1> to vector<32x128xi1>
    %633 = vector.broadcast %cst_757 : f32 to vector<32x128xf32>
    %634 = arith.select %632, %633, %624 : vector<32x128xi1>, vector<32x128xf32>
    %635 = vector.extract_strided_slice %623 {offsets = [0, 32], sizes = [32, 128], strides = [1, 1]} : vector<32x160xf32> to vector<32x128xf32>
    %636 = arith.maximumf %635, %634 : vector<32x128xf32>
    %c0_758 = arith.constant 0 : index
    %c0_759 = arith.constant 0 : index
    %c0_760 = arith.constant 0 : index
    %637 = vector.load %arg5[%c0_758, %c0_759, %c0_760] : memref<1x32x128xf32, #tpu.memory_space<vmem>>, vector<1x32x128xf32>
    %638 = vector.shape_cast %637 : vector<1x32x128xf32> to vector<32x128xf32>
    %639 = vector.shape_cast %636 : vector<32x128xf32> to vector<1x32x128xf32>
    tpu.vector_store %arg5[%c0_758, %c0_759, %c0_760], %639 {strides = array<i32>} : memref<1x32x128xf32, #tpu.memory_space<vmem>>, vector<1x32x128xf32>,
    return
  }
  func.func @transform_0(%arg0: i32, %arg1: i32) -> (i32, i32, i32, i32) {
    %c0_i32 = arith.constant 0 : i32
    %c0_i32_0 = arith.constant 0 : i32
    %c0_i32_1 = arith.constant 0 : i32
    return %arg0, %arg1, %c0_i32, %c0_i32_0 : i32, i32, i32, i32
  }
  func.func @transform_1(%arg0: i32, %arg1: i32) -> (i32, i32) {
    %c0_i32 = arith.constant 0 : i32
    %c0_i32_0 = arith.constant 0 : i32
    %c0_i32_1 = arith.constant 0 : i32
    return %c0_i32, %c0_i32_0 : i32, i32
  }
  func.func @transform_2(%arg0: i32, %arg1: i32) -> (i32, i32) {
    %c0_i32 = arith.constant 0 : i32
    %c0_i32_0 = arith.constant 0 : i32
    %c0_i32_1 = arith.constant 0 : i32
    return %c0_i32, %c0_i32_0 : i32, i32
  }
  func.func @transform_3(%arg0: i32, %arg1: i32) -> (i32, i32, i32) {
    %c0_i32 = arith.constant 0 : i32
    %c0_i32_0 = arith.constant 0 : i32
    return %arg0, %c0_i32, %arg1 : i32, i32, i32
  }
}

</mosaic_0001>

<bundles_post_ra>
// kernel: cbrm_forward.1
= control target key start
LH: loop header
LB: loop body
LE: loop exit
PB: predicated region body
PF: predicated region fallthrough
CT: control target
= control target key end

     0   :  { %s2129_s12 = smov 0   ;;  %s2131_s13 = smov 0   ;;  %s3017_s0 = inlined_call_operand.vmem [shape: bf16[2,1,48,224], index: 0, kind: input, shape index: {}]   ;;  %s3018_s1 = inlined_call_operand.vmem [shape: bf16[32,32], index: 1, kind: input, shape index: {}]   ;;  %s3019_s2 = inlined_call_operand.vmem [shape: f32[32,1], index: 2, kind: input, shape index: {}]   ;;  %s3020_s3 = inlined_call_operand.vmem [shape: f32[2,32,128], index: 3, kind: output, shape index: {}]  }
   0x1   :  { %s2133_s14 = smov 0  }
   0x2 LB: > { %s25_s15 = sadd.s32 1, %s2097_s13  ;;  %p1943_p0 = scmp.ge.s32.totalorder %s2101_s14, 1  ;;  %s2101_s14 = sphi %s2133_s14, %s13_s14   ;;  %s2097_s13 = sphi %s2131_s13, %s3089_s13   ;;  %s2093_s12 = sphi %s2129_s12, %s3088_s12  }
   0x3   : > { %p27_p1 = scmp.ge.s32.totalorder %s25_s15, 2  ;;  %p157_p2 = scmp.lt.s32.totalorder %s2101_s14, 3 }
   0x5   : > { %s3091_s15 = smov (%p27_p1, %s25_s15), 0  ;;  %p158_p3 = pnand %p1943_p0, %p157_p2 }
   0x6   : > { %p188_p4 = scmp.lt.s32.totalorder (!%p158_p3), %s2093_s12, 1  ;;  %s2103_s20 = smov (!%p158_p3), 127  }
   0x7   : > { %161 = sbr.rel (%p158_p3) target bundleno = 753 (0x2f1), region = 32  ;;  %s2104_s21 = smov (!%p158_p3), 96  }
   0x8   : > { %s2105_s22 = smov (!%p158_p3), 95   ;;  %s2107_s8 = smov (!%p158_p3), 1  }
   0x9   : > { %s2108_s9 = smov (!%p158_p3), 32  }
   0xc   : > { %s3093_s12 = smov (!%p188_p4, %s2093_s12), 1  ;;  %vm3022_vm0 = vcmask 1040384   ;;  %vm216_vm1 = vsmask.f32 256  ;;  %vm3021_vm2 = vcmask 258052   ;;  %vm3024_vm4 = vcmask 1041409  }
   0xd   : > { %s2014_s16 = smul.u32 48, %s3093_s12  ;;  %vm219_vm3 = vsmask.f32 4352  ;;  %vm236_vm5 = vsmask.f32 1280  ;;  %vm2177_vm6 = vmand %vm3022_vm0, %vm216_vm1  ;;  %vm3023_vm7 = vcmask 259077  }
   0xe   : > { %vm239_vm8 = vsmask.f32 5376  ;;  %vm220_vm9 = vmand %vm3021_vm2, %vm219_vm3  ;;  %vm268_vm11 = vsmask.f32 2304  ;;  %vm271_vm12 = vsmask.f32 6400 }
   0xf   : > { %s2153_s19 = scalar_lea.vmem %s3017_s0, %s2014_s16  ;;  %vm2185_vm10 = vmand %vm3024_vm4, %vm236_vm5  ;;  %vm252_vm14 = vsmask.f32 7942  ;;  %vm450_vm15 = vcmask 1043457   ;;  %vm3029_vm3 = vcmask 1042434   ;;  %v447_v38 = vld [vmem:[#allocation2 + $0x18] sm:$0x22] }
  0x10   : > { %v533_v0 = vld [vmem:[%s2153_s19 + $0x8] sm:$0x11]  ;;  %v642_v1 = vld [vmem:[%s2153_s19 + $0x20] sm:$0x11]  ;;  %v622_v6 = vld [vmem:[%s2153_s19 + $0x18] sm:$0x11] }
  0x11   : > { %v475_v2 = vld [vmem:[%s2153_s19] sm:$0x11]  ;;  %535 = vrot.lane.b32.xlu1 %v533_v0, %s2103_s20  ;;  %v644_v3 = vrot.slane %v642_v1, 6  ;;  %v702_v5 = vld [vmem:[%s2153_s19 + $0x28] sm:$0x11]  ;;  %v624_v9 = vshll.u32 %v622_v6, 16  ;;  %vm240_vm13 = vmand %vm3023_vm7, %vm239_vm8 }
  0x12   : > { %v477_v4 = vrot.slane %v475_v2, 7  ;;  %v673_v7 = vld [vmem:[%s2153_s19 + $0x20] sm:$0x44]  ;;  %v704_v8 = vrot.slane %v702_v5, 7  ;;  %v1117_v11 = vld [vmem:[%s2153_s19 + $0x10] sm:$0x22]  ;;  %vm2196_vm1 = vmor %vm220_vm9, %vm2177_vm6 }
  0x13   : > { %645 = vrot.lane.b32.xlu0 %v644_v3, %s2103_s20  ;;  %v675_v10 = vshll.u32 %v673_v7, 16  ;;  %v592_v12 = vld [vmem:[%s2153_s19 + $0x10] sm:$0x44]  ;;  %v507_v13 = vld [vmem:[%s2153_s19] sm:$0x44]  ;;  %v1119_v16 = vshrl.u32 %v1117_v11, 16  ;;  %vm2204_vm8 = vmor %vm240_vm13, %vm2185_vm10 }
  0x14   : > { %v563_v14 = vld [vmem:[%s2153_s19 + $0x10] sm:$0x11]  ;;  %v594_v19 = vrot.slane %v592_v12, 7  ;;  %v509_v20 = vshll.u32 %v507_v13, 16  ;;  %v1195_v23 = vld [vmem:[%s2153_s19 + $0x20] sm:$0x22]  ;;  %vm2210_vm0 = vmand %vm450_vm15, %vm252_vm14 }
  0x15   : > { %478 = vrot.lane.b32.xlu1 %v477_v4, %s2103_s20  ;;  %v677_v15 = vrot.slane %v675_v10, 7  ;;  %v565_v17 = vshll.u32 %v563_v14, 16  ;;  %v1980_v22 = vrot.slane %v1119_v16, 9  ;;  %v1151_v25 = vld [vmem:[%s2153_s19 + $0x28] sm:$0x11]  ;;  %v1983_v26 = vrot.slane %v1195_v23, 9 }
  0x16   : > { %v968_v27 = vld [vmem:[%s2153_s19 + $0x8] sm:$0x11]  ;;  %v1153_v28 = vrot.slane %v1151_v25, 6  ;;  %v1219_v30 = vld [vmem:[%s2153_s19 + $0x20] sm:$0x11]  ;;  %vm452_vm5 = vcmask 261125  }
  0x17   : > { %705 = vrot.lane.b32.xlu0 %v704_v8, %s2103_s20  ;;  %v2045_v18 = vpack.i.bf16 %v677_v15, %v624_v9  ;;  %v567_v21 = vrot.slane %v565_v17, 7  ;;  %v970_v31 = vrot.slane %v968_v27, 7  ;;  %v1221_v33 = vrot.slane %v1219_v30, 7  ;;  %v1011_v34 = vld [vmem:[%s2153_s19] sm:$0x22]  ;;  %s2013_s10 = sshll.u32 %s3093_s12, 5 }
  0x18   : > { %v1033_v35 = vld [vmem:[%s2153_s19] sm:$0x11]  ;;  %v1182_v36 = vld [vmem:[%s2153_s19 + $0x28] sm:$0x44]  ;;  %v1131_v39 = vld [vmem:[%s2153_s19 + $0x10] sm:$0x11]  ;;  %s204_s17 = scalar_lea.vmem %s3020_s3, %s2013_s10 }
  0x19   : > { %2046 = vrot.lane.b32.xlu1 %v2045_v18, %s2103_s20  ;;  %v2050_v24 = vpack.i.bf16 %v567_v21, %v509_v20  ;;  %v446_v41 = vld [vmem:[%s2153_s19 + $0x28] sm:$0x22]  ;;  %vm3027_vm6 = vcmask 1043459   ;;  %vm3026_vm9 = vcmask 261127   ;;  %vm3025_vm2 = vsmask.f32 7958 }
  0x1a   : > { %v448_v43 = vsel %vm2204_vm8, %v446_v41, %v447_v38  ;;  %vm297_vm7 = vsmask.f32 3328  ;;  %vm300_vm10 = vsmask.f32 7424  ;;  %v1013_v44 = vrot.slane %v1011_v34, 6  ;;  %vm2220_vm13 = vmand %vm452_vm5, %vm3025_vm2 }
  0x1b   : > { %595 = vrot.lane.b32.xlu0 %v594_v19, %s2103_s20  ;;  %v1093_v45 = vld [vmem:[%s2153_s19 + $0x18] sm:$0x44]  ;;  %v1184_v46 = vshll.u32 %v1182_v36, 16  ;;  %449 = vst [vmem:[#allocation2 + $0x18] sm:$0x22] %v448_v43  ;;  %vm298_vm15 = vmand %vm3027_vm6, %vm297_vm7  ;;  %v1133_v52 = vshll.u32 %v1131_v39, 16 }
  0x1c   : > { %v612_v48 = vld [vmem:[%s2153_s19 + $0x18] sm:$0x22]  ;;  %v999_v49 = vld [vmem:[%s2153_s19 + $0x8] sm:$0x44]  ;;  %v663_v51 = vld [vmem:[%s2153_s19 + $0x20] sm:$0x88] }
  0x1d   : > { %1123 = vrot.lane.b32.xlu1 %v1980_v22, %s2104_s21  ;;  %v614_v50 = vshrl.u32 %v612_v48, 16  ;;  %vm301_vm4 = vmand %vm3026_vm9, %vm300_vm10  ;;  %v619_v53 = vld [vmem:[#allocation2 + $0x8] sm:$0x11]  ;;  %v665_v54 = vshrl.u32 %v663_v51, 16  ;;  %v670_v55 = vld [vmem:[#allocation2 + $0x8] sm:$0x88] }
  0x1e   : > { %v2106_v56 = vmov 0   ;;  %v1207_v57 = vld [vmem:[%s2153_s19 + $0x20] sm:$0x22]  ;;  %v1064_v58 = vld [vmem:[%s2153_s19 + $0x18] sm:$0x11]  ;;  %vm3028_vm5 = vcmask 260102   ;;  %vm2234_vm2 = vmor %vm301_vm4, %vm298_vm15 }
  0x1f   : > { %2051 = vrot.lane.b32.xlu0 %v2050_v24, %s2103_s20  ;;  %1411 = vmatprep.mubr.bf16.mxu1 %v2106_v56  ;;  %v1961_v60 = vrot.slane %v614_v50, 9  ;;  %v1095_v61 = vrot.slane %v1093_v45, 7  ;;  %v1001_v62 = vshll.u32 %v999_v49, 16  ;;  %v1186_v63 = vrot.slane %v1184_v46, 7  ;;  %vm2243_vm7 = vmand %vm3029_vm3, %vm268_vm11  ;;  %v553_v2 = vld [vmem:[%s2153_s19 + $0x10] sm:$0x22] }
  0x20   : > { %1326 = vmatprep.mubr.bf16.mxu0 %v2106_v56  ;;  %2061 = vset.pattern.permute.xlu1 %v2106_v56  ;;  %v671_v1 = vsel %vm2234_vm2, %v665_v54, %v670_v55  ;;  %vm2254_vm4 = vmor %vm2220_vm13, %vm2210_vm0  ;;  %v555_v5 = vshrl.u32 %v553_v2, 16  ;;  %v560_v6 = vld [vmem:[#allocation2 + $0x68] sm:$0x22]  ;;  %v497_v7 = vld [vmem:[%s2153_s19] sm:$0x88]  ;;  %v1984_v8 = vrot.slane %v1207_v57, 9 }
  0x21   : > { %1199 = vrot.lane.b32.xlu1 %v1983_v26, %s2104_s21  ;;  %v620_v4 = vsel %vm2196_vm1, %v1961_v60, %v619_v53  ;;  %672 = vst [vmem:[#allocation2 + $0x8] sm:$0x88] %v671_v1  ;;  %2060 = vset.pattern.permute.xlu0 %v2106_v56  ;;  %v1066_v9 = vshll.u32 %v1064_v58, 16  ;;  %vm272_vm0 = vmand %vm3028_vm5, %vm271_vm12  ;;  %v499_v10 = vshrl.u32 %v497_v7, 16  ;;  %v1104_v11 = vld [vmem:[%s2153_s19 + $0x10] sm:$0x22]  ;;  %v2055_v15 = vpack.i.bf16 %v1001_v62, %v1186_v63 }
  0x22   : > { %621 = vst [vmem:[#allocation2 + $0x8] sm:$0x11] %v620_v4  ;;  %v455_v12 = vld [vmem:[#allocation2 + $0x18] sm:$0xee]  ;;  %v504_v13 = vld [vmem:[#allocation2 + $0x50] sm:$0x44]  ;;  %v561_v14 = vsel %vm2204_vm8, %v555_v5, %v560_v6  ;;  %vm2274_vm11 = vmor %vm272_vm0, %vm2243_vm7 }
  0x23   : > { %1154 = vrot.lane.b32.xlu0 %v1153_v28, %s2103_s20  ;;  %v456_v16 = vsel %vm2254_vm4, 0, %v455_v12  ;;  %562 = vst [vmem:[#allocation2 + $0x68] sm:$0x22] %v561_v14  ;;  %v1956_v17 = vrot.slane %v499_v10, 9  ;;  %v1022_v18 = vld [vmem:[%s2153_s19] sm:$0x22] }
  0x24   : > { %457 = vst [vmem:[#allocation2 + $0x18] sm:$0xee] %v456_v16  ;;  %v1068_v20 = vrot.slane %v1066_v9, 7  ;;  %v1106_v21 = vshll.u32 %v1104_v11, 16  ;;  %v844_v22 = vld [vmem:[%s2153_s19 + $0x10] sm:$0x11] }
  0x25   : > { %971 = vrot.lane.b32.xlu1 %v970_v31, %s2103_s20  ;;  %v505_v23 = vsel %vm2274_vm11, %v1956_v17, %v504_v13  ;;  %vm226_vm12 = vsmask.f32 7938  ;;  %vm228_vm10 = vsmask.f32 7954  ;;  %v634_v24 = vld [vmem:[%s2153_s19 + $0x20] sm:$0x22] }
  0x26   : > { %506 = vst [vmem:[#allocation2 + $0x50] sm:$0x44] %v505_v23  ;;  %v1024_v25 = vrot.slane %v1022_v18, 6  ;;  %vm284_vm13 = vsmask.f32 7946  ;;  %v846_v27 = vshrl.u32 %v844_v22, 16 }
  0x27   : > { %1222 = vrot.lane.b32.xlu0 %v1221_v33, %s2105_s22  ;;  %v635_v26 = vld [vmem:[#allocation2 + $0x8] sm:$0x22]  ;;  %v2285_v28 = vld [vmem:[%s2153_s19] sm:$0x11]  ;;  %v1108_v31 = vrot.slane %v1106_v21, 6  ;;  %vm3050_vm7 = vcmask 1041409  }
  0x28   : > { %v636_v29 = vsel %vm2204_vm8, %v634_v24, %v635_v26  ;;  %v686_v30 = vld [vmem:[%s2153_s19 + $0x28] sm:$0x22]  ;;  %v2292_v32 = vld [vmem:[%s2153_s19] sm:$0x22]  ;;  %vm2296_vm0 = vmand %vm3050_vm7, %vm252_vm14  ;;  %vm3053_vm9 = vsmask.f32 7958 }
  0x29   : > { %1035 = vrot.lane.b32.xlu1 %v1033_v35, %s2105_s22  ;;  %637 = vst [vmem:[#allocation2 + $0x8] sm:$0x22] %v636_v29  ;;  %v1964_v34 = vrot.slane %v686_v30, 9  ;;  %v691_v35 = vld [vmem:[#allocation2 + $0x48] sm:$0x11]  ;;  %vm3054_vm6 = vcmask 259077  }
  0x2a   : > { %v2301_v36 = vld [vmem:[%s2153_s19 + $0x10] sm:$0x22]  ;;  %vm2305_vm5 = vmand %vm3054_vm6, %vm3053_vm9  ;;  %vm310_vm15 = vsmask.f32 7950  ;;  %v989_v39 = vld [vmem:[%s2153_s19 + $0x8] sm:$0x88] }
  0x2b   : > { %1014 = vrot.lane.b32.xlu0 %v1013_v44, %s2104_s21  ;;  %v761_v41 = vrot.slane %v2285_v28, 5  ;;  %vm3057_vm14 = vcmask 1040384   ;;  %vm312_vm3 = vsmask.f32 7966  ;;  %v692_v43 = vsel %vm2196_vm1, %v1964_v34, %v691_v35  ;;  %v996_v45 = vld [vmem:[#allocation2 + $0x60] sm:$0x44] }
  0x2c   : > { %vm2314_vm7 = vmand %vm3057_vm14, %vm226_vm12  ;;  %v991_v44 = vshrl.u32 %v989_v39, 16  ;;  %v1172_v46 = vld [vmem:[%s2153_s19 + $0x28] sm:$0x88]  ;;  %v938_v47 = vld [vmem:[%s2153_s19 + $0x20] sm:$0x22]  ;;  %v1969_v48 = vrot.slane %v2292_v32, 9 }
  0x2d   : > { %1135 = vrot.lane.b32.xlu1 %v1133_v52, %s2105_s22  ;;  %vm3060_vm6 = vcmask 258052   ;;  %693 = vst [vmem:[#allocation2 + $0x48] sm:$0x11] %v692_v43  ;;  %v1174_v50 = vshrl.u32 %v1172_v46, 16  ;;  %v1179_v51 = vld [vmem:[#allocation2 + $0x78] sm:$0x88]  ;;  %vm2338_vm12 = vmor %vm2305_vm5, %vm2296_vm0 }
  0x2e   : > { %vm2325_vm9 = vmand %vm3060_vm6, %vm228_vm10  ;;  %v458_v52 = vld [vmem:[%s2153_s19] sm:$0x22]  ;;  %v2332_v53 = vld [vmem:[%s2153_s19 + $0x10] sm:$0x11]  ;;  %v1975_v57 = vrot.slane %v991_v44, 9  ;;  %v860_v2 = vshll.u32 %v2301_v36, 16 }
  0x2f   : > { %1096 = vrot.lane.b32.xlu0 %v1095_v61, %s2103_s20  ;;  %v694_v55 = vld [vmem:[%s2153_s19 + $0x28] sm:$0x22]  ;;  %v1953_v58 = vrot.slane %v458_v52, 9  ;;  %v464_v60 = vld [vmem:[#allocation2 + $0x50] sm:$0x11]  ;;  %v1180_v63 = vsel %vm2234_vm2, %v1174_v50, %v1179_v51  ;;  %vm2360_vm5 = vmor %vm2325_vm9, %vm2314_vm7  ;;  %vm3067_vm10 = vcmask 1042434  }
  0x30   : > { %v918_v61 = vld [vmem:[%s2153_s19 + $0x20] sm:$0x11]  ;;  %v638_v62 = vld [vmem:[%s2153_s19 + $0x20] sm:$0x22]  ;;  %v519_v0 = vld [vmem:[%s2153_s19 + $0x8] sm:$0x22]  ;;  %v997_v4 = vsel %vm2274_vm11, %v1975_v57, %v996_v45 }
  0x31   : > { %1211 = vrot.lane.b32.xlu1 %v1984_v8, %s2104_s21  ;;  %v523_v1 = vld [vmem:[#allocation2 + $0x50] sm:$0x88]  ;;  %1181 = vst [vmem:[#allocation2 + $0x78] sm:$0x88] %v1180_v63  ;;  %v465_v5 = vsel %vm2196_vm1, %v1953_v58, %v464_v60  ;;  %v467_v6 = vld [vmem:[%s2153_s19] sm:$0x22]  ;;  %vm2374_vm0 = vmand %vm3067_vm10, %vm284_vm13 }
  0x32   : > { %v521_v7 = vrot.slane %v519_v0, 6  ;;  %v576_v8 = vld [vmem:[%s2153_s19 + $0x10] sm:$0x88]  ;;  %v639_v10 = vld [vmem:[#allocation2 + $0x8] sm:$0x22]  ;;  %v1965_v11 = vrot.slane %v694_v55, 9 }
  0x33   : > { %2056 = vrot.lane.b32.xlu0 %v2055_v15, %s2103_s20  ;;  %998 = vst [vmem:[#allocation2 + $0x60] sm:$0x44] %v997_v4  ;;  %466 = vst [vmem:[#allocation2 + $0x50] sm:$0x11] %v465_v5  ;;  %v1959_v12 = vrot.slane %v576_v8, 9  ;;  %v640_v14 = vsel %vm2338_vm12, %v638_v62, %v639_v10  ;;  %vm3071_vm7 = vcmask 260102  }
  0x34   : > { %v581_v13 = vld [vmem:[#allocation2 + $0x68] sm:$0x44]  ;;  %v524_v15 = vsel %vm2234_vm2, %v521_v7, %v523_v1  ;;  %v526_v16 = vld [vmem:[%s2153_s19 + $0x8] sm:$0x22]  ;;  %v1054_v17 = vld [vmem:[%s2153_s19 + $0x18] sm:$0x22] }
  0x35   : > { %1069 = vrot.lane.b32.xlu1 %v1068_v20, %s2103_s20  ;;  %v1061_v18 = vld [vmem:[#allocation2 + $0x70] sm:$0x22]  ;;  %v833_v20 = vshll.u32 %v2332_v53, 16  ;;  %641 = vst [vmem:[#allocation2 + $0x8] sm:$0x22] %v640_v14  ;;  %v582_v22 = vsel %vm2274_vm11, %v1959_v12, %v581_v13  ;;  %v1056_v23 = vshrl.u32 %v1054_v17, 16 }
  0x36   : > { %525 = vst [vmem:[#allocation2 + $0x50] sm:$0x88] %v524_v15  ;;  %v372_v24 = vld [vmem:[%s2153_s19 + $0x18] sm:$0x11]  ;;  %vm3070_vm14 = vsmask.f32 7962 }
  0x37   : > { %1025 = vrot.lane.b32.xlu0 %v1024_v25, %s2104_s21  ;;  %v379_v25 = vld [vmem:[#allocation2 + $0x58] sm:$0x11]  ;;  %vm2384_vm6 = vmand %vm3071_vm7, %vm3070_vm14  ;;  %v1954_v29 = vrot.slane %v467_v6, 9  ;;  %583 = vst [vmem:[#allocation2 + $0x68] sm:$0x44] %v582_v22  ;;  %v374_v30 = vshrl.u32 %v372_v24, 16  ;;  %v1062_v34 = vsel %vm2204_vm8, %v1056_v23, %v1061_v18 }
  0x38   : > { %v584_v33 = vld [vmem:[%s2153_s19 + $0x10] sm:$0x88]  ;;  %v392_v35 = vld [vmem:[%s2153_s19 + $0x20] sm:$0x11]  ;;  %v396_v36 = vld [vmem:[#allocation2 + $0x58] sm:$0x22] }
  0x39   : > { %850 = vrot.lane.b32.xlu1 %v846_v27, %s2104_s21  ;;  %v699_v27 = vld [vmem:[#allocation2 + $0x48] sm:$0x11]  ;;  %vm3074_vm13 = vcmask 1043459   ;;  %1063 = vst [vmem:[#allocation2 + $0x70] sm:$0x22] %v1062_v34  ;;  %v380_v39 = vsel %vm2196_vm1, %v374_v30, %v379_v25  ;;  %v394_v43 = vrot.slane %v392_v35, 7 }
  0x3a   : > { %v700_v32 = vsel %vm2360_vm5, %v1965_v11, %v699_v27  ;;  %vm2398_vm9 = vmand %vm3074_vm13, %vm310_vm15  ;;  %v406_v44 = vld [vmem:[%s2153_s19 + $0x20] sm:$0x22]  ;;  %v928_v45 = vld [vmem:[%s2153_s19 + $0x20] sm:$0x11]  ;;  %vm3077_vm10 = vcmask 261127   ;;  %v1971_v50 = vrot.slane %v860_v2, 9 }
  0x3b   : > { %1109 = vrot.lane.b32.xlu0 %v1108_v31, %s2104_s21  ;;  %v382_v31 = vld [vmem:[%s2153_s19 + $0x18] sm:$0x22]  ;;  %701 = vst [vmem:[#allocation2 + $0x48] sm:$0x11] %v700_v32  ;;  %v771_v46 = vld [vmem:[%s2153_s19] sm:$0x11]  ;;  %vm2409_vm14 = vmand %vm3077_vm10, %vm312_vm3  ;;  %v397_v53 = vsel %vm2204_vm8, %v394_v43, %v396_v36 }
  0x3c   : > { %v384_v42 = vshll.u32 %v382_v31, 16  ;;  %381 = vst [vmem:[#allocation2 + $0x58] sm:$0x11] %v380_v39  ;;  %v408_v49 = vrot.slane %v406_v44, 7  ;;  %v472_v51 = vld [vmem:[#allocation2 + $0x50] sm:$0x11]  ;;  %vm2422_vm3 = vmor %vm2384_vm6, %vm2374_vm0 }
  0x3d   : > { %940 = vrot.lane.b32.xlu1 %v938_v47, %s2104_s21  ;;  %v1960_v52 = vrot.slane %v584_v33, 9  ;;  %v410_v55 = vld [vmem:[#allocation2 + $0x58] sm:$0x44]  ;;  %v835_v57 = vrot.slane %v833_v20, 5  ;;  %v473_v28 = vsel %vm2360_vm5, %v1954_v29, %v472_v51  ;;  %398 = vst [vmem:[#allocation2 + $0x58] sm:$0x22] %v397_v53  ;;  %vm2437_vm15 = vmor %vm2409_vm14, %vm2398_vm9 }
  0x3e   : > { %v411_v60 = vsel %vm2274_vm11, %v408_v49, %v410_v55  ;;  %474 = vst [vmem:[#allocation2 + $0x50] sm:$0x11] %v473_v28  ;;  %v530_v63 = vld [vmem:[#allocation2 + $0x50] sm:$0x88]  ;;  %v1952_v0 = vrot.slane %v384_v42, 9  ;;  %v773_v8 = vrot.slane %v771_v46, 5 }
  0x3f   : > { %920 = vrot.lane.b32.xlu0 %v918_v61, %s2104_s21  ;;  %v421_v61 = vld [vmem:[%s2153_s19 + $0x20] sm:$0x44]  ;;  %412 = vst [vmem:[#allocation2 + $0x58] sm:$0x44] %v411_v60  ;;  %v589_v5 = vld [vmem:[#allocation2 + $0x68] sm:$0x44] }
  0x40   : > { %v413_v1 = vld [vmem:[%s2153_s19 + $0x20] sm:$0x44]  ;;  %v423_v2 = vshrl.u32 %v421_v61, 16  ;;  %v427_v6 = vld [vmem:[#allocation2 + $0x58] sm:$0x88]  ;;  %v590_v10 = vsel %vm2422_vm3, %v1960_v52, %v589_v5  ;;  %vm1287_vm0 = vcmask 261120  }
  0x41   : > { %786 = vrot.lane.b32.xlu1 %v1969_v48, %s2104_s21  ;;  %v528_v48 = vrot.slane %v526_v16, 6  ;;  %v438_v7 = vld [vmem:[%s2153_s19 + $0x28] sm:$0x11]  ;;  %v439_v12 = vld [vmem:[#allocation2 + $0x18] sm:$0x11]  ;;  %v415_v14 = vshll.u32 %v413_v1, 16 }
  0x42   : > { %v425_v11 = vrot.slane %v423_v2, 7  ;;  %591 = vst [vmem:[#allocation2 + $0x68] sm:$0x44] %v590_v10  ;;  %v440_v15 = vsel %vm2196_vm1, %v438_v7, %v439_v12  ;;  %v214_v16 = vld [vmem:[%s2153_s19] sm:$0x11]  ;;  %vm481_vm7 = vcmask 1039360  }
  0x43   : > { %762 = vrot.lane.b32.xlu0 %v761_v41, %s2104_s21  ;;  %v399_v41 = vld [vmem:[%s2153_s19 + $0x20] sm:$0x11]  ;;  %v531_v4 = vsel %vm2437_vm15, %v528_v48, %v530_v63  ;;  %v389_v17 = vld [vmem:[#allocation2 + $0x58] sm:$0x11]  ;;  %v430_v20 = vld [vmem:[%s2153_s19 + $0x20] sm:$0x88] }
  0x44   : > { %532 = vst [vmem:[#allocation2 + $0x50] sm:$0x88] %v531_v4  ;;  %v401_v13 = vrot.slane %v399_v41, 7  ;;  %v428_v18 = vsel %vm2234_vm2, %v425_v11, %v427_v6  ;;  %441 = vst [vmem:[#allocation2 + $0x18] sm:$0x11] %v440_v15  ;;  %v390_v22 = vsel %vm2360_vm5, %v1952_v0, %v389_v17  ;;  %v432_v38 = vshll.u32 %v430_v20, 16 }
  0x45   : > { %930 = vrot.lane.b32.xlu1 %v928_v45, %s2104_s21  ;;  %v222_v21 = vld [vmem:[#allocation2 + $0x30] sm:$0x11]  ;;  %429 = vst [vmem:[#allocation2 + $0x58] sm:$0x88] %v428_v18  ;;  %v234_v24 = vld [vmem:[%s2153_s19] sm:$0x22] }
  0x46   : > { %v223_v23 = vsel %vm2196_vm1, %v214_v16, %v222_v21  ;;  %v242_v25 = vld [vmem:[#allocation2 + $0x30] sm:$0x22]  ;;  %v245_v26 = vld [vmem:[%s2153_s19] sm:$0x44]  ;;  %391 = vst [vmem:[#allocation2 + $0x58] sm:$0x11] %v390_v22 }
  0x47   : > { %864 = vrot.lane.b32.xlu0 %v1971_v50, %s2104_s21  ;;  %v403_v27 = vld [vmem:[#allocation2 + $0x58] sm:$0x22]  ;;  %224 = vst [vmem:[#allocation2 + $0x30] sm:$0x11] %v223_v23  ;;  %v243_v29 = vsel %vm2204_vm8, %v234_v24, %v242_v25  ;;  %v260_v30 = vld [vmem:[%s2153_s19] sm:$0x44] }
  0x48   : > { %v404_v31 = vsel %vm2338_vm12, %v401_v13, %v403_v27  ;;  %v418_v32 = vld [vmem:[#allocation2 + $0x58] sm:$0x44]  ;;  %244 = vst [vmem:[#allocation2 + $0x30] sm:$0x22] %v243_v29  ;;  %v247_v33 = vshll.u32 %v245_v26, 16  ;;  %v262_v34 = vshrl.u32 %v260_v30, 16 }
  0x49   : > { %836 = vrot.lane.b32.xlu1 %v835_v57, %s2104_s21  ;;  %v274_v35 = vld [vmem:[#allocation2 + $0x30] sm:$0x44]  ;;  %405 = vst [vmem:[#allocation2 + $0x58] sm:$0x22] %v404_v31  ;;  %v419_v36 = vsel %vm2422_vm3, %v415_v14, %v418_v32  ;;  %v277_v39 = vld [vmem:[%s2153_s19] sm:$0x88] }
  0x4a   : > { %v292_v42 = vld [vmem:[%s2153_s19 + $0x8] sm:$0x11]  ;;  %420 = vst [vmem:[#allocation2 + $0x58] sm:$0x44] %v419_v36  ;;  %v275_v44 = vsel %vm2274_vm11, %v262_v34, %v274_v35  ;;  %v279_v45 = vshll.u32 %v277_v39, 16  ;;  %v1947_v52 = vrot.slane %v247_v33, 9 }
  0x4b   : > { %774 = vrot.lane.b32.xlu0 %v773_v8, %s2104_s21  ;;  %v442_v43 = vld [vmem:[%s2153_s19 + $0x28] sm:$0x11]  ;;  %v294_v46 = vrot.slane %v292_v42, 5  ;;  %v303_v47 = vld [vmem:[#allocation2 + $0x30] sm:$0x88]  ;;  %vm765_vm6 = vcmask 785408  }
  0x4c   : > { %276 = vst [vmem:[#allocation2 + $0x30] sm:$0x44] %v275_v44  ;;  %v318_v48 = vld [vmem:[%s2153_s19 + $0x8] sm:$0x22]  ;;  %v323_v49 = vld [vmem:[#allocation2] sm:$0x11] }
  0x4d   : > { %v443_v50 = vld [vmem:[#allocation2 + $0x18] sm:$0x11]  ;;  %v225_v51 = vld [vmem:[%s2153_s19] sm:$0x11]  ;;  %v304_v53 = vsel %vm2234_vm2, %v294_v46, %v303_v47  ;;  %v1950_v55 = vrot.slane %v318_v48, 9  ;;  %v1949_v0 = vrot.slane %v279_v45, 9 }
  0x4e   : > { %v435_v57 = vld [vmem:[#allocation2 + $0x58] sm:$0x88]  ;;  %v444_v28 = vsel %vm2360_vm5, %v442_v43, %v443_v50  ;;  %305 = vst [vmem:[#allocation2 + $0x30] sm:$0x88] %v304_v53  ;;  %v306_v41 = vld [vmem:[%s2153_s19 + $0x8] sm:$0x11] }
  0x4f   : > { %v334_v60 = vld [vmem:[%s2153_s19 + $0x10] sm:$0x11]  ;;  %v436_v61 = vsel %vm2437_vm15, %v432_v38, %v435_v57  ;;  %445 = vst [vmem:[#allocation2 + $0x18] sm:$0x11] %v444_v28  ;;  %v324_v1 = vsel %vm2196_vm1, %v1950_v55, %v323_v49  ;;  %v257_v5 = vld [vmem:[#allocation2 + $0x30] sm:$0x22] }
  0x50   : > { %v231_v63 = vld [vmem:[#allocation2 + $0x30] sm:$0x11]  ;;  %v336_v2 = vshrl.u32 %v334_v60, 16  ;;  %437 = vst [vmem:[#allocation2 + $0x58] sm:$0x88] %v436_v61  ;;  %v258_v8 = vsel %vm2338_vm12, %v1947_v52, %v257_v5  ;;  %v308_v10 = vrot.slane %v306_v41, 5 }
  0x51   : > { %v232_v4 = vsel %vm2360_vm5, %v225_v51, %v231_v63  ;;  %325 = vst [vmem:[#allocation2] sm:$0x11] %v324_v1  ;;  %v340_v6 = vld [vmem:[#allocation2] sm:$0x22]  ;;  %v351_v7 = vld [vmem:[%s2153_s19 + $0x10] sm:$0x44] }
  0x52   : > { %233 = vst [vmem:[#allocation2 + $0x30] sm:$0x11] %v232_v4  ;;  %v326_v11 = vld [vmem:[%s2153_s19 + $0x10] sm:$0x11]  ;;  %v338_v12 = vrot.slane %v336_v2, 7  ;;  %v210_v48 = vld [vmem:[%s3019_s2] sm:$0xff] }
  0x53   : > { %v352_v13 = vld [vmem:[#allocation2] sm:$0x44]  ;;  %259 = vst [vmem:[#allocation2 + $0x30] sm:$0x22] %v258_v8  ;;  %v359_v15 = vld [vmem:[%s2153_s19 + $0x10] sm:$0x88]  ;;  %1239 = vperm.xlu0 %2060, %v210_v48  }
  0x54   : > { %v353_v14 = vsel %vm2274_vm11, %v351_v7, %v352_v13  ;;  %v360_v16 = vld [vmem:[#allocation2] sm:$0x88]  ;;  %v363_v17 = vld [vmem:[%s2153_s19 + $0x18] sm:$0x11]  ;;  %v289_v18 = vld [vmem:[#allocation2 + $0x30] sm:$0x44]  ;;  %v341_v20 = vsel %vm2204_vm8, %v338_v12, %v340_v6 }
  0x55   : > { %354 = vst [vmem:[#allocation2] sm:$0x44] %v353_v14  ;;  %v361_v21 = vsel %vm2234_vm2, %v359_v15, %v360_v16  ;;  %v290_v22 = vsel %vm2422_vm3, %v1949_v0, %v289_v18  ;;  %v328_v23 = vshll.u32 %v326_v11, 16  ;;  %342 = vst [vmem:[#allocation2] sm:$0x22] %v341_v20  ;;  %v365_v25 = vshll.u32 %v363_v17, 16 }
  0x56   : > { %v343_v24 = vld [vmem:[%s2153_s19 + $0x10] sm:$0x22]  ;;  %362 = vst [vmem:[#allocation2] sm:$0x88] %v361_v21  ;;  %291 = vst [vmem:[#allocation2 + $0x30] sm:$0x44] %v290_v22 }
  0x57   : > { %v315_v26 = vld [vmem:[#allocation2 + $0x30] sm:$0x88]  ;;  %v1236_v27 = vld [vmem:[#allocation2 + $0x18] sm:$0xff]  ;;  %v355_v30 = vld [vmem:[%s2153_s19 + $0x10] sm:$0x44]  ;;  %v345_v33 = vshll.u32 %v343_v24, 16 }
  0x58   : > { %v316_v29 = vsel %vm2437_vm15, %v308_v10, %v315_v26  ;;  %v1235_v31 = vld [vmem:[#allocation2 + $0x58] sm:$0xff]  ;;  %v331_v32 = vld [vmem:[#allocation2] sm:$0x11]  ;;  %v1143_v34 = vld [vmem:[%s2153_s19 + $0x28] sm:$0x22]  ;;  %v367_v39 = vrot.slane %v365_v25, 5 }
  0x59   : > { %317 = vst [vmem:[#allocation2 + $0x30] sm:$0x88] %v316_v29  ;;  %v1990_v35 = vcombine.high %v1235_v31, %v1236_v27  ;;  %v1989_v36 = vcombine.low %v1235_v31, %v1236_v27  ;;  %v332_v38 = vsel %vm2360_vm5, %v328_v23, %v331_v32  ;;  %v1144_v42 = vld [vmem:[#allocation2 + $0x78] sm:$0x22]  ;;  %v951_v44 = vld [vmem:[%s2153_s19 + $0x8] sm:$0x22] }
  0x5a   : > { %333 = vst [vmem:[#allocation2] sm:$0x11] %v332_v38  ;;  %v1145_v43 = vsel %vm2204_vm8, %v1143_v34, %v1144_v42  ;;  %v957_v45 = vld [vmem:[#allocation2 + $0x60] sm:$0x11]  ;;  %v1972_v47 = vrot.slane %v951_v44, 9  ;;  %v211_v52 = vld [vmem:[%s3019_s2 + $0x8] sm:$0xff] }
  0x5b   : > { %1306 = vmatprep.subr.bf16.mxu0 %v1990_v35  ;;  %1146 = vst [vmem:[#allocation2 + $0x78] sm:$0x22] %v1145_v43  ;;  %v960_v28 = vld [vmem:[%s2153_s19 + $0x8] sm:$0x22]  ;;  %v1077_v41 = vld [vmem:[%s2153_s19 + $0x18] sm:$0x88]  ;;  %1244 = vperm.xlu1 %2061, %v211_v52  }
  0x5c   : > { %v356_v46 = vld [vmem:[#allocation2] sm:$0x44]  ;;  %1307 = vmatpush1.bf16.msra.mxu0 %v1989_v36  ;;  %v348_v49 = vld [vmem:[#allocation2] sm:$0x22]  ;;  %v958_v57 = vsel %vm2196_vm1, %v1972_v47, %v957_v45  ;;  %v1082_v60 = vld [vmem:[#allocation2 + $0x70] sm:$0x44] }
  0x5d   : > { %v357_v50 = vsel %vm2422_vm3, %v355_v30, %v356_v46  ;;  %v369_v51 = vld [vmem:[#allocation2] sm:$0x88]  ;;  %v349_v53 = vsel %vm2338_vm12, %v345_v33, %v348_v49  ;;  %v1147_v61 = vld [vmem:[%s2153_s19 + $0x28] sm:$0x22]  ;;  %959 = vst [vmem:[#allocation2 + $0x60] sm:$0x11] %v958_v57 }
  0x5e   : > { %358 = vst [vmem:[#allocation2] sm:$0x44] %v357_v50  ;;  %v370_v55 = vsel %vm2437_vm15, %v367_v39, %v369_v51  ;;  %350 = vst [vmem:[#allocation2] sm:$0x22] %v349_v53  ;;  %v1978_v63 = vrot.slane %v1077_v41, 9  ;;  %v213_v11 = vld [vmem:[%s3019_s2 + $0x18] sm:$0xff] }
  0x5f   : > { %371 = vst [vmem:[#allocation2] sm:$0x88] %v370_v55  ;;  %v827_v0 = vld [vmem:[%s2153_s19 + $0x18] sm:$0x88]  ;;  %v828_v1 = vld [vmem:[#allocation2 + $0x20] sm:$0x88]  ;;  %1254 = vperm.xlu0 %2060, %v213_v11  }
  0x60   : > { %v829_v2 = vsel %vm2234_vm2, %v827_v0, %v828_v1  ;;  %v872_v4 = vld [vmem:[%s2153_s19 + $0x28] sm:$0x11]  ;;  %v876_v5 = vld [vmem:[#allocation2 + $0x10] sm:$0x22]  ;;  %v1083_v6 = vsel %vm2274_vm11, %v1978_v63, %v1082_v60  ;;  %v1085_v7 = vld [vmem:[%s2153_s19 + $0x18] sm:$0x88] }
  0x61   : > { %830 = vst [vmem:[#allocation2 + $0x20] sm:$0x88] %v829_v2  ;;  %v874_v8 = vrot.slane %v872_v4, 7  ;;  %v886_v10 = vld [vmem:[%s2153_s19 + $0x28] sm:$0x22]  ;;  %v1973_v15 = vrot.slane %v960_v28, 9 }
  0x62   : > { %1084 = vst [vmem:[#allocation2 + $0x70] sm:$0x44] %v1083_v6  ;;  %v888_v12 = vrot.slane %v886_v10, 7  ;;  %v890_v13 = vld [vmem:[#allocation2 + $0x10] sm:$0x44]  ;;  %v1979_v21 = vrot.slane %v1085_v7, 9 }
  0x63   : > { %v1148_v14 = vld [vmem:[#allocation2 + $0x78] sm:$0x22]  ;;  %v877_v16 = vsel %vm2204_vm8, %v874_v8, %v876_v5  ;;  %v901_v17 = vld [vmem:[%s2153_s19 + $0x28] sm:$0x44]  ;;  %v212_v18 = vld [vmem:[%s3019_s2 + $0x10] sm:$0xff]  ;;  %vm1038_vm13 = vcmask 777216  }
  0x64   : > { %v1149_v20 = vsel %vm2338_vm12, %v1147_v61, %v1148_v14  ;;  %878 = vst [vmem:[#allocation2 + $0x10] sm:$0x22] %v877_v16  ;;  %v879_v22 = vld [vmem:[%s2153_s19 + $0x28] sm:$0x11]  ;;  %v891_v23 = vsel %vm2274_vm11, %v888_v12, %v890_v13  ;;  %v893_v24 = vld [vmem:[%s2153_s19 + $0x28] sm:$0x44]  ;;  %1249 = vperm.xlu1 %2061, %v212_v18  }
  0x65   : > { %v903_v25 = vshrl.u32 %v901_v17, 16  ;;  %1150 = vst [vmem:[#allocation2 + $0x78] sm:$0x22] %v1149_v20  ;;  %892 = vst [vmem:[#allocation2 + $0x10] sm:$0x44] %v891_v23  ;;  %v2558_v34 = vld [vmem:[%s3018_s1] sm:$0xff]  }
  0x66   : > { %v907_v26 = vld [vmem:[#allocation2 + $0x10] sm:$0x88]  ;;  %v716_v27 = vld [vmem:[%s2153_s19 + $0x8] sm:$0x11]  ;;  %v718_v29 = vld [vmem:[#allocation2 + $0x40] sm:$0x11] }
  0x67   : > { %v2065_v30 = vld [vmem:[#allocation2 + $0x34] ss:$-48 sps:$4 sm:$0xff]   ;;  %v2067_v31 = vld [vmem:[#allocation2 + $0x30] ss:$-48 sps:$4 sm:$0xff]   ;;  %v905_v32 = vrot.slane %v903_v25, 7  ;;  %v719_v33 = vsel %vm2196_vm1, %v716_v27, %v718_v29  ;;  %v881_v39 = vrot.slane %v879_v22, 7 }
  0x68   : > { %v965_v35 = vld [vmem:[#allocation2 + $0x60] sm:$0x11]  ;;  %720 = vst [vmem:[#allocation2 + $0x40] sm:$0x11] %v719_v33  ;;  %v725_v36 = vld [vmem:[%s2153_s19 + $0x8] sm:$0x22]  ;;  %1308 = vmatprep.subr.bf16.mxu0 %v2065_v30 }
  0x69   : > { %v966_v38 = vsel %vm2360_vm5, %v1973_v15, %v965_v35  ;;  %v895_v42 = vshll.u32 %v893_v24, 16  ;;  %v908_v43 = vsel %vm2234_vm2, %v905_v32, %v907_v26  ;;  %v726_v44 = vld [vmem:[#allocation2 + $0x40] sm:$0x22]  ;;  %v729_v45 = vld [vmem:[%s2153_s19 + $0x8] sm:$0x44]  ;;  %1309 = vmatpush1.bf16.msra.mxu0 %v2067_v31 }
  0x6a   : > { %967 = vst [vmem:[#allocation2 + $0x60] sm:$0x11] %v966_v38  ;;  %v1090_v46 = vld [vmem:[#allocation2 + $0x70] sm:$0x44]  ;;  %909 = vst [vmem:[#allocation2 + $0x10] sm:$0x88] %v908_v43  ;;  %v727_v48 = vsel %vm2204_vm8, %v725_v36, %v726_v44 }
  0x6b   : > { %v910_v47 = vld [vmem:[%s2153_s19 + $0x28] sm:$0x88]  ;;  %v739_v49 = vld [vmem:[%s2153_s19 + $0x8] sm:$0x44]  ;;  %v1091_v50 = vsel %vm2422_vm3, %v1979_v21, %v1090_v46  ;;  %728 = vst [vmem:[#allocation2 + $0x40] sm:$0x22] %v727_v48 }
  0x6c   : > { %v731_v51 = vshll.u32 %v729_v45, 16  ;;  %v741_v52 = vshrl.u32 %v739_v49, 16  ;;  %v746_v53 = vld [vmem:[#allocation2 + $0x40] sm:$0x44]  ;;  %v749_v55 = vld [vmem:[%s2153_s19 + $0x8] sm:$0x88]  ;;  %1991 = vmatmul.mubr.msk.bf16.vlgmr.msra.gmra.mxu0 %vm1287_vm0, %v2558_v34 }
  0x6d   : > { %1092 = vst [vmem:[#allocation2 + $0x70] sm:$0x44] %v1091_v50  ;;  %v883_v57 = vld [vmem:[#allocation2 + $0x10] sm:$0x22]  ;;  %v802_v28 = vld [vmem:[%s2153_s19 + $0x18] sm:$0x11]  ;;  %1336 = vmatprep.mubr.bf16.mxu0 %v2106_v56 }
  0x6e   : > { %v884_v41 = vsel %vm2338_vm12, %v881_v39, %v883_v57  ;;  %v898_v60 = vld [vmem:[#allocation2 + $0x10] sm:$0x44]  ;;  %v721_v61 = vld [vmem:[%s2153_s19 + $0x8] sm:$0x11]  ;;  %v747_v63 = vsel %vm2274_vm11, %v741_v52, %v746_v53  ;;  %v804_v0 = vshrl.u32 %v802_v28, 16  ;;  %v912_v2 = vshll.u32 %v910_v47, 16 }
  0x6f   : > { %885 = vst [vmem:[#allocation2 + $0x10] sm:$0x22] %v884_v41  ;;  %v899_v1 = vsel %vm2422_vm3, %v895_v42, %v898_v60  ;;  %748 = vst [vmem:[#allocation2 + $0x40] sm:$0x44] %v747_v63  ;;  %v751_v4 = vshll.u32 %v749_v55, 16  ;;  %v1966_v8 = vrot.slane %v731_v51, 9 }
  0x70   : > { %v808_v5 = vld [vmem:[#allocation2 + $0x20] sm:$0x22]  ;;  %v819_v6 = vld [vmem:[%s2153_s19 + $0x18] sm:$0x44]  ;;  %900 = vst [vmem:[#allocation2 + $0x10] sm:$0x44] %v899_v1 }
  0x71   : > { %v722_v7 = vld [vmem:[#allocation2 + $0x40] sm:$0x11]  ;;  %v806_v10 = vrot.slane %v804_v0, 7  ;;  %v820_v11 = vld [vmem:[#allocation2 + $0x20] sm:$0x44]  ;;  %v2592_v14 = vld [vmem:[%s3018_s1 + $0x8] sm:$0xff]  }
  0x72   : > { %v723_v12 = vsel %vm2360_vm5, %v721_v61, %v722_v7  ;;  %v821_v13 = vsel %vm2274_vm11, %v819_v6, %v820_v11  ;;  %v915_v15 = vld [vmem:[#allocation2 + $0x10] sm:$0x88]  ;;  %v736_v18 = vld [vmem:[#allocation2 + $0x40] sm:$0x22]  ;;  %v1968_v20 = vrot.slane %v751_v4, 9 }
  0x73   : > { %724 = vst [vmem:[#allocation2 + $0x40] sm:$0x11] %v723_v12  ;;  %v809_v16 = vsel %vm2204_vm8, %v806_v10, %v808_v5  ;;  %822 = vst [vmem:[#allocation2 + $0x20] sm:$0x44] %v821_v13  ;;  %v916_v17 = vsel %vm2437_vm15, %v912_v2, %v915_v15  ;;  %v737_v21 = vsel %vm2338_vm12, %v1966_v8, %v736_v18  ;;  %v811_v22 = vld [vmem:[%s2153_s19 + $0x18] sm:$0x22] }
  0x74   : > { %810 = vst [vmem:[#allocation2 + $0x20] sm:$0x22] %v809_v16  ;;  %917 = vst [vmem:[#allocation2 + $0x10] sm:$0x88] %v916_v17  ;;  %1992 = vmatmul.mubr.msk.bf16.gmra.mxu0 %vm1287_vm0, %v2592_v14  ;;  %v813_v25 = vshll.u32 %v811_v22, 16 }
  0x75   : > { %738 = vst [vmem:[#allocation2 + $0x40] sm:$0x22] %v737_v21  ;;  %v823_v26 = vld [vmem:[%s2153_s19 + $0x18] sm:$0x44]  ;;  %1496 = vmatprep.mubr.bf16.mxu0 %v2106_v56  ;;  %v540_v33 = vld [vmem:[#allocation2 + $0x68] sm:$0x11] }
  0x76   : > { %v756_v23 = vld [vmem:[#allocation2 + $0x40] sm:$0x44]  ;;  %v543_v36 = vld [vmem:[%s2153_s19 + $0x10] sm:$0x22]  ;;  %v650_v42 = vld [vmem:[#allocation2 + $0x8] sm:$0x44] }
  0x77   : > { %v757_v24 = vsel %vm2422_vm3, %v1968_v20, %v756_v23  ;;  %v653_v45 = vld [vmem:[%s2153_s19 + $0x20] sm:$0x88]  ;;  %v545_v47 = vshll.u32 %v543_v36, 16  ;;  %v484_v49 = vld [vmem:[#allocation2 + $0x50] sm:$0x22] }
  0x78   : > { %758 = vst [vmem:[#allocation2 + $0x40] sm:$0x44] %v757_v24  ;;  %v487_v50 = vld [vmem:[%s2153_s19] sm:$0x88]  ;;  %v655_v55 = vshll.u32 %v653_v45, 16 }
  0x79   : > { %v710_v28 = vld [vmem:[#allocation2 + $0x48] sm:$0x22]  ;;  %v489_v60 = vshll.u32 %v487_v50, 16  ;;  %v1957_v0 = vrot.slane %v545_v47, 9  ;;  %v603_v5 = vld [vmem:[%s2153_s19 + $0x18] sm:$0x22] }
  0x7a   : > { %v824_v27 = vld [vmem:[#allocation2 + $0x20] sm:$0x44]  ;;  %v683_v7 = vld [vmem:[#allocation2 + $0x8] sm:$0x88]  ;;  %v1962_v11 = vrot.slane %v655_v55, 9  ;;  %v605_v20 = vshll.u32 %v603_v5, 16 }
  0x7b   : > { %v816_v29 = vld [vmem:[#allocation2 + $0x20] sm:$0x22]  ;;  %v825_v30 = vsel %vm2422_vm3, %v823_v26, %v824_v27  ;;  %v600_v8 = vld [vmem:[#allocation2 + $0x68] sm:$0x88]  ;;  %v631_v12 = vld [vmem:[#allocation2 + $0x8] sm:$0x11] }
  0x7c   : > { %v817_v31 = vsel %vm2338_vm12, %v813_v25, %v816_v29  ;;  %826 = vst [vmem:[#allocation2 + $0x20] sm:$0x44] %v825_v30  ;;  %v1955_v18 = vrot.slane %v489_v60, 10  ;;  %v1159_v60 = vld [vmem:[#allocation2 + $0x78] sm:$0x44] }
  0x7d   : > { %818 = vst [vmem:[#allocation2 + $0x20] sm:$0x22] %v817_v31  ;;  %v1128_v31 = vld [vmem:[#allocation2 + $0x78] sm:$0x11]  ;;  %v841_v59 = vld [vmem:[#allocation2 + $0x20] sm:$0x88] }
  0x83   : > { %v536_v32 = vpop.permute.xlu1 %535 }
  0x84   : > { %v537_v35 = vrot.slane %v536_v32, 4 }
  0x85   : > { %v646_v38 = vpop.permute.xlu0 %645 }
  0x86   : > { %v538_v39 = vsel %vm481_vm7, %v536_v32, %v537_v35  ;;  %v647_v43 = vrot.slane %v646_v38, 4 }
  0x87   : > { %v541_v44 = vsel %vm2196_vm1, %v538_v39, %v540_v33  ;;  %v479_v46 = vpop.permute.xlu1 %478 }
  0x88   : > { %542 = vst [vmem:[#allocation2 + $0x68] sm:$0x11] %v541_v44  ;;  %v648_v48 = vsel %vm481_vm7, %v646_v38, %v647_v43  ;;  %v480_v51 = vrot.slane %v479_v46, 4 }
  0x89   : > { %v651_v52 = vsel %vm2274_vm11, %v648_v48, %v650_v42  ;;  %v706_v53 = vpop.permute.xlu0 %705 }
  0x8a   : > { %652 = vst [vmem:[#allocation2 + $0x8] sm:$0x44] %v651_v52  ;;  %v482_v57 = vsel %vm481_vm7, %v479_v46, %v480_v51  ;;  %v707_v41 = vrot.slane %v706_v53, 4  ;;  %v573_v46 = vld [vmem:[#allocation2 + $0x68] sm:$0x22]  ;;  %v607_v51 = vrot.slane %v605_v20, 6 }
  0x8b   : > { %v485_v61 = vsel %vm2204_vm8, %v482_v57, %v484_v49  ;;  %v2047_v63 = vpop.permute.xlu1 %2046  ;;  %v516_v49 = vld [vmem:[#allocation2 + $0x50] sm:$0x44]  ;;  %v1204_v52 = vld [vmem:[#allocation2 + $0x28] sm:$0x11] }
  0x8c   : > { %486 = vst [vmem:[#allocation2 + $0x50] sm:$0x22] %v485_v61  ;;  %v708_v1 = vsel %vm481_vm7, %v706_v53, %v707_v41  ;;  %v2049_v2 = vunpack.i.h.bf16 %v2047_v63  ;;  %v2048_v4 = vunpack.i.l.bf16 %v2047_v63 }
  0x8d   : > { %v711_v6 = vsel %vm2204_vm8, %v708_v1, %v710_v28  ;;  %v596_v10 = vpop.permute.xlu0 %595 }
  0x8e   : > { %712 = vst [vmem:[#allocation2 + $0x48] sm:$0x22] %v711_v6  ;;  %v680_v13 = vrot.slane %v2049_v2, 4  ;;  %v628_v15 = vrot.slane %v2048_v4, 4  ;;  %v597_v16 = vrot.slane %v596_v10, 4 }
  0x8f   : > { %v550_v17 = vld [vmem:[#allocation2 + $0x68] sm:$0x11]  ;;  %v1124_v21 = vpop.permute.xlu1 %1123 }
  0x90   : > { %v551_v22 = vsel %vm2360_vm5, %v1957_v0, %v550_v17  ;;  %v681_v23 = vsel %vm481_vm7, %v2049_v2, %v680_v13  ;;  %v629_v24 = vsel %vm481_vm7, %v2048_v4, %v628_v15  ;;  %v598_v25 = vsel %vm481_vm7, %v596_v10, %v597_v16  ;;  %v1162_v2 = vld [vmem:[%s2153_s19 + $0x28] sm:$0x88] }
  0x91   : > { %552 = vst [vmem:[#allocation2 + $0x68] sm:$0x11] %v551_v22  ;;  %v660_v26 = vld [vmem:[#allocation2 + $0x8] sm:$0x44]  ;;  %v684_v27 = vsel %vm2437_vm15, %v681_v23, %v683_v7  ;;  %v632_v29 = vsel %vm2360_vm5, %v629_v24, %v631_v12  ;;  %v601_v30 = vsel %vm2234_vm2, %v598_v25, %v600_v8  ;;  %v1125_v32 = vrot.slane %v1124_v21, 4  ;;  %v2052_v33 = vpop.permute.xlu0 %2051 }
  0x92   : > { %v661_v35 = vsel %vm2422_vm3, %v1962_v11, %v660_v26  ;;  %685 = vst [vmem:[#allocation2 + $0x8] sm:$0x88] %v684_v27  ;;  %633 = vst [vmem:[#allocation2 + $0x8] sm:$0x11] %v632_v29  ;;  %v2054_v36 = vunpack.i.h.bf16 %v2052_v33  ;;  %v2053_v38 = vunpack.i.l.bf16 %v2052_v33  ;;  %v976_v7 = vld [vmem:[#allocation2 + $0x60] sm:$0x22] }
  0x93   : > { %602 = vst [vmem:[#allocation2 + $0x68] sm:$0x88] %v601_v30  ;;  %662 = vst [vmem:[#allocation2 + $0x8] sm:$0x44] %v661_v35  ;;  %v494_v39 = vld [vmem:[#allocation2 + $0x50] sm:$0x22]  ;;  %v1126_v42 = vsel %vm765_vm6, %v1124_v21, %v1125_v32  ;;  %v1200_v43 = vpop.permute.xlu1 %1199 }
  0x94   : > { %v495_v44 = vsel %vm2338_vm12, %v1955_v18, %v494_v39  ;;  %v1129_v45 = vsel %vm2196_vm1, %v1126_v42, %v1128_v31  ;;  %v570_v47 = vrot.slane %v2054_v36, 4  ;;  %v513_v48 = vrot.slane %v2053_v38, 4  ;;  %v979_v12 = vld [vmem:[%s2153_s19 + $0x8] sm:$0x88]  ;;  %v1227_v18 = vld [vmem:[#allocation2 + $0x28] sm:$0x22] }
  0x95   : > { %496 = vst [vmem:[#allocation2 + $0x50] sm:$0x22] %v495_v44  ;;  %v713_v50 = vld [vmem:[#allocation2 + $0x48] sm:$0xee]  ;;  %1130 = vst [vmem:[#allocation2 + $0x78] sm:$0x11] %v1129_v45  ;;  %v1155_v55 = vpop.permute.xlu0 %1154 }
  0x96   : > { %v1201_v53 = vrot.slane %v1200_v43, 4  ;;  %v714_v57 = vsel %vm2254_vm4, 0, %v713_v50  ;;  %v571_v28 = vsel %vm481_vm7, %v2054_v36, %v570_v47  ;;  %v514_v41 = vsel %vm481_vm7, %v2053_v38, %v513_v48  ;;  %v1041_v24 = vld [vmem:[#allocation2 + $0x70] sm:$0x11]  ;;  %v1044_v27 = vld [vmem:[%s2153_s19 + $0x18] sm:$0x22] }
  0x97   : > { %v1156_v61 = vrot.slane %v1155_v55, 4  ;;  %715 = vst [vmem:[#allocation2 + $0x48] sm:$0xee] %v714_v57  ;;  %v574_v63 = vsel %vm2338_vm12, %v571_v28, %v573_v46  ;;  %v517_v0 = vsel %vm2422_vm3, %v514_v41, %v516_v49  ;;  %v972_v4 = vpop.permute.xlu1 %971  ;;  %v1164_v16 = vshll.u32 %v1162_v2, 16  ;;  %v1019_v32 = vld [vmem:[#allocation2 + $0x60] sm:$0x88] }
  0x98   : > { %v1202_v1 = vsel %vm765_vm6, %v1200_v43, %v1201_v53  ;;  %575 = vst [vmem:[#allocation2 + $0x68] sm:$0x22] %v574_v63  ;;  %518 = vst [vmem:[#allocation2 + $0x50] sm:$0x44] %v517_v0  ;;  %v973_v8 = vrot.slane %v972_v4, 4  ;;  %v981_v19 = vshll.u32 %v979_v12, 16 }
  0x99   : > { %v1205_v5 = vsel %vm2196_vm1, %v1202_v1, %v1204_v52  ;;  %v1157_v6 = vsel %vm481_vm7, %v1155_v55, %v1156_v61  ;;  %v1223_v13 = vpop.permute.xlu0 %1222  ;;  %v1981_v30 = vrot.slane %v1164_v16, 9  ;;  %v1046_v45 = vshll.u32 %v1044_v27, 16  ;;  %v1101_v50 = vld [vmem:[#allocation2 + $0x70] sm:$0x88] }
  0x9a   : > { %v609_v10 = vld [vmem:[#allocation2 + $0x68] sm:$0x88]  ;;  %1206 = vst [vmem:[#allocation2 + $0x28] sm:$0x11] %v1205_v5  ;;  %v1160_v11 = vsel %vm2274_vm11, %v1157_v6, %v1159_v60  ;;  %v974_v17 = vsel %vm481_vm7, %v972_v4, %v973_v8  ;;  %v1224_v20 = vrot.slane %v1223_v13, 4  ;;  %v1974_v44 = vrot.slane %v981_v19, 10 }
  0x9b   : > { %v610_v15 = vsel %vm2437_vm15, %v607_v51, %v609_v10  ;;  %1161 = vst [vmem:[#allocation2 + $0x78] sm:$0x44] %v1160_v11  ;;  %v977_v21 = vsel %vm2204_vm8, %v974_v17, %v976_v7  ;;  %v1036_v22 = vpop.permute.xlu1 %1035  ;;  %v1357_v35 = vld [vmem:[#allocation2 + $0x8] sm:$0xff]  ;;  %v1976_v0 = vrot.slane %v1046_v45, 9  ;;  %v1008_v17 = vld [vmem:[#allocation2 + $0x60] sm:$0x44] }
  0x9c   : > { %611 = vst [vmem:[#allocation2 + $0x68] sm:$0x88] %v610_v15  ;;  %978 = vst [vmem:[#allocation2 + $0x60] sm:$0x22] %v977_v21  ;;  %v1225_v23 = vsel %vm1038_vm13, %v1223_v13, %v1224_v20  ;;  %v1037_v25 = vrot.slane %v1036_v22, 4 }
  0x9d   : > { %v1228_v26 = vsel %vm2204_vm8, %v1225_v23, %v1227_v18  ;;  %v1015_v29 = vpop.permute.xlu0 %1014  ;;  %v1140_v53 = vld [vmem:[#allocation2 + $0x78] sm:$0x11]  ;;  %v1192_v18 = vld [vmem:[#allocation2 + $0x78] sm:$0x88]  ;;  %v1074_v23 = vld [vmem:[#allocation2 + $0x70] sm:$0x22] }
  0x9e   : > { %1229 = vst [vmem:[#allocation2 + $0x28] sm:$0x22] %v1228_v26  ;;  %v1039_v31 = vsel %vm1038_vm13, %v1036_v22, %v1037_v25  ;;  %v1016_v33 = vrot.slane %v1015_v29, 4  ;;  %v1358_v36 = vld [vmem:[#allocation2 + $0x48] sm:$0xff] }
  0x9f   : > { %v1042_v38 = vsel %vm2196_vm1, %v1039_v31, %v1041_v24  ;;  %v1136_v39 = vpop.permute.xlu1 %1135  ;;  %v1996_v42 = vcombine.high %v1357_v35, %v1358_v36  ;;  %v1995_v43 = vcombine.low %v1357_v35, %v1358_v36 }
  0xa0   : > { %1043 = vst [vmem:[#allocation2 + $0x70] sm:$0x11] %v1042_v38  ;;  %v1017_v46 = vsel %vm765_vm6, %v1015_v29, %v1016_v33  ;;  %v1137_v47 = vrot.slane %v1136_v39, 4 }
  0xa1   : > { %v1020_v49 = vsel %vm2234_vm2, %v1017_v46, %v1019_v32  ;;  %v1097_v51 = vpop.permute.xlu0 %1096  ;;  %1391 = vmatprep.subr.bf16.mxu1 %v1996_v42  ;;  %v1216_v10 = vld [vmem:[#allocation2 + $0x28] sm:$0x11] }
  0xa2   : > { %v1169_v48 = vld [vmem:[#allocation2 + $0x78] sm:$0x44]  ;;  %1021 = vst [vmem:[#allocation2 + $0x60] sm:$0x88] %v1020_v49  ;;  %v1138_v55 = vsel %vm1038_vm13, %v1136_v39, %v1137_v47  ;;  %v1098_v57 = vrot.slane %v1097_v51, 4  ;;  %1392 = vmatpush1.bf16.msra.mxu1 %v1995_v43 }
  0xa3   : > { %v1170_v52 = vsel %vm2422_vm3, %v1981_v30, %v1169_v48  ;;  %v2062_v28 = vld [vmem:[#allocation2 + $0x54] ss:$24 sps:$4 sm:$0xff]   ;;  %v986_v41 = vld [vmem:[#allocation2 + $0x60] sm:$0x22]  ;;  %v1141_v60 = vsel %vm2360_vm5, %v1138_v55, %v1140_v53  ;;  %v1212_v61 = vpop.permute.xlu1 %1211  ;;  %v2064_v4 = vld [vmem:[#allocation2 + $0x50] ss:$24 sps:$4 sm:$0xff]  }
  0xa4   : > { %1171 = vst [vmem:[#allocation2 + $0x78] sm:$0x44] %v1170_v52  ;;  %v987_v63 = vsel %vm2338_vm12, %v1974_v44, %v986_v41  ;;  %1142 = vst [vmem:[#allocation2 + $0x78] sm:$0x11] %v1141_v60  ;;  %v1099_v1 = vsel %vm481_vm7, %v1097_v51, %v1098_v57  ;;  %v1213_v2 = vrot.slane %v1212_v61, 4  ;;  %1393 = vmatprep.subr.bf16.mxu1 %v2062_v28 }
  0xa5   : > { %988 = vst [vmem:[#allocation2 + $0x60] sm:$0x22] %v987_v63  ;;  %v1230_v5 = vld [vmem:[#allocation2 + $0x28] sm:$0xee]  ;;  %v1102_v6 = vsel %vm2234_vm2, %v1099_v1, %v1101_v50  ;;  %v2057_v7 = vpop.permute.xlu0 %2056  ;;  %v855_v39 = vld [vmem:[#allocation2 + $0x10] sm:$0x11] }
  0xa6   : > { %v1231_v8 = vsel %vm2254_vm4, 0, %v1230_v5  ;;  %1103 = vst [vmem:[#allocation2 + $0x70] sm:$0x88] %v1102_v6  ;;  %v1214_v11 = vsel %vm765_vm6, %v1212_v61, %v1213_v2  ;;  %v2059_v12 = vunpack.i.h.bf16 %v2057_v7  ;;  %v2058_v13 = vunpack.i.l.bf16 %v2057_v7  ;;  %1394 = vmatpush1.bf16.msra.mxu1 %v2064_v4  ;;  %v945_v49 = vld [vmem:[#allocation2 + $0x38] sm:$0x22] }
  0xa7   : > { %1232 = vst [vmem:[#allocation2 + $0x28] sm:$0xee] %v1231_v8  ;;  %v1051_v15 = vld [vmem:[#allocation2 + $0x70] sm:$0x11]  ;;  %v1217_v16 = vsel %vm2360_vm5, %v1214_v11, %v1216_v10  ;;  %v1070_v20 = vpop.permute.xlu1 %1069  ;;  %v925_v53 = vld [vmem:[#allocation2 + $0x38] sm:$0x11] }
  0xa8   : > { %v1052_v21 = vsel %vm2360_vm5, %v1976_v0, %v1051_v15  ;;  %1218 = vst [vmem:[#allocation2 + $0x28] sm:$0x11] %v1217_v16  ;;  %v1005_v22 = vrot.slane %v2059_v12, 4  ;;  %v1189_v19 = vrot.slane %v2058_v13, 4  ;;  %v1071_v24 = vrot.slane %v1070_v20, 4 }
  0xa9   : > { %1053 = vst [vmem:[#allocation2 + $0x70] sm:$0x11] %v1052_v21  ;;  %v1026_v25 = vpop.permute.xlu0 %1025  ;;  %1997 = vmatmul.mubr.msk.bf16.vlgmr.msra.gmra.mxu1 %vm1287_vm0, %v2558_v34  ;;  %v1030_v36 = vld [vmem:[#allocation2 + $0x60] sm:$0x88]  ;;  %v791_v0 = vld [vmem:[#allocation2 + $0x20] sm:$0x11] }
  0xaa   : > { %v1006_v26 = vsel %vm481_vm7, %v2059_v12, %v1005_v22  ;;  %v1190_v27 = vsel %vm481_vm7, %v2058_v13, %v1189_v19  ;;  %v1027_v29 = vrot.slane %v1026_v25, 4  ;;  %v1072_v30 = vsel %vm481_vm7, %v1070_v20, %v1071_v24  ;;  %1421 = vmatprep.mubr.bf16.mxu1 %v2106_v56  ;;  %v768_v5 = vld [vmem:[#allocation2 + $0x40] sm:$0x88]  ;;  %v794_v11 = vld [vmem:[%s2153_s19 + $0x18] sm:$0x11] }
  0xab   : > { %v1009_v31 = vsel %vm2422_vm3, %v1006_v26, %v1008_v17  ;;  %v1193_v32 = vsel %vm2437_vm15, %v1190_v27, %v1192_v18  ;;  %v1075_v33 = vsel %vm2338_vm12, %v1072_v30, %v1074_v23  ;;  %v851_v35 = vpop.permute.xlu1 %850  ;;  %v796_v23 = vshll.u32 %v794_v11, 16 }
  0xac   : > { %1010 = vst [vmem:[#allocation2 + $0x60] sm:$0x44] %v1009_v31  ;;  %1194 = vst [vmem:[#allocation2 + $0x78] sm:$0x88] %v1193_v32  ;;  %v1028_v38 = vsel %vm765_vm6, %v1026_v25, %v1027_v29  ;;  %v852_v42 = vrot.slane %v851_v35, 4 }
  0xad   : > { %1076 = vst [vmem:[#allocation2 + $0x70] sm:$0x22] %v1075_v33  ;;  %v1031_v43 = vsel %vm2437_vm15, %v1028_v38, %v1030_v36  ;;  %v1110_v58 = vpop.permute.xlu0 %1109  ;;  %v1114_v47 = vld [vmem:[#allocation2 + $0x70] sm:$0x88] }
  0xae   : > { %1032 = vst [vmem:[#allocation2 + $0x60] sm:$0x88] %v1031_v43  ;;  %v1111_v44 = vrot.slane %v1110_v58, 4  ;;  %v853_v45 = vsel %vm765_vm6, %v851_v35, %v852_v42 }
  0xaf   : > { %v856_v54 = vsel %vm2196_vm1, %v853_v45, %v855_v39  ;;  %v941_v46 = vpop.permute.xlu1 %940 }
  0xb0   : > { %v1112_v48 = vsel %vm765_vm6, %v1110_v58, %v1111_v44  ;;  %857 = vst [vmem:[#allocation2 + $0x10] sm:$0x11] %v856_v54  ;;  %v942_v50 = vrot.slane %v941_v46, 4 }
  0xb1   : > { %v1115_v51 = vsel %vm2437_vm15, %v1112_v48, %v1114_v47  ;;  %v921_v52 = vpop.permute.xlu0 %920  ;;  %1998 = vmatmul.mubr.msk.bf16.gmra.mxu1 %vm1287_vm0, %v2592_v14 }
  0xb2   : > { %1116 = vst [vmem:[#allocation2 + $0x70] sm:$0x88] %v1115_v51  ;;  %v922_v55 = vrot.slane %v921_v52, 4  ;;  %v943_v57 = vsel %vm765_vm6, %v941_v46, %v942_v50  ;;  %1581 = vmatprep.mubr.bf16.mxu1 %v2106_v56 }
  0xb3   : > { %v946_v28 = vsel %vm2204_vm8, %v943_v57, %v945_v49  ;;  %v787_v41 = vpop.permute.xlu1 %786  ;;  %v2069_v60 = vld [vmem:[#allocation2 + $0x78] ss:$-80 sps:$4 sm:$0xff]   ;;  %v2071_v61 = vld [vmem:[#allocation2 + $0x7c] ss:$-80 sps:$4 sm:$0xff]  }
  0xb4   : > { %v923_v63 = vsel %vm765_vm6, %v921_v52, %v922_v55  ;;  %947 = vst [vmem:[#allocation2 + $0x38] sm:$0x22] %v946_v28  ;;  %v788_v1 = vrot.slane %v787_v41, 4  ;;  %1561 = vmatprep.subr.bf16.mxu1 %v2071_v61 }
  0xb5   : > { %v926_v2 = vsel %vm2196_vm1, %v923_v63, %v925_v53  ;;  %v763_v4 = vpop.permute.xlu0 %762  ;;  %1562 = vmatpush1.bf16.msra.mxu1 %v2069_v60 }
  0xb6   : > { %927 = vst [vmem:[#allocation2 + $0x38] sm:$0x11] %v926_v2  ;;  %v764_v6 = vrot.slane %v763_v4, 4  ;;  %v789_v40 = vsel %vm765_vm6, %v787_v41, %v788_v1 }
  0xb7   : > { %v792_v7 = vsel %vm2196_vm1, %v789_v40, %v791_v0  ;;  %v931_v8 = vpop.permute.xlu1 %930  ;;  %v869_v20 = vld [vmem:[#allocation2 + $0x10] sm:$0x11] }
  0xb8   : > { %v766_v10 = vsel %vm765_vm6, %v763_v4, %v764_v6  ;;  %793 = vst [vmem:[#allocation2 + $0x20] sm:$0x11] %v792_v7  ;;  %v932_v12 = vrot.slane %v931_v8, 4 }
  0xb9   : > { %v769_v13 = vsel %vm2234_vm2, %v766_v10, %v768_v5  ;;  %v865_v15 = vpop.permute.xlu0 %864  ;;  %v2073_v16 = vld [vmem:[#allocation2 + $0x60] ss:$16 sps:$4 sm:$0xff]   ;;  %v2075_v17 = vld [vmem:[#allocation2 + $0x64] ss:$16 sps:$4 sm:$0xff]   ;;  %vm1671_vm2 = vcmask 7168  }
  0xba   : > { %770 = vst [vmem:[#allocation2 + $0x40] sm:$0x88] %v769_v13  ;;  %v866_v18 = vrot.slane %v865_v15, 4  ;;  %v933_v22 = vsel %vm765_vm6, %v931_v8, %v932_v12  ;;  %1563 = vmatprep.subr.bf16.mxu1 %v2075_v17 }
  0xbb   : > { %v948_v21 = vld [vmem:[#allocation2 + $0x38] sm:$0xee]  ;;  %v837_v37 = vpop.permute.xlu1 %836  ;;  %1564 = vmatpush1.bf16.msra.mxu1 %v2073_v16 }
  0xbc   : > { %v949_v19 = vsel %vm2254_vm4, 0, %v948_v21  ;;  %v867_v24 = vsel %vm765_vm6, %v865_v15, %v866_v18  ;;  %v838_v25 = vrot.slane %v837_v37, 4 }
  0xbd   : > { %950 = vst [vmem:[#allocation2 + $0x38] sm:$0xee] %v949_v19  ;;  %v870_v26 = vsel %vm2360_vm5, %v867_v24, %v869_v20  ;;  %v935_v27 = vld [vmem:[#allocation2 + $0x38] sm:$0x11]  ;;  %v775_v29 = vpop.permute.xlu0 %774 }
  0xbe   : > { %871 = vst [vmem:[#allocation2 + $0x10] sm:$0x11] %v870_v26  ;;  %v936_v30 = vsel %vm2360_vm5, %v933_v22, %v935_v27  ;;  %v776_v31 = vrot.slane %v775_v29, 4  ;;  %v839_v3 = vsel %vm765_vm6, %v837_v37, %v838_v25  ;;  %2009 = vmatmul.mubr.msk.bf16.vlgmr.msra.gmra.mxu1 %vm1287_vm0, %v2558_v34 }
  0xbf   : > { %v799_v32 = vld [vmem:[#allocation2 + $0x20] sm:$0x11]  ;;  %937 = vst [vmem:[#allocation2 + $0x38] sm:$0x11] %v936_v30  ;;  %v842_v33 = vsel %vm2437_vm15, %v839_v3, %v841_v59  ;;  %1591 = vmatprep.mubr.bf16.mxu1 %v2106_v56 }
  0xc0   : > { %v800_v35 = vsel %vm2360_vm5, %v796_v23, %v799_v32  ;;  %v777_v36 = vsel %vm765_vm6, %v775_v29, %v776_v31  ;;  %843 = vst [vmem:[#allocation2 + $0x20] sm:$0x88] %v842_v33 }
  0xc1   : > { %801 = vst [vmem:[#allocation2 + $0x20] sm:$0x11] %v800_v35  ;;  %v779_v38 = vld [vmem:[#allocation2 + $0x40] sm:$0x88] }
  0xc2   : > { %v780_v39 = vsel %vm2437_vm15, %v777_v36, %v779_v38 }
  0xc3   : > { %781 = vst [vmem:[#allocation2 + $0x40] sm:$0x88] %v780_v39 }
  0xc6   : > { %v2076_v42 = vld [vmem:[#allocation2 + $0x10] ss:$40 sps:$4 sm:$0xff]   ;;  %v2078_v43 = vld [vmem:[#allocation2 + $0x14] ss:$40 sps:$4 sm:$0xff]   ;;  %2010 = vmatmul.mubr.msk.bf16.gmra.mxu1 %vm1287_vm0, %v2592_v14 }
  0xc7   : > { %1476 = vmatprep.subr.bf16.mxu0 %v2078_v43 }
  0xc8   : > { %v1441_v58 = vld [vmem:[#allocation2 + $0x20] sm:$0xff]  ;;  %1477 = vmatpush1.bf16.msra.mxu0 %v2076_v42 }
  0xca   : > { %v1440_v9 = vld [vmem:[#allocation2 + $0x40] sm:$0xff] }
  0xcb   : > { %v1999_v44 = vcombine.low %v1440_v9, %v1441_v58  ;;  %v2000_v45 = vcombine.high %v1440_v9, %v1441_v58 }
  0xcd   : > { %1478 = vmatprep.subr.bf16.mxu0 %v2000_v45 }
  0xce   : > { %1479 = vmatpush1.bf16.msra.mxu0 %v1999_v44  ;;  %v2756_v47 = vpop.permute.xlu0 %1239 }
  0xd1   : > { %2003 = vmatmul.mubr.msk.bf16.vlgmr.msra.gmra.mxu0 %vm1287_vm0, %v2558_v34 }
  0xd2   : > { %1506 = vmatprep.mubr.bf16.mxu0 %v2106_v56 }
  0xd6   : > { %v2758_v49 = vpop.permute.xlu1 %1244 }
  0xd9   : > { %2004 = vmatmul.mubr.msk.bf16.gmra.mxu0 %vm1287_vm0, %v2592_v14 }
  0xda   : > { %v2778_v8 = vpop.permute.xlu0 %1254 }
  0xdf   : > { %v2762_v34 = vpop.permute.xlu1 %1249 }
 0x12c   : > { %v1328_v62 = vpop.f32.mrf.mxu0 }
 0x12d   : > { %v1329_v50 = vadd.f32 %v1328_v62, %v2756_v47 }
 0x12e   : > { %v1330_v54 = vpop.f32.mrf.mxu0 }
 0x12f   : > { %v1331_v51 = vadd.f32 %v1330_v54, %v2756_v47  ;;  %v1347_v14 = vmax.f32 %v1329_v50, 0.0 }
 0x130   : > { %v1332_v46 = vpop.f32.mrf.mxu0 }
 0x131   : > { %v1333_v55 = vadd.f32 %v1332_v46, %v2758_v49  ;;  %v1348_v61 = vmax.f32 %v1331_v51, 0.0 }
 0x132   : > { %v1334_v48 = vpop.f32.mrf.mxu0 }
 0x133   : > { %v1335_v28 = vadd.f32 %v1334_v48, %v2758_v49  ;;  %v1349_v6 = vmax.f32 %v1333_v55, 0.0 }
 0x134   : > { %v1338_v53 = vpop.f32.mrf.mxu0 }
 0x135   : > { %v1339_v1 = vadd.f32 %v1338_v53, %v2762_v34  ;;  %v1350_v7 = vmax.f32 %v1335_v28, 0.0 }
 0x136   : > { %v1340_v0 = vpop.f32.mrf.mxu0 }
 0x137   : > { %v1341_v13 = vadd.f32 %v1340_v0, %v2762_v34  ;;  %v1351_v17 = vmax.f32 %v1339_v1, 0.0 }
 0x138   : > { %v1342_v16 = vpop.f32.mrf.mxu0 }
 0x139   : > { %v1343_v22 = vadd.f32 %v1342_v16, %v2778_v8  ;;  %v1352_v59 = vmax.f32 %v1341_v13, 0.0 }
 0x13a   : > { %v2823_v51 = vpop.f32.mrf.mxu0 }
 0x13b   : > { %v1353_v30 = vmax.f32 %v1343_v22, 0.0  ;;  %v1610_v22 = vlaneseq }
 0x169   : > { %v1413_v52 = vpop.f32.mrf.mxu1 }
 0x16a   : > { %v2765_v56 = vadd.f32 %v1413_v52, %v2756_v47 }
 0x16b   : > { %v1415_v57 = vpop.f32.mrf.mxu1 }
 0x16c   : > { %v1432_v41 = vmax.f32 %v2765_v56, 0.0  ;;  %v2771_v60 = vadd.f32 %v1415_v57, %v2756_v47 }
 0x16d   : > { %v1417_v63 = vpop.f32.mrf.mxu1 }
 0x16e   : > { %v1433_v2 = vmax.f32 %v2771_v60, 0.0  ;;  %v1418_v4 = vadd.f32 %v1417_v63, %v2758_v49  ;;  %v2776_v5 = vmax.f32 %v1347_v14, %v1432_v41 }
 0x16f   : > { %v1419_v40 = vpop.f32.mrf.mxu1 }
 0x170   : > { %v1420_v10 = vadd.f32 %v1419_v40, %v2758_v49  ;;  %v1434_v11 = vmax.f32 %v1418_v4, 0.0  ;;  %v2781_v12 = vmax.f32 %v1348_v61, %v1433_v2 }
 0x171   : > { %v1423_v15 = vpop.f32.mrf.mxu1 }
 0x172   : > { %v1435_v18 = vmax.f32 %v1420_v10, 0.0  ;;  %v1424_v20 = vadd.f32 %v1423_v15, %v2762_v34  ;;  %v2785_v21 = vmax.f32 %v1349_v6, %v1434_v11 }
 0x173   : > { %v1425_v37 = vpop.f32.mrf.mxu1 }
 0x174   : > { %v2788_v19 = vmax.f32 %v1350_v7, %v1435_v18  ;;  %v1436_v23 = vmax.f32 %v1424_v20, 0.0  ;;  %v1426_v24 = vadd.f32 %v1425_v37, %v2762_v34  ;;  %v1611_v37 = vand.u32 127, %v1610_v22 }
 0x175   : > { %v1427_v25 = vpop.f32.mrf.mxu1 }
 0x176   : > { %v1437_v26 = vmax.f32 %v1426_v24, 0.0  ;;  %v1428_v27 = vadd.f32 %v1427_v25, %v2778_v8  ;;  %v2792_v29 = vmax.f32 %v1351_v17, %v1436_v23  ;;  %v1617_v24 = vand.u32 31, %v1611_v37 }
 0x177   : > { %v1429_v33 = vpop.f32.mrf.mxu1  ;;  %vm1781_vm8 = vcmp.lt.s32.totalorder %v1611_v37, 32 }
 0x178   : > { %v1438_v31 = vmax.f32 %v1428_v27, 0.0  ;;  %v2794_v3 = vmax.f32 %v1352_v59, %v1437_v26  ;;  %v2840_v1 = vadd.f32 %v1429_v33, %v2778_v8  ;;  %vm2866_vm1 = vcmp.eq.s32.totalorder %v1617_v24, 0 }
 0x17a   : > { %v2796_v32 = vmax.f32 %v1353_v30, %v1438_v31 }
 0x17e   : > { %v1583_v35 = vpop.f32.mrf.mxu1 }
 0x17f   : > { %v2799_v36 = vadd.f32 %v1583_v35, %v2756_v47 }
 0x180   : > { %v1585_v38 = vpop.f32.mrf.mxu1 }
 0x181   : > { %v1602_v39 = vmax.f32 %v2799_v36, 0.0  ;;  %v1586_v53 = vadd.f32 %v1585_v38, %v2756_v47 }
 0x182   : > { %v1587_v42 = vpop.f32.mrf.mxu1 }
 0x183   : > { %v2803_v43 = vadd.f32 %v1587_v42, %v2758_v49  ;;  %1724 = vrot.lane.b32.xlu1 %v1602_v39, %s2107_s8  ;;  %v1603_v57 = vmax.f32 %v1586_v53, 0.0 }
 0x184   : > { %v1589_v58 = vpop.f32.mrf.mxu1 }
 0x185   : > { %v1604_v9 = vmax.f32 %v2803_v43, 0.0  ;;  %v1590_v28 = vadd.f32 %v1589_v58, %v2758_v49  ;;  %v1612_v43 = vadd.s32 128, %v1611_v37 }
 0x186   : > { %v1593_v44 = vpop.f32.mrf.mxu1 }
 0x187   : > { %v2810_v45 = vadd.f32 %v1593_v44, %v2762_v34  ;;  %1728 = vrot.lane.b32.xlu0 %v1604_v9, %s2107_s8 }
 0x188   : > { %v1595_v62 = vpop.f32.mrf.mxu1 }
 0x189   : > { %v1606_v54 = vmax.f32 %v2810_v45, 0.0  ;;  %v1596_v4 = vadd.f32 %v1595_v62, %v2762_v34 }
 0x18a   : > { %v1597_v46 = vpop.f32.mrf.mxu1 }
 0x18b   : > { %v2817_v48 = vadd.f32 %v1597_v46, %v2778_v8  ;;  %1732 = vrot.lane.b32.xlu1 %v1606_v54, %s2107_s8  ;;  %v1607_v13 = vmax.f32 %v1596_v4, 0.0 }
 0x18c   : > { %v1599_v16 = vpop.f32.mrf.mxu1 }
 0x18d   : > { %v1608_v50 = vmax.f32 %v2817_v48, 0.0 }
 0x18f   : > { %1736 = vrot.lane.b32.xlu0 %v1608_v50, %s2107_s8  ;;  %1655 = vrot.lane.b32.xlu1 %v1432_v41, %s2107_s8 }
 0x191   : > { %v1498_v52 = vpop.f32.mrf.mxu0 }
 0x193   : > { %v1500_v56 = vpop.f32.mrf.mxu0  ;;  %1657 = vrot.lane.b32.xlu0 %v1433_v2, %s2107_s8  ;;  %1659 = vrot.lane.b32.xlu1 %v1434_v11, %s2107_s8  ;;  %v1605_v2 = vmax.f32 %v1590_v28, 0.0  ;;  %v1439_v11 = vmax.f32 %v2840_v1, 0.0  ;;  %v1624_v28 = vand.u32 31, %v1612_v43 }
 0x194   : > { %v1501_v14 = vadd.f32 %v1500_v56, %v2756_v47 }
 0x195   : > { %v1502_v55 = vpop.f32.mrf.mxu0  ;;  %vm2925_vm4 = vcmp.eq.s32.totalorder %v1624_v28, 0 }
 0x196   : > { %v1518_v60 = vmax.f32 %v1501_v14, 0.0  ;;  %v1503_v59 = vadd.f32 %v1502_v55, %v2758_v49 }
 0x197   : > { %v1504_v61 = vpop.f32.mrf.mxu0  ;;  %1661 = vrot.lane.b32.xlu0 %v1435_v18, %s2107_s8  ;;  %1663 = vrot.lane.b32.xlu1 %v1436_v23, %s2107_s8  ;;  %v2856_v18 = vadd.f32 %v1599_v16, %v2778_v8  ;;  %v1499_v23 = vadd.f32 %v1498_v52, %v2756_v47 }
 0x198   : > { %v2834_v63 = vmax.f32 %v1518_v60, %v1603_v57  ;;  %v1505_v41 = vadd.f32 %v1504_v61, %v2758_v49  ;;  %v1519_v27 = vmax.f32 %v1503_v59, 0.0 }
 0x199   : > { %v1508_v0 = vpop.f32.mrf.mxu0  ;;  %v1609_v20 = vmax.f32 %v2856_v18, 0.0  ;;  %v1517_v25 = vmax.f32 %v1499_v23, 0.0 }
 0x19a   : > { %v1520_v6 = vmax.f32 %v1505_v41, 0.0  ;;  %v1509_v33 = vadd.f32 %v1508_v0, %v2762_v34  ;;  %v1710_v42 = vmax.f32 %v1519_v27, %v1604_v9 }
 0x19b   : > { %v1510_v40 = vpop.f32.mrf.mxu0  ;;  %1665 = vrot.lane.b32.xlu0 %v1437_v26, %s2107_s8  ;;  %1667 = vrot.lane.b32.xlu1 %v1438_v31, %s2107_s8  ;;  %v1708_v31 = vmax.f32 %v1517_v25, %v1602_v39  ;;  %v1345_v25 = vadd.f32 %v2823_v51, %v2778_v8 }
 0x19c   : > { %v2843_v7 = vmax.f32 %v1520_v6, %v1605_v2  ;;  %v1511_v10 = vadd.f32 %v1510_v40, %v2762_v34  ;;  %v1521_v44 = vmax.f32 %v1509_v33, 0.0 }
 0x19d   : > { %v1512_v35 = vpop.f32.mrf.mxu0 }
 0x19e   : > { %v1522_v15 = vmax.f32 %v1511_v10, 0.0  ;;  %v1513_v36 = vadd.f32 %v1512_v35, %v2778_v8  ;;  %v1712_v52 = vmax.f32 %v1521_v44, %v1606_v54 }
 0x19f   : > { %1669 = vrot.lane.b32.xlu0 %v1439_v11, %s2107_s8  ;;  %1726 = vrot.lane.b32.xlu1 %v1603_v57, %s2107_s8 }
 0x1a0   : > { %v2849_v17 = vmax.f32 %v1522_v15, %v1607_v13  ;;  %v1523_v53 = vmax.f32 %v1513_v36, 0.0 }
 0x1a2   : > { %v1714_v45 = vmax.f32 %v1523_v53, %v1608_v50 }
 0x1a3   : > { %1730 = vrot.lane.b32.xlu0 %v1605_v2, %s2107_s8  ;;  %1734 = vrot.lane.b32.xlu1 %v1607_v13, %s2107_s8 }
 0x1a7   : > { %1738 = vrot.lane.b32.xlu0 %v1609_v20, %s2107_s8 }
 0x1f5   : > { %v2870_v30 = vpop.permute.xlu1 %1724 }
 0x1f6   : > { %v1752_v47 = vsel %vm1671_vm2, 0.0, %v2870_v30 }
 0x1f7   : > { %v1756_v49 = vsel %vm2866_vm1, 0.0, %v1752_v47 }
 0x1f8   : > { %v2879_v38 = vmax.f32 %v1708_v31, %v1756_v49 }
 0x1f9   : > { %v2883_v58 = vpop.permute.xlu0 %1728 }
 0x1fa   : > { %v1753_v34 = vsel %vm1671_vm2, 0.0, %v2883_v58  ;;  %v1788_v39 = vsel %vm1781_vm8, 0.0, %v2879_v38 }
 0x1fb   : > { %v1758_v62 = vsel %vm2866_vm1, 0.0, %v1753_v34  ;;  %1796 = vrot.lane.b32.xlu1 %v1788_v39, %s2108_s9  ;;  %v1514_v39 = vpop.f32.mrf.mxu0 }
 0x1fc   : > { %v2893_v46 = vmax.f32 %v1710_v42, %v1758_v62 }
 0x1fd   : > { %v2895_v9 = vpop.permute.xlu1 %1732 }
 0x1fe   : > { %v1754_v56 = vsel %vm1671_vm2, 0.0, %v2895_v9  ;;  %v1789_v14 = vsel %vm1781_vm8, 0.0, %v2893_v46 }
 0x1ff   : > { %v1760_v55 = vsel %vm2866_vm1, 0.0, %v1754_v56  ;;  %1798 = vrot.lane.b32.xlu0 %v1789_v14, %s2108_s9  ;;  %v1515_v56 = vadd.f32 %v1514_v39, %v2778_v8 }
 0x200   : > { %v2906_v57 = vmax.f32 %v1712_v52, %v1760_v55 }
 0x201   : > { %v2908_v60 = vpop.permute.xlu0 %1736  ;;  %v1656_v61 = vpop.permute.xlu1 %1655 }
 0x202   : > { %v1755_v54 = vsel %vm1671_vm2, 0.0, %v2908_v60  ;;  %v1684_v41 = vsel %vm1671_vm2, 0.0, %v1656_v61  ;;  %v1790_v0 = vsel %vm1781_vm8, 0.0, %v2906_v57 }
 0x203   : > { %v1762_v2 = vsel %vm2866_vm1, 0.0, %v1755_v54  ;;  %v1692_v4 = vsel %vm2866_vm1, 0.0, %v1684_v41  ;;  %1800 = vrot.lane.b32.xlu1 %v1790_v0, %s2108_s9 }
 0x204   : > { %v2923_v6 = vmax.f32 %v2776_v5, %v1692_v4  ;;  %v2929_v50 = vmax.f32 %v1714_v45, %v1762_v2 }
 0x205   : > { %v1658_v40 = vpop.permute.xlu0 %1657  ;;  %v1660_v10 = vpop.permute.xlu1 %1659 }
 0x206   : > { %v1672_v13 = vsel %vm1671_vm2, %v1656_v61, %v1658_v40  ;;  %v1685_v15 = vsel %vm1671_vm2, 0.0, %v1660_v10  ;;  %v1791_v16 = vsel %vm1781_vm8, 0.0, %v2929_v50  ;;  %v1772_v22 = vmax.f32 %v2923_v6, %v2879_v38 }
 0x207   : > { %v1693_v5 = vsel %vm2925_vm4, 0.0, %v1672_v13  ;;  %v1694_v23 = vsel %vm2866_vm1, 0.0, %v1685_v15  ;;  %1802 = vrot.lane.b32.xlu0 %v1791_v16, %s2108_s9  ;;  %v1354_v38 = vmax.f32 %v1345_v25, 0.0  ;;  %v1524_v61 = vmax.f32 %v1515_v56, 0.0 }
 0x208   : > { %v1701_v24 = vmax.f32 %v2781_v12, %v1693_v5  ;;  %v1702_v59 = vmax.f32 %v2785_v21, %v1694_v23 }
 0x209   : > { %v1662_v37 = vpop.permute.xlu0 %1661  ;;  %v1664_v27 = vpop.permute.xlu1 %1663  ;;  %v1646_v43 = vmax.f32 %v1354_v38, %v1439_v11  ;;  %v1715_v4 = vmax.f32 %v1524_v61, %v1609_v20 }
 0x20a   : > { %v1673_v31 = vsel %vm1671_vm2, %v1660_v10, %v1662_v37  ;;  %v1686_v33 = vsel %vm1671_vm2, 0.0, %v1664_v27  ;;  %v1774_v47 = vmax.f32 %v1702_v59, %v2893_v46 }
 0x20b   : > { %v1695_v35 = vsel %vm2925_vm4, 0.0, %v1673_v31  ;;  %v1696_v49 = vsel %vm2866_vm1, 0.0, %v1686_v33 }
 0x20c   : > { %v1703_v12 = vmax.f32 %v2788_v19, %v1695_v35  ;;  %v1704_v21 = vmax.f32 %v2792_v29, %v1696_v49 }
 0x20d   : > { %v1666_v51 = vpop.permute.xlu0 %1665  ;;  %v1668_v42 = vpop.permute.xlu1 %1667 }
 0x20e   : > { %v1674_v44 = vsel %vm1671_vm2, %v1664_v27, %v1666_v51  ;;  %v1687_v36 = vsel %vm1671_vm2, 0.0, %v1668_v42  ;;  %v1776_v34 = vmax.f32 %v1704_v21, %v2906_v57 }
 0x20f   : > { %v1697_v62 = vsel %vm2925_vm4, 0.0, %v1674_v44  ;;  %v1698_v46 = vsel %vm2866_vm1, 0.0, %v1687_v36 }
 0x210   : > { %v1705_v19 = vmax.f32 %v2794_v3, %v1697_v62  ;;  %v1706_v29 = vmax.f32 %v2796_v32, %v1698_v46 }
 0x211   : > { %v1670_v52 = vpop.permute.xlu0 %1669  ;;  %v1727_v53 = vpop.permute.xlu1 %1726 }
 0x212   : > { %v1675_v14 = vsel %vm1671_vm2, %v1668_v42, %v1670_v52  ;;  %v1740_v55 = vsel %vm1671_vm2, %v2870_v30, %v1727_v53  ;;  %v1778_v57 = vmax.f32 %v1706_v29, %v2929_v50 }
 0x213   : > { %v1699_v26 = vsel %vm2925_vm4, 0.0, %v1675_v14  ;;  %v1757_v3 = vsel %vm2925_vm4, 0.0, %v1740_v55 }
 0x214   : > { %v1707_v32 = vmax.f32 %v1646_v43, %v1699_v26  ;;  %v1765_v1 = vmax.f32 %v2834_v63, %v1757_v3 }
 0x215   : > { %v1731_v11 = vpop.permute.xlu0 %1730  ;;  %v1735_v28 = vpop.permute.xlu1 %1734 }
 0x216   : > { %v1741_v8 = vsel %vm1671_vm2, %v2883_v58, %v1731_v11  ;;  %v1742_v30 = vsel %vm1671_vm2, %v2895_v9, %v1735_v28  ;;  %v1773_v45 = vmax.f32 %v1701_v24, %v1765_v1 }
 0x217   : > { %v1759_v54 = vsel %vm2925_vm4, 0.0, %v1741_v8  ;;  %v1761_v41 = vsel %vm2925_vm4, 0.0, %v1742_v30 }
 0x218   : > { %v1767_v0 = vmax.f32 %v2843_v7, %v1759_v54  ;;  %v1769_v63 = vmax.f32 %v2849_v17, %v1761_v41 }
 0x219   : > { %v1739_v2 = vpop.permute.xlu0 %1738 }
 0x21a   : > { %v1743_v58 = vsel %vm1671_vm2, %v2908_v60, %v1739_v2  ;;  %v1775_v6 = vmax.f32 %v1703_v12, %v1767_v0  ;;  %v1777_v9 = vmax.f32 %v1705_v19, %v1769_v63 }
 0x21b   : > { %v1763_v50 = vsel %vm2925_vm4, 0.0, %v1743_v58 }
 0x21c   : > { %v1771_v40 = vmax.f32 %v1715_v4, %v1763_v50 }
 0x21e   : > { %v1779_v10 = vmax.f32 %v1707_v32, %v1771_v40 }
 0x26d   : > { %v1797_v13 = vpop.permute.xlu1 %1796 }
 0x26e   : > { %v1808_v15 = vmax.f32 %v1772_v22, %v1797_v13  ;;  %v1809_v16 = vmax.f32 %v1773_v45, %v1797_v13 }
 0x270   : > { %1826 = vrot.lane.b32.xlu0 %v1809_v16, %s2104_s21  ;;  %1824 = vrot.lane.b32.xlu1 %v1808_v15, %s2104_s21 }
 0x271   : > { %v1799_v7 = vpop.permute.xlu0 %1798 }
 0x272   : > { %v1810_v17 = vmax.f32 %v1774_v47, %v1799_v7  ;;  %v1811_v18 = vmax.f32 %v1775_v6, %v1799_v7 }
 0x274   : > { %1830 = vrot.lane.b32.xlu0 %v1811_v18, %s2104_s21  ;;  %1828 = vrot.lane.b32.xlu1 %v1810_v17, %s2104_s21 }
 0x275   : > { %v1801_v20 = vpop.permute.xlu1 %1800 }
 0x276   : > { %v1812_v60 = vmax.f32 %v1776_v34, %v1801_v20  ;;  %v1813_v48 = vmax.f32 %v1777_v9, %v1801_v20 }
 0x278   : > { %1834 = vrot.lane.b32.xlu0 %v1813_v48, %s2104_s21  ;;  %1832 = vrot.lane.b32.xlu1 %v1812_v60, %s2104_s21 }
 0x279   : > { %v1803_v22 = vpop.permute.xlu0 %1802 }
 0x27a   : > { %v1814_v5 = vmax.f32 %v1778_v57, %v1803_v22  ;;  %v1815_v23 = vmax.f32 %v1779_v10, %v1803_v22 }
 0x27c   : > { %1838 = vrot.lane.b32.xlu0 %v1815_v23, %s2104_s21  ;;  %1836 = vrot.lane.b32.xlu1 %v1814_v5, %s2104_s21 }
 0x2e2   : > { %v1827_v24 = vpop.permute.xlu0 %1826  ;;  %v1825_v59 = vpop.permute.xlu1 %1824 }
 0x2e3   : > { %v1841_v25 = vsel %vm765_vm6, %v1825_v59, %v1827_v24 }
 0x2e4   : > { %1849 = vst [vmem:[%s204_s17] sm:$0xff] %v1841_v25 }
 0x2e6   : > { %v1831_v37 = vpop.permute.xlu0 %1830  ;;  %v1829_v27 = vpop.permute.xlu1 %1828 }
 0x2e7   : > { %v1842_v31 = vsel %vm765_vm6, %v1829_v27, %v1831_v37 }
 0x2e8   : > { %1850 = vst [vmem:[%s204_s17 + $0x8] sm:$0xff] %v1842_v31 }
 0x2ea   : > { %v1835_v33 = vpop.permute.xlu0 %1834  ;;  %v1833_v47 = vpop.permute.xlu1 %1832 }
 0x2eb   : > { %v1843_v35 = vsel %vm765_vm6, %v1833_v47, %v1835_v33 }
 0x2ec   : > { %1851 = vst [vmem:[%s204_s17 + $0x10] sm:$0xff] %v1843_v35 }
 0x2ee   : > { %v1839_v49 = vpop.permute.xlu0 %1838  ;;  %v1837_v12 = vpop.permute.xlu1 %1836 }
 0x2ef   : > { %v1844_v21 = vsel %vm765_vm6, %v1837_v12, %v1839_v49 }
 0x2f0   : > { %1852 = vst [vmem:[%s204_s17 + $0x18] sm:$0xff] %v1844_v21 }
 0x2f1 PF: > { %s13_s14 = sadd.s32 1, %s2101_s14   ;;  %s3088_s12 = smov %s2097_s13 }
 0x2f2   : > { %p10_p5 = scmp.ge.s32.totalorder %s13_s14, 4   ;;  %s3089_s13 = smov %s3091_s15 }
 0x2f4   :  { %12 = sbr.rel (!%p10_p5) target bundleno = 2 (0x2), region = 65 }

</bundles_post_ra>
